<compile_context>
chip_gen: v5e
topology: v5e:2x2
jax: 0.10.0
libtpu: 0.0.40
codegen_flags: <defaults>
</compile_context>

<pallas_src>
import math

import jax
import jax.numpy as jnp
from jax.experimental import pallas as pl
from jax.experimental.pallas import tpu as pltpu


# -----------------------------------------------------------------------------------------
# Small, TPU-friendly stand-in config for timm vit_base_patch16_224
# (embed_dim=128 keeps the lane axis dense; depth/heads reduced for the demo).
# -----------------------------------------------------------------------------------------
IMG_SIZE = 32
PATCH_SIZE = 8
IN_CHANS = 3
EMBED_DIM = 128          # multiple of 128 -> lane-dense vreg stores
DEPTH = 2
NUM_HEADS = 4
MLP_RATIO = 4
EPS = 1e-6


# -----------------------------------------------------------------------------------------
# Shared math (used both inside the Pallas kernel and by the plain-JAX reference so the
# numerics match bit-for-bit up to MXU-vs-XLA accumulation order).
# -----------------------------------------------------------------------------------------
def bf16_dot(a, b):
    """MXU matmul: bf16 operands, f32 accumulation."""
    return jnp.dot(a.astype(jnp.bfloat16), b.astype(jnp.bfloat16),
                   preferred_element_type=jnp.float32)


def bf16_dot_nt(a, b):
    """a @ b.T (contract last dims) with bf16 operands / f32 accumulation."""
    return jax.lax.dot_general(
        a.astype(jnp.bfloat16), b.astype(jnp.bfloat16),
        dimension_numbers=(((1,), (1,)), ((), ())),
        preferred_element_type=jnp.float32)


def layer_norm(x, g, b, eps=EPS):
    mu = jnp.mean(x, axis=-1, keepdims=True)
    c = x - mu
    var = jnp.mean(c * c, axis=-1, keepdims=True)
    return c * jax.lax.rsqrt(var + eps) * g + b


def attention(x, qkv_w, qkv_b, proj_w, proj_b, *, num_heads):
    t, d = x.shape
    dh = d // num_heads
    scale = dh ** -0.5
    qkv = bf16_dot(x, qkv_w) + qkv_b                          # (T, 3D) f32
    out = jnp.zeros_like(x)
    for h in range(num_heads):
        q = qkv[:, h * dh:(h + 1) * dh] * scale               # (T, dh)
        k = qkv[:, d + h * dh:d + (h + 1) * dh]
        v = qkv[:, 2 * d + h * dh:2 * d + (h + 1) * dh]
        s = bf16_dot_nt(q, k)                                  # (T, T)
        s = s - jnp.max(s, axis=-1, keepdims=True)
        p = jnp.exp(s)
        p = p / jnp.sum(p, axis=-1, keepdims=True)
        head = bf16_dot(p, v)                                  # (T, dh)
        # concat(heads) @ proj_w == sum_h head_h @ proj_w[h*dh:(h+1)*dh, :]  (avoids concat)
        out = out + bf16_dot(head, proj_w[h * dh:(h + 1) * dh, :])
    return out + proj_b


def mlp(x, fc1_w, fc1_b, fc2_w, fc2_b):
    h = bf16_dot(x, fc1_w) + fc1_b
    # TODO(synk): timm's default GELU is exact (erf); tanh-approximate GELU is used here.
    h = jax.nn.gelu(h, approximate=True)
    return bf16_dot(h, fc2_w) + fc2_b


def encoder_block(x, ln1_g, ln1_b, qkv_w, qkv_b, proj_w, proj_b,
                  ln2_g, ln2_b, fc1_w, fc1_b, fc2_w, fc2_b, *, num_heads, eps=EPS):
    x = x + attention(layer_norm(x, ln1_g, ln1_b, eps),
                      qkv_w, qkv_b, proj_w, proj_b, num_heads=num_heads)
    x = x + mlp(layer_norm(x, ln2_g, ln2_b, eps), fc1_w, fc1_b, fc2_w, fc2_b)
    return x


# -----------------------------------------------------------------------------------------
# Input preparation (pure layout work, done in the JAX wrapper).
# -----------------------------------------------------------------------------------------
def _extract_patches(x, patch_size):
    b, c, hh, ww = x.shape
    hp, wp = hh // patch_size, ww // patch_size
    x = x.reshape(b, c, hp, patch_size, wp, patch_size)
    x = x.transpose(0, 2, 4, 1, 3, 5)                 # (B, hp, wp, C, P, P)
    return x.reshape(b, hp * wp, c * patch_size * patch_size)


def _prep_inputs(x, params, patch_size):
    """Patch extraction + 'cls-token-as-zero-patch' trick.

    tokens = patches_ext @ patch_w + patch_b + pos_eff, where row 0 of patches_ext is zeros
    and pos_eff[0] folds in (cls - patch_b). This lets the kernel build the full [T, D]
    token sequence with a single matmul + add (no in-kernel concatenation).
    """
    b = x.shape[0]
    n = params['pos'].shape[0] - 1
    cpp = params['patch_w'].shape[0]
    d = params['patch_w'].shape[1]
    patches = _extract_patches(x, patch_size)                               # (B, N, Cpp)
    patches_ext = jnp.concatenate(
        [jnp.zeros((b, 1, cpp), patches.dtype), patches], axis=1)           # (B, T, Cpp)
    patches_ext = patches_ext.astype(jnp.bfloat16)                          # halve DMA bytes
    cls_row = params['cls'] - params['patch_b']                             # (1, D)
    pos_eff = params['pos'] + jnp.concatenate(
        [cls_row, jnp.zeros((n, d), jnp.float32)], axis=0)                  # (T, D)
    return patches_ext, pos_eff


def _split_outputs(features):
    b, t, d = features.shape
    n = t - 1
    hp = wp = int(round(math.sqrt(n)))
    cls_token = features[:, 0]
    patch_tokens = features[:, 1:]
    patch_tokens_2d = jnp.transpose(patch_tokens, (0, 2, 1)).reshape(b, d, hp, wp)
    return cls_token, patch_tokens, patch_tokens_2d


# -----------------------------------------------------------------------------------------
# Pallas forward
# -----------------------------------------------------------------------------------------
def vit_backbone_forward(x, params, *, patch_size=PATCH_SIZE, num_heads=NUM_HEADS, eps=EPS):
    """x: [B, C, H, W] f32 -> (cls_token [B,D], patch_tokens [B,N,D], patch_tokens_2d [B,D,h,w])."""
    B = x.shape[0]
    patches_ext, pos_eff = _prep_inputs(x, params, patch_size)
    _, T, Cpp = patches_ext.shape
    D = params['patch_w'].shape[1]
    L = params['qkv_w'].shape[0]
    Hm = params['fc1_w'].shape[-1]

    def kernel(patches_ref, pos_ref, pw_ref, pb_ref,
               ln1_g_ref, ln1_b_ref, qkv_w_ref, qkv_b_ref,
               proj_w_ref, proj_b_ref, ln2_g_ref, ln2_b_ref,
               fc1_w_ref, fc1_b_ref, fc2_w_ref, fc2_b_ref,
               norm_g_ref, norm_b_ref, out_ref, x_res):
        l = pl.program_id(1)

        # Layer 0: patch embedding + cls + positional embedding into the residual stream
        # (VMEM scratch, carried across the depth axis of the grid).
        @pl.when(l == 0)
        def _embed():
            x_res[...] = (bf16_dot(patches_ref[0], pw_ref[...])
                          + pb_ref[...] + pos_ref[...])

        # One transformer encoder block per grid step along the depth axis.
        x_res[...] = encoder_block(
            x_res[...],
            ln1_g_ref[0], ln1_b_ref[0], qkv_w_ref[0], qkv_b_ref[0],
            proj_w_ref[0], proj_b_ref[0],
            ln2_g_ref[0], ln2_b_ref[0], fc1_w_ref[0], fc1_b_ref[0],
            fc2_w_ref[0], fc2_b_ref[0],
            num_heads=num_heads, eps=eps)

        # Final LayerNorm + lane-dense (D = 128) store of the full token sequence.
        @pl.when(l == pl.num_programs(1) - 1)
        def _finalize():
            out_ref[0] = layer_norm(x_res[...], norm_g_ref[...], norm_b_ref[...],
                                    eps).astype(out_ref.dtype)

    per_layer = lambda b, l: (l, 0, 0)      # streamed (double-buffered) per layer
    const2 = lambda b, l: (0, 0)            # resident in VMEM across all grid steps

    in_specs = [
        pl.BlockSpec((1, T, Cpp), lambda b, l: (b, 0, 0)),   # patches (per batch element)
        pl.BlockSpec((T, D), const2),                        # pos_eff
        pl.BlockSpec((Cpp, D), const2),                      # patch_w
        pl.BlockSpec((1, D), const2),                        # patch_b
        pl.BlockSpec((1, 1, D), per_layer),                  # ln1_g
        pl.BlockSpec((1, 1, D), per_layer),                  # ln1_b
        pl.BlockSpec((1, D, 3 * D), per_layer),              # qkv_w
        pl.BlockSpec((1, 1, 3 * D), per_layer),              # qkv_b
        pl.BlockSpec((1, D, D), per_layer),                  # proj_w
        pl.BlockSpec((1, 1, D), per_layer),                  # proj_b
        pl.BlockSpec((1, 1, D), per_layer),                  # ln2_g
        pl.BlockSpec((1, 1, D), per_layer),                  # ln2_b
        pl.BlockSpec((1, D, Hm), per_layer),                 # fc1_w
        pl.BlockSpec((1, 1, Hm), per_layer),                 # fc1_b
        pl.BlockSpec((1, Hm, D), per_layer),                 # fc2_w
        pl.BlockSpec((1, 1, D), per_layer),                  # fc2_b
        pl.BlockSpec((1, D), const2),                        # norm_g
        pl.BlockSpec((1, D), const2),                        # norm_b
    ]

    args = (patches_ext, pos_eff, params['patch_w'], params['patch_b'],
            params['ln1_g'], params['ln1_b'], params['qkv_w'], params['qkv_b'],
            params['proj_w'], params['proj_b'], params['ln2_g'], params['ln2_b'],
            params['fc1_w'], params['fc1_b'], params['fc2_w'], params['fc2_b'],
            params['norm_g'], params['norm_b'])

    # Advisory cost estimate so XLA can overlap this custom call with surrounding work.
    flops_per_b = (2 * T * Cpp * D
                   + L * (2 * T * D * (3 * D)        # qkv
                          + 2 * 2 * T * T * D        # q@k^T and p@v (all heads)
                          + 2 * T * D * D            # proj
                          + 2 * 2 * T * D * Hm))     # fc1 + fc2
    transcendentals = B * L * (T * T + T * Hm)       # softmax exp + gelu tanh
    bytes_accessed = sum(int(a.size) * a.dtype.itemsize for a in args) + B * T * D * 4

    features = pl.pallas_call(
        kernel,
        out_shape=jax.ShapeDtypeStruct((B, T, D), jnp.float32),
        grid=(B, L),
        in_specs=in_specs,
        out_specs=pl.BlockSpec((1, T, D), lambda b, l: (b, 0, 0)),
        scratch_shapes=[pltpu.VMEM((T, D), jnp.float32)],    # residual-stream accumulator
        compiler_params=pltpu.CompilerParams(
            dimension_semantics=("parallel", "arbitrary")),  # batch across TCs, depth carried
        cost_estimate=pl.CostEstimate(
            flops=int(B * flops_per_b),
            transcendentals=int(transcendentals),
            bytes_accessed=int(bytes_accessed)),
    )(*args)

    return _split_outputs(features)


# -----------------------------------------------------------------------------------------
# Plain-JAX reference (same bf16-operand / f32-accumulate math as the kernel).
# -----------------------------------------------------------------------------------------
def vit_backbone_reference(x, params, *, patch_size=PATCH_SIZE, num_heads=NUM_HEADS, eps=EPS):
    B = x.shape[0]
    patches_ext, pos_eff = _prep_inputs(x, params, patch_size)
    L = params['qkv_w'].shape[0]
    feats = []
    for b in range(B):
        tok = bf16_dot(patches_ext[b], params['patch_w']) + params['patch_b'] + pos_eff
        for l in range(L):
            tok = encoder_block(
                tok,
                params['ln1_g'][l], params['ln1_b'][l],
                params['qkv_w'][l], params['qkv_b'][l],
                params['proj_w'][l], params['proj_b'][l],
                params['ln2_g'][l], params['ln2_b'][l],
                params['fc1_w'][l], params['fc1_b'][l],
                params['fc2_w'][l], params['fc2_b'][l],
                num_heads=num_heads, eps=eps)
        feats.append(layer_norm(tok, params['norm_g'], params['norm_b'], eps))
    return _split_outputs(jnp.stack(feats, axis=0))


# -----------------------------------------------------------------------------------------
# Deterministic synthetic parameters (timm pretrained weights are not available in-script).
# -----------------------------------------------------------------------------------------
def init_params(key, *, img_size=IMG_SIZE, patch_size=PATCH_SIZE, in_chans=IN_CHANS,
                embed_dim=EMBED_DIM, depth=DEPTH, mlp_ratio=MLP_RATIO):
    d = embed_dim
    n = (img_size // patch_size) ** 2
    t = n + 1
    cpp = in_chans * patch_size * patch_size
    hm = mlp_ratio * d
    ks = jax.random.split(key, 12)
    nrm = lambda k, shape, s=0.02: s * jax.random.normal(k, shape, jnp.float32)
    return dict(
        # matmul weights stored in bf16 (MXU operands, halved HBM/DMA bytes);
        # biases / LN params / cls / pos stay f32.
        patch_w=nrm(ks[0], (cpp, d)).astype(jnp.bfloat16),
        patch_b=nrm(ks[1], (1, d)),
        cls=nrm(ks[2], (1, d)),
        pos=nrm(ks[3], (t, d)),
        ln1_g=jnp.ones((depth, 1, d), jnp.float32),
        ln1_b=jnp.zeros((depth, 1, d), jnp.float32),
        qkv_w=nrm(ks[4], (depth, d, 3 * d)).astype(jnp.bfloat16),
        qkv_b=nrm(ks[5], (depth, 1, 3 * d)),
        proj_w=nrm(ks[6], (depth, d, d)).astype(jnp.bfloat16),
        proj_b=nrm(ks[7], (depth, 1, d)),
        ln2_g=jnp.ones((depth, 1, d), jnp.float32),
        ln2_b=jnp.zeros((depth, 1, d), jnp.float32),
        fc1_w=nrm(ks[8], (depth, d, hm)).astype(jnp.bfloat16),
        fc1_b=nrm(ks[9], (depth, 1, hm)),
        fc2_w=nrm(ks[10], (depth, hm, d)).astype(jnp.bfloat16),
        fc2_b=nrm(ks[11], (depth, 1, d)),
        norm_g=jnp.ones((1, d), jnp.float32),
        norm_b=jnp.zeros((1, d), jnp.float32),
    )


if __name__ == "__main__":
    key = jax.random.PRNGKey(0)
    kx, kp = jax.random.split(key)

    B = 2
    x = jax.random.normal(kx, (B, IN_CHANS, IMG_SIZE, IMG_SIZE), jnp.float32)
    params = init_params(kp)

    cls_tok, patch_tok, patch_2d = vit_backbone_forward(x, params)
    cls_tok, patch_tok, patch_2d = jax.block_until_ready((cls_tok, patch_tok, patch_2d))

    n_patches = (IMG_SIZE // PATCH_SIZE) ** 2
    hw = IMG_SIZE // PATCH_SIZE
    assert cls_tok.shape == (B, EMBED_DIM)
    assert patch_tok.shape == (B, n_patches, EMBED_DIM)
    assert patch_2d.shape == (B, EMBED_DIM, hw, hw)

    ref_cls, ref_patch, ref_2d = vit_backbone_reference(x, params)
    assert jnp.allclose(cls_tok, ref_cls, atol=5e-3, rtol=5e-3)
    assert jnp.allclose(patch_tok, ref_patch, atol=5e-3, rtol=5e-3)
    assert jnp.allclose(patch_2d, ref_2d, atol=5e-3, rtol=5e-3)

    print("KERNEL_OK")
</pallas_src>

<mosaic_0001>
module attributes {stable_mosaic.version = 11 : i64} {
  func.func @kernel(%arg0: i32, %arg1: i32, %arg2: memref<1x17x192xbf16, #tpu.memory_space<vmem>>, %arg3: memref<17x128xf32, #tpu.memory_space<vmem>>, %arg4: memref<192x128xbf16, #tpu.memory_space<vmem>>, %arg5: memref<1x128xf32, #tpu.memory_space<vmem>>, %arg6: memref<1x1x128xf32, #tpu.memory_space<vmem>>, %arg7: memref<1x1x128xf32, #tpu.memory_space<vmem>>, %arg8: memref<1x128x384xbf16, #tpu.memory_space<vmem>>, %arg9: memref<1x1x384xf32, #tpu.memory_space<vmem>>, %arg10: memref<1x128x128xbf16, #tpu.memory_space<vmem>>, %arg11: memref<1x1x128xf32, #tpu.memory_space<vmem>>, %arg12: memref<1x1x128xf32, #tpu.memory_space<vmem>>, %arg13: memref<1x1x128xf32, #tpu.memory_space<vmem>>, %arg14: memref<1x128x512xbf16, #tpu.memory_space<vmem>>, %arg15: memref<1x1x512xf32, #tpu.memory_space<vmem>>, %arg16: memref<1x512x128xbf16, #tpu.memory_space<vmem>>, %arg17: memref<1x1x128xf32, #tpu.memory_space<vmem>>, %arg18: memref<1x128xf32, #tpu.memory_space<vmem>>, %arg19: memref<1x128xf32, #tpu.memory_space<vmem>>, %arg20: memref<1x17x128xf32, #tpu.memory_space<vmem>>, %arg21: memref<17x128xf32, #tpu.memory_space<vmem>>) attributes {dimension_semantics = [#tpu.dimension_semantics<parallel>, #tpu.dimension_semantics<arbitrary>], iteration_bounds = array<i64: 2, 2>, scalar_prefetch = 0 : i64, scratch_operands = 1 : i64, tpu.core_type = #tpu.core_type<tc>, window_params = [{transform_indices = @transform_0, window_bounds = array<i64: 1, 17, 192>}, {pipeline_mode = #tpu.pipeline_mode<synchronous>, transform_indices = @transform_1, window_bounds = array<i64: 17, 128>}, {pipeline_mode = #tpu.pipeline_mode<synchronous>, transform_indices = @transform_2, window_bounds = array<i64: 192, 128>}, {pipeline_mode = #tpu.pipeline_mode<synchronous>, transform_indices = @transform_3, window_bounds = array<i64: 1, 128>}, {transform_indices = @transform_4, window_bounds = array<i64: 1, 1, 128>}, {transform_indices = @transform_5, window_bounds = array<i64: 1, 1, 128>}, {transform_indices = @transform_6, window_bounds = array<i64: 1, 128, 384>}, {transform_indices = @transform_7, window_bounds = array<i64: 1, 1, 384>}, {transform_indices = @transform_8, window_bounds = array<i64: 1, 128, 128>}, {transform_indices = @transform_9, window_bounds = array<i64: 1, 1, 128>}, {transform_indices = @transform_10, window_bounds = array<i64: 1, 1, 128>}, {transform_indices = @transform_11, window_bounds = array<i64: 1, 1, 128>}, {transform_indices = @transform_12, window_bounds = array<i64: 1, 128, 512>}, {transform_indices = @transform_13, window_bounds = array<i64: 1, 1, 512>}, {transform_indices = @transform_14, window_bounds = array<i64: 1, 512, 128>}, {transform_indices = @transform_15, window_bounds = array<i64: 1, 1, 128>}, {pipeline_mode = #tpu.pipeline_mode<synchronous>, transform_indices = @transform_16, window_bounds = array<i64: 1, 128>}, {pipeline_mode = #tpu.pipeline_mode<synchronous>, transform_indices = @transform_17, window_bounds = array<i64: 1, 128>}, {transform_indices = @transform_18, window_bounds = array<i64: 1, 17, 128>}]} {
    %c0_i32 = arith.constant 0 : i32
    %0 = arith.cmpi eq, %arg1, %c0_i32 : i32
    %1 = arith.extui %0 : i1 to i32
    %c0_i32_0 = arith.constant 0 : i32
    %2 = arith.cmpi ne, %1, %c0_i32_0 : i32
    scf.if %2 {
      %c0_82 = arith.constant 0 : index
      %c0_83 = arith.constant 0 : index
      %c0_84 = arith.constant 0 : index
      %198 = vector.load %arg2[%c0_82, %c0_83, %c0_84] : memref<1x17x192xbf16, #tpu.memory_space<vmem>>, vector<1x17x192xbf16>
      %199 = vector.shape_cast %198 : vector<1x17x192xbf16> to vector<17x192xbf16>
      %c0_85 = arith.constant 0 : index
      %c0_86 = arith.constant 0 : index
      %200 = vector.load %arg4[%c0_85, %c0_86] : memref<192x128xbf16, #tpu.memory_space<vmem>>, vector<192x128xbf16>
      %cst_87 = arith.constant dense<0.000000e+00> : vector<17x128xf32>
      %201 = tpu.matmul %199, %200, %cst_87 {dimension_numbers = #tpu.dot_dimension_numbers<[1], [0], [0], [1], [0, 0, 1, 1], [], []>} : vector<17x192xbf16>, vector<192x128xbf16>, vector<17x128xf32> -> vector<17x128xf32>
      %c0_88 = arith.constant 0 : index
      %c0_89 = arith.constant 0 : index
      %202 = vector.load %arg5[%c0_88, %c0_89] : memref<1x128xf32, #tpu.memory_space<vmem>>, vector<1x128xf32>
      %203 = vector.broadcast %202 : vector<1x128xf32> to vector<17x128xf32>
      %204 = arith.addf %201, %203 : vector<17x128xf32>
      %c0_90 = arith.constant 0 : index
      %c0_91 = arith.constant 0 : index
      %205 = vector.load %arg3[%c0_90, %c0_91] : memref<17x128xf32, #tpu.memory_space<vmem>>, vector<17x128xf32>
      %206 = arith.addf %204, %205 : vector<17x128xf32>
      %c0_92 = arith.constant 0 : index
      %c0_93 = arith.constant 0 : index
      %207 = vector.load %arg21[%c0_92, %c0_93] : memref<17x128xf32, #tpu.memory_space<vmem>>, vector<17x128xf32>
      tpu.vector_store %arg21[%c0_92, %c0_93], %206 {strides = array<i32>} : memref<17x128xf32, #tpu.memory_space<vmem>>, vector<17x128xf32>,
    } else {
    }
    %c0 = arith.constant 0 : index
    %c0_1 = arith.constant 0 : index
    %3 = vector.load %arg21[%c0, %c0_1] : memref<17x128xf32, #tpu.memory_space<vmem>>, vector<17x128xf32>
    %c0_2 = arith.constant 0 : index
    %c0_3 = arith.constant 0 : index
    %c0_4 = arith.constant 0 : index
    %4 = vector.load %arg6[%c0_2, %c0_3, %c0_4] : memref<1x1x128xf32, #tpu.memory_space<vmem>>, vector<1x1x128xf32>
    %5 = vector.shape_cast %4 : vector<1x1x128xf32> to vector<1x128xf32>
    %c0_5 = arith.constant 0 : index
    %c0_6 = arith.constant 0 : index
    %c0_7 = arith.constant 0 : index
    %6 = vector.load %arg7[%c0_5, %c0_6, %c0_7] : memref<1x1x128xf32, #tpu.memory_space<vmem>>, vector<1x1x128xf32>
    %7 = vector.shape_cast %6 : vector<1x1x128xf32> to vector<1x128xf32>
    %c0_8 = arith.constant 0 : index
    %c0_9 = arith.constant 0 : index
    %c0_10 = arith.constant 0 : index
    %8 = vector.load %arg8[%c0_8, %c0_9, %c0_10] : memref<1x128x384xbf16, #tpu.memory_space<vmem>>, vector<1x128x384xbf16>
    %9 = vector.shape_cast %8 : vector<1x128x384xbf16> to vector<128x384xbf16>
    %c0_11 = arith.constant 0 : index
    %c0_12 = arith.constant 0 : index
    %c0_13 = arith.constant 0 : index
    %10 = vector.load %arg9[%c0_11, %c0_12, %c0_13] : memref<1x1x384xf32, #tpu.memory_space<vmem>>, vector<1x1x384xf32>
    %11 = vector.shape_cast %10 : vector<1x1x384xf32> to vector<1x384xf32>
    %c0_14 = arith.constant 0 : index
    %c0_15 = arith.constant 0 : index
    %c0_16 = arith.constant 0 : index
    %12 = vector.load %arg10[%c0_14, %c0_15, %c0_16] : memref<1x128x128xbf16, #tpu.memory_space<vmem>>, vector<1x128x128xbf16>
    %13 = vector.shape_cast %12 : vector<1x128x128xbf16> to vector<128x128xbf16>
    %c0_17 = arith.constant 0 : index
    %c0_18 = arith.constant 0 : index
    %c0_19 = arith.constant 0 : index
    %14 = vector.load %arg11[%c0_17, %c0_18, %c0_19] : memref<1x1x128xf32, #tpu.memory_space<vmem>>, vector<1x1x128xf32>
    %15 = vector.shape_cast %14 : vector<1x1x128xf32> to vector<1x128xf32>
    %c0_20 = arith.constant 0 : index
    %c0_21 = arith.constant 0 : index
    %c0_22 = arith.constant 0 : index
    %16 = vector.load %arg12[%c0_20, %c0_21, %c0_22] : memref<1x1x128xf32, #tpu.memory_space<vmem>>, vector<1x1x128xf32>
    %17 = vector.shape_cast %16 : vector<1x1x128xf32> to vector<1x128xf32>
    %c0_23 = arith.constant 0 : index
    %c0_24 = arith.constant 0 : index
    %c0_25 = arith.constant 0 : index
    %18 = vector.load %arg13[%c0_23, %c0_24, %c0_25] : memref<1x1x128xf32, #tpu.memory_space<vmem>>, vector<1x1x128xf32>
    %19 = vector.shape_cast %18 : vector<1x1x128xf32> to vector<1x128xf32>
    %c0_26 = arith.constant 0 : index
    %c0_27 = arith.constant 0 : index
    %c0_28 = arith.constant 0 : index
    %20 = vector.load %arg14[%c0_26, %c0_27, %c0_28] : memref<1x128x512xbf16, #tpu.memory_space<vmem>>, vector<1x128x512xbf16>
    %21 = vector.shape_cast %20 : vector<1x128x512xbf16> to vector<128x512xbf16>
    %c0_29 = arith.constant 0 : index
    %c0_30 = arith.constant 0 : index
    %c0_31 = arith.constant 0 : index
    %22 = vector.load %arg15[%c0_29, %c0_30, %c0_31] : memref<1x1x512xf32, #tpu.memory_space<vmem>>, vector<1x1x512xf32>
    %23 = vector.shape_cast %22 : vector<1x1x512xf32> to vector<1x512xf32>
    %c0_32 = arith.constant 0 : index
    %c0_33 = arith.constant 0 : index
    %c0_34 = arith.constant 0 : index
    %24 = vector.load %arg16[%c0_32, %c0_33, %c0_34] : memref<1x512x128xbf16, #tpu.memory_space<vmem>>, vector<1x512x128xbf16>
    %25 = vector.shape_cast %24 : vector<1x512x128xbf16> to vector<512x128xbf16>
    %c0_35 = arith.constant 0 : index
    %c0_36 = arith.constant 0 : index
    %c0_37 = arith.constant 0 : index
    %26 = vector.load %arg17[%c0_35, %c0_36, %c0_37] : memref<1x1x128xf32, #tpu.memory_space<vmem>>, vector<1x1x128xf32>
    %27 = vector.shape_cast %26 : vector<1x1x128xf32> to vector<1x128xf32>
    %cst = arith.constant dense<0.000000e+00> : vector<17xf32>
    %28 = vector.multi_reduction <add>, %3, %cst [1] : vector<17x128xf32> to vector<17xf32>
    %29 = vector.shape_cast %28 : vector<17xf32> to vector<17x1xf32>
    %cst_38 = arith.constant 1.280000e+02 : f32
    %30 = vector.broadcast %cst_38 : f32 to vector<17x1xf32>
    %31 = arith.divf %29, %30 : vector<17x1xf32>
    %32 = vector.broadcast %31 : vector<17x1xf32> to vector<17x128xf32>
    %33 = arith.subf %3, %32 : vector<17x128xf32>
    %34 = arith.mulf %33, %33 : vector<17x128xf32>
    %cst_39 = arith.constant dense<0.000000e+00> : vector<17xf32>
    %35 = vector.multi_reduction <add>, %34, %cst_39 [1] : vector<17x128xf32> to vector<17xf32>
    %36 = vector.shape_cast %35 : vector<17xf32> to vector<17x1xf32>
    %cst_40 = arith.constant 1.280000e+02 : f32
    %37 = vector.broadcast %cst_40 : f32 to vector<17x1xf32>
    %38 = arith.divf %36, %37 : vector<17x1xf32>
    %cst_41 = arith.constant 9.99999997E-7 : f32
    %39 = vector.broadcast %cst_41 : f32 to vector<17x1xf32>
    %40 = arith.addf %38, %39 : vector<17x1xf32>
    %41 = math.rsqrt %40 : vector<17x1xf32>
    %42 = vector.broadcast %41 : vector<17x1xf32> to vector<17x128xf32>
    %43 = arith.mulf %33, %42 : vector<17x128xf32>
    %44 = vector.broadcast %5 : vector<1x128xf32> to vector<17x128xf32>
    %45 = arith.mulf %43, %44 : vector<17x128xf32>
    %46 = vector.broadcast %7 : vector<1x128xf32> to vector<17x128xf32>
    %47 = arith.addf %45, %46 : vector<17x128xf32>
    %48 = arith.truncf %47 : vector<17x128xf32> to vector<17x128xbf16>
    %cst_42 = arith.constant dense<0.000000e+00> : vector<17x384xf32>
    %49 = tpu.matmul %48, %9, %cst_42 {dimension_numbers = #tpu.dot_dimension_numbers<[1], [0], [0], [1], [0, 0, 1, 1], [], []>} : vector<17x128xbf16>, vector<128x384xbf16>, vector<17x384xf32> -> vector<17x384xf32>
    %50 = vector.broadcast %11 : vector<1x384xf32> to vector<17x384xf32>
    %51 = arith.addf %49, %50 : vector<17x384xf32>
    %cst_43 = arith.constant 0.000000e+00 : f32
    %52 = vector.broadcast %cst_43 : f32 to vector<17x128xf32>
    %53 = vector.extract_strided_slice %51 {offsets = [0, 0], sizes = [17, 32], strides = [1, 1]} : vector<17x384xf32> to vector<17x32xf32>
    %cst_44 = arith.constant 0.176776692 : f32
    %54 = vector.broadcast %cst_44 : f32 to vector<17x32xf32>
    %55 = arith.mulf %53, %54 : vector<17x32xf32>
    %56 = vector.extract_strided_slice %51 {offsets = [0, 128], sizes = [17, 32], strides = [1, 1]} : vector<17x384xf32> to vector<17x32xf32>
    %57 = vector.extract_strided_slice %51 {offsets = [0, 256], sizes = [17, 32], strides = [1, 1]} : vector<17x384xf32> to vector<17x32xf32>
    %58 = arith.truncf %55 : vector<17x32xf32> to vector<17x32xbf16>
    %59 = arith.truncf %56 : vector<17x32xf32> to vector<17x32xbf16>
    %cst_45 = arith.constant dense<0.000000e+00> : vector<17x17xf32>
    %60 = tpu.matmul %58, %59, %cst_45 {dimension_numbers = #tpu.dot_dimension_numbers<[1], [1], [0], [0], [0, 0, 1, 0], [], []>} : vector<17x32xbf16>, vector<17x32xbf16>, vector<17x17xf32> -> vector<17x17xf32>
    %cst_46 = arith.constant dense<0xFF800000> : vector<17xf32>
    %61 = vector.multi_reduction <maximumf>, %60, %cst_46 [1] : vector<17x17xf32> to vector<17xf32>
    %62 = vector.shape_cast %61 : vector<17xf32> to vector<17x1xf32>
    %63 = vector.broadcast %62 : vector<17x1xf32> to vector<17x17xf32>
    %64 = arith.subf %60, %63 : vector<17x17xf32>
    %65 = math.exp %64 : vector<17x17xf32>
    %cst_47 = arith.constant dense<0.000000e+00> : vector<17xf32>
    %66 = vector.multi_reduction <add>, %65, %cst_47 [1] : vector<17x17xf32> to vector<17xf32>
    %67 = vector.shape_cast %66 : vector<17xf32> to vector<17x1xf32>
    %68 = vector.broadcast %67 : vector<17x1xf32> to vector<17x17xf32>
    %69 = arith.divf %65, %68 : vector<17x17xf32>
    %70 = arith.truncf %69 : vector<17x17xf32> to vector<17x17xbf16>
    %71 = arith.truncf %57 : vector<17x32xf32> to vector<17x32xbf16>
    %cst_48 = arith.constant dense<0.000000e+00> : vector<17x32xf32>
    %72 = tpu.matmul %70, %71, %cst_48 {dimension_numbers = #tpu.dot_dimension_numbers<[1], [0], [0], [1], [0, 0, 1, 1], [], []>} : vector<17x17xbf16>, vector<17x32xbf16>, vector<17x32xf32> -> vector<17x32xf32>
    %73 = vector.extract_strided_slice %13 {offsets = [0, 0], sizes = [32, 128], strides = [1, 1]} : vector<128x128xbf16> to vector<32x128xbf16>
    %74 = arith.truncf %72 : vector<17x32xf32> to vector<17x32xbf16>
    %cst_49 = arith.constant dense<0.000000e+00> : vector<17x128xf32>
    %75 = tpu.matmul %74, %73, %cst_49 {dimension_numbers = #tpu.dot_dimension_numbers<[1], [0], [0], [1], [0, 0, 1, 1], [], []>} : vector<17x32xbf16>, vector<32x128xbf16>, vector<17x128xf32> -> vector<17x128xf32>
    %76 = arith.addf %52, %75 : vector<17x128xf32>
    %77 = vector.extract_strided_slice %51 {offsets = [0, 32], sizes = [17, 32], strides = [1, 1]} : vector<17x384xf32> to vector<17x32xf32>
    %cst_50 = arith.constant 0.176776692 : f32
    %78 = vector.broadcast %cst_50 : f32 to vector<17x32xf32>
    %79 = arith.mulf %77, %78 : vector<17x32xf32>
    %80 = vector.extract_strided_slice %51 {offsets = [0, 160], sizes = [17, 32], strides = [1, 1]} : vector<17x384xf32> to vector<17x32xf32>
    %81 = vector.extract_strided_slice %51 {offsets = [0, 288], sizes = [17, 32], strides = [1, 1]} : vector<17x384xf32> to vector<17x32xf32>
    %82 = arith.truncf %79 : vector<17x32xf32> to vector<17x32xbf16>
    %83 = arith.truncf %80 : vector<17x32xf32> to vector<17x32xbf16>
    %cst_51 = arith.constant dense<0.000000e+00> : vector<17x17xf32>
    %84 = tpu.matmul %82, %83, %cst_51 {dimension_numbers = #tpu.dot_dimension_numbers<[1], [1], [0], [0], [0, 0, 1, 0], [], []>} : vector<17x32xbf16>, vector<17x32xbf16>, vector<17x17xf32> -> vector<17x17xf32>
    %cst_52 = arith.constant dense<0xFF800000> : vector<17xf32>
    %85 = vector.multi_reduction <maximumf>, %84, %cst_52 [1] : vector<17x17xf32> to vector<17xf32>
    %86 = vector.shape_cast %85 : vector<17xf32> to vector<17x1xf32>
    %87 = vector.broadcast %86 : vector<17x1xf32> to vector<17x17xf32>
    %88 = arith.subf %84, %87 : vector<17x17xf32>
    %89 = math.exp %88 : vector<17x17xf32>
    %cst_53 = arith.constant dense<0.000000e+00> : vector<17xf32>
    %90 = vector.multi_reduction <add>, %89, %cst_53 [1] : vector<17x17xf32> to vector<17xf32>
    %91 = vector.shape_cast %90 : vector<17xf32> to vector<17x1xf32>
    %92 = vector.broadcast %91 : vector<17x1xf32> to vector<17x17xf32>
    %93 = arith.divf %89, %92 : vector<17x17xf32>
    %94 = arith.truncf %93 : vector<17x17xf32> to vector<17x17xbf16>
    %95 = arith.truncf %81 : vector<17x32xf32> to vector<17x32xbf16>
    %cst_54 = arith.constant dense<0.000000e+00> : vector<17x32xf32>
    %96 = tpu.matmul %94, %95, %cst_54 {dimension_numbers = #tpu.dot_dimension_numbers<[1], [0], [0], [1], [0, 0, 1, 1], [], []>} : vector<17x17xbf16>, vector<17x32xbf16>, vector<17x32xf32> -> vector<17x32xf32>
    %97 = vector.extract_strided_slice %13 {offsets = [32, 0], sizes = [32, 128], strides = [1, 1]} : vector<128x128xbf16> to vector<32x128xbf16>
    %98 = arith.truncf %96 : vector<17x32xf32> to vector<17x32xbf16>
    %cst_55 = arith.constant dense<0.000000e+00> : vector<17x128xf32>
    %99 = tpu.matmul %98, %97, %cst_55 {dimension_numbers = #tpu.dot_dimension_numbers<[1], [0], [0], [1], [0, 0, 1, 1], [], []>} : vector<17x32xbf16>, vector<32x128xbf16>, vector<17x128xf32> -> vector<17x128xf32>
    %100 = arith.addf %76, %99 : vector<17x128xf32>
    %101 = vector.extract_strided_slice %51 {offsets = [0, 64], sizes = [17, 32], strides = [1, 1]} : vector<17x384xf32> to vector<17x32xf32>
    %cst_56 = arith.constant 0.176776692 : f32
    %102 = vector.broadcast %cst_56 : f32 to vector<17x32xf32>
    %103 = arith.mulf %101, %102 : vector<17x32xf32>
    %104 = vector.extract_strided_slice %51 {offsets = [0, 192], sizes = [17, 32], strides = [1, 1]} : vector<17x384xf32> to vector<17x32xf32>
    %105 = vector.extract_strided_slice %51 {offsets = [0, 320], sizes = [17, 32], strides = [1, 1]} : vector<17x384xf32> to vector<17x32xf32>
    %106 = arith.truncf %103 : vector<17x32xf32> to vector<17x32xbf16>
    %107 = arith.truncf %104 : vector<17x32xf32> to vector<17x32xbf16>
    %cst_57 = arith.constant dense<0.000000e+00> : vector<17x17xf32>
    %108 = tpu.matmul %106, %107, %cst_57 {dimension_numbers = #tpu.dot_dimension_numbers<[1], [1], [0], [0], [0, 0, 1, 0], [], []>} : vector<17x32xbf16>, vector<17x32xbf16>, vector<17x17xf32> -> vector<17x17xf32>
    %cst_58 = arith.constant dense<0xFF800000> : vector<17xf32>
    %109 = vector.multi_reduction <maximumf>, %108, %cst_58 [1] : vector<17x17xf32> to vector<17xf32>
    %110 = vector.shape_cast %109 : vector<17xf32> to vector<17x1xf32>
    %111 = vector.broadcast %110 : vector<17x1xf32> to vector<17x17xf32>
    %112 = arith.subf %108, %111 : vector<17x17xf32>
    %113 = math.exp %112 : vector<17x17xf32>
    %cst_59 = arith.constant dense<0.000000e+00> : vector<17xf32>
    %114 = vector.multi_reduction <add>, %113, %cst_59 [1] : vector<17x17xf32> to vector<17xf32>
    %115 = vector.shape_cast %114 : vector<17xf32> to vector<17x1xf32>
    %116 = vector.broadcast %115 : vector<17x1xf32> to vector<17x17xf32>
    %117 = arith.divf %113, %116 : vector<17x17xf32>
    %118 = arith.truncf %117 : vector<17x17xf32> to vector<17x17xbf16>
    %119 = arith.truncf %105 : vector<17x32xf32> to vector<17x32xbf16>
    %cst_60 = arith.constant dense<0.000000e+00> : vector<17x32xf32>
    %120 = tpu.matmul %118, %119, %cst_60 {dimension_numbers = #tpu.dot_dimension_numbers<[1], [0], [0], [1], [0, 0, 1, 1], [], []>} : vector<17x17xbf16>, vector<17x32xbf16>, vector<17x32xf32> -> vector<17x32xf32>
    %121 = vector.extract_strided_slice %13 {offsets = [64, 0], sizes = [32, 128], strides = [1, 1]} : vector<128x128xbf16> to vector<32x128xbf16>
    %122 = arith.truncf %120 : vector<17x32xf32> to vector<17x32xbf16>
    %cst_61 = arith.constant dense<0.000000e+00> : vector<17x128xf32>
    %123 = tpu.matmul %122, %121, %cst_61 {dimension_numbers = #tpu.dot_dimension_numbers<[1], [0], [0], [1], [0, 0, 1, 1], [], []>} : vector<17x32xbf16>, vector<32x128xbf16>, vector<17x128xf32> -> vector<17x128xf32>
    %124 = arith.addf %100, %123 : vector<17x128xf32>
    %125 = vector.extract_strided_slice %51 {offsets = [0, 96], sizes = [17, 32], strides = [1, 1]} : vector<17x384xf32> to vector<17x32xf32>
    %cst_62 = arith.constant 0.176776692 : f32
    %126 = vector.broadcast %cst_62 : f32 to vector<17x32xf32>
    %127 = arith.mulf %125, %126 : vector<17x32xf32>
    %128 = vector.extract_strided_slice %51 {offsets = [0, 224], sizes = [17, 32], strides = [1, 1]} : vector<17x384xf32> to vector<17x32xf32>
    %129 = vector.extract_strided_slice %51 {offsets = [0, 352], sizes = [17, 32], strides = [1, 1]} : vector<17x384xf32> to vector<17x32xf32>
    %130 = arith.truncf %127 : vector<17x32xf32> to vector<17x32xbf16>
    %131 = arith.truncf %128 : vector<17x32xf32> to vector<17x32xbf16>
    %cst_63 = arith.constant dense<0.000000e+00> : vector<17x17xf32>
    %132 = tpu.matmul %130, %131, %cst_63 {dimension_numbers = #tpu.dot_dimension_numbers<[1], [1], [0], [0], [0, 0, 1, 0], [], []>} : vector<17x32xbf16>, vector<17x32xbf16>, vector<17x17xf32> -> vector<17x17xf32>
    %cst_64 = arith.constant dense<0xFF800000> : vector<17xf32>
    %133 = vector.multi_reduction <maximumf>, %132, %cst_64 [1] : vector<17x17xf32> to vector<17xf32>
    %134 = vector.shape_cast %133 : vector<17xf32> to vector<17x1xf32>
    %135 = vector.broadcast %134 : vector<17x1xf32> to vector<17x17xf32>
    %136 = arith.subf %132, %135 : vector<17x17xf32>
    %137 = math.exp %136 : vector<17x17xf32>
    %cst_65 = arith.constant dense<0.000000e+00> : vector<17xf32>
    %138 = vector.multi_reduction <add>, %137, %cst_65 [1] : vector<17x17xf32> to vector<17xf32>
    %139 = vector.shape_cast %138 : vector<17xf32> to vector<17x1xf32>
    %140 = vector.broadcast %139 : vector<17x1xf32> to vector<17x17xf32>
    %141 = arith.divf %137, %140 : vector<17x17xf32>
    %142 = arith.truncf %141 : vector<17x17xf32> to vector<17x17xbf16>
    %143 = arith.truncf %129 : vector<17x32xf32> to vector<17x32xbf16>
    %cst_66 = arith.constant dense<0.000000e+00> : vector<17x32xf32>
    %144 = tpu.matmul %142, %143, %cst_66 {dimension_numbers = #tpu.dot_dimension_numbers<[1], [0], [0], [1], [0, 0, 1, 1], [], []>} : vector<17x17xbf16>, vector<17x32xbf16>, vector<17x32xf32> -> vector<17x32xf32>
    %145 = vector.extract_strided_slice %13 {offsets = [96, 0], sizes = [32, 128], strides = [1, 1]} : vector<128x128xbf16> to vector<32x128xbf16>
    %146 = arith.truncf %144 : vector<17x32xf32> to vector<17x32xbf16>
    %cst_67 = arith.constant dense<0.000000e+00> : vector<17x128xf32>
    %147 = tpu.matmul %146, %145, %cst_67 {dimension_numbers = #tpu.dot_dimension_numbers<[1], [0], [0], [1], [0, 0, 1, 1], [], []>} : vector<17x32xbf16>, vector<32x128xbf16>, vector<17x128xf32> -> vector<17x128xf32>
    %148 = arith.addf %124, %147 : vector<17x128xf32>
    %149 = vector.broadcast %15 : vector<1x128xf32> to vector<17x128xf32>
    %150 = arith.addf %148, %149 : vector<17x128xf32>
    %151 = arith.addf %3, %150 : vector<17x128xf32>
    %cst_68 = arith.constant dense<0.000000e+00> : vector<17xf32>
    %152 = vector.multi_reduction <add>, %151, %cst_68 [1] : vector<17x128xf32> to vector<17xf32>
    %153 = vector.shape_cast %152 : vector<17xf32> to vector<17x1xf32>
    %cst_69 = arith.constant 1.280000e+02 : f32
    %154 = vector.broadcast %cst_69 : f32 to vector<17x1xf32>
    %155 = arith.divf %153, %154 : vector<17x1xf32>
    %156 = vector.broadcast %155 : vector<17x1xf32> to vector<17x128xf32>
    %157 = arith.subf %151, %156 : vector<17x128xf32>
    %158 = arith.mulf %157, %157 : vector<17x128xf32>
    %cst_70 = arith.constant dense<0.000000e+00> : vector<17xf32>
    %159 = vector.multi_reduction <add>, %158, %cst_70 [1] : vector<17x128xf32> to vector<17xf32>
    %160 = vector.shape_cast %159 : vector<17xf32> to vector<17x1xf32>
    %cst_71 = arith.constant 1.280000e+02 : f32
    %161 = vector.broadcast %cst_71 : f32 to vector<17x1xf32>
    %162 = arith.divf %160, %161 : vector<17x1xf32>
    %cst_72 = arith.constant 9.99999997E-7 : f32
    %163 = vector.broadcast %cst_72 : f32 to vector<17x1xf32>
    %164 = arith.addf %162, %163 : vector<17x1xf32>
    %165 = math.rsqrt %164 : vector<17x1xf32>
    %166 = vector.broadcast %165 : vector<17x1xf32> to vector<17x128xf32>
    %167 = arith.mulf %157, %166 : vector<17x128xf32>
    %168 = vector.broadcast %17 : vector<1x128xf32> to vector<17x128xf32>
    %169 = arith.mulf %167, %168 : vector<17x128xf32>
    %170 = vector.broadcast %19 : vector<1x128xf32> to vector<17x128xf32>
    %171 = arith.addf %169, %170 : vector<17x128xf32>
    %172 = arith.truncf %171 : vector<17x128xf32> to vector<17x128xbf16>
    %cst_73 = arith.constant dense<0.000000e+00> : vector<17x512xf32>
    %173 = tpu.matmul %172, %21, %cst_73 {dimension_numbers = #tpu.dot_dimension_numbers<[1], [0], [0], [1], [0, 0, 1, 1], [], []>} : vector<17x128xbf16>, vector<128x512xbf16>, vector<17x512xf32> -> vector<17x512xf32>
    %174 = vector.broadcast %23 : vector<1x512xf32> to vector<17x512xf32>
    %175 = arith.addf %173, %174 : vector<17x512xf32>
    %176 = arith.mulf %175, %175 : vector<17x512xf32>
    %177 = arith.mulf %175, %176 : vector<17x512xf32>
    %cst_74 = arith.constant 4.471500e-02 : f32
    %178 = vector.broadcast %cst_74 : f32 to vector<17x512xf32>
    %179 = arith.mulf %178, %177 : vector<17x512xf32>
    %180 = arith.addf %175, %179 : vector<17x512xf32>
    %cst_75 = arith.constant 0.797884583 : f32
    %181 = vector.broadcast %cst_75 : f32 to vector<17x512xf32>
    %182 = arith.mulf %181, %180 : vector<17x512xf32>
    %183 = math.tanh %182 : vector<17x512xf32>
    %cst_76 = arith.constant 1.000000e+00 : f32
    %184 = vector.broadcast %cst_76 : f32 to vector<17x512xf32>
    %185 = arith.addf %184, %183 : vector<17x512xf32>
    %cst_77 = arith.constant 5.000000e-01 : f32
    %186 = vector.broadcast %cst_77 : f32 to vector<17x512xf32>
    %187 = arith.mulf %186, %185 : vector<17x512xf32>
    %188 = arith.mulf %175, %187 : vector<17x512xf32>
    %189 = arith.truncf %188 : vector<17x512xf32> to vector<17x512xbf16>
    %cst_78 = arith.constant dense<0.000000e+00> : vector<17x128xf32>
    %190 = tpu.matmul %189, %25, %cst_78 {dimension_numbers = #tpu.dot_dimension_numbers<[1], [0], [0], [1], [0, 0, 1, 1], [], []>} : vector<17x512xbf16>, vector<512x128xbf16>, vector<17x128xf32> -> vector<17x128xf32>
    %191 = vector.broadcast %27 : vector<1x128xf32> to vector<17x128xf32>
    %192 = arith.addf %190, %191 : vector<17x128xf32>
    %193 = arith.addf %151, %192 : vector<17x128xf32>
    %c0_79 = arith.constant 0 : index
    %c0_80 = arith.constant 0 : index
    %194 = vector.load %arg21[%c0_79, %c0_80] : memref<17x128xf32, #tpu.memory_space<vmem>>, vector<17x128xf32>
    tpu.vector_store %arg21[%c0_79, %c0_80], %193 {strides = array<i32>} : memref<17x128xf32, #tpu.memory_space<vmem>>, vector<17x128xf32>,
    %c1_i32 = arith.constant 1 : i32
    %195 = arith.cmpi eq, %arg1, %c1_i32 : i32
    %196 = arith.extui %195 : i1 to i32
    %c0_i32_81 = arith.constant 0 : i32
    %197 = arith.cmpi ne, %196, %c0_i32_81 : i32
    scf.if %197 {
      %c0_82 = arith.constant 0 : index
      %c0_83 = arith.constant 0 : index
      %198 = vector.load %arg21[%c0_82, %c0_83] : memref<17x128xf32, #tpu.memory_space<vmem>>, vector<17x128xf32>
      %c0_84 = arith.constant 0 : index
      %c0_85 = arith.constant 0 : index
      %199 = vector.load %arg18[%c0_84, %c0_85] : memref<1x128xf32, #tpu.memory_space<vmem>>, vector<1x128xf32>
      %c0_86 = arith.constant 0 : index
      %c0_87 = arith.constant 0 : index
      %200 = vector.load %arg19[%c0_86, %c0_87] : memref<1x128xf32, #tpu.memory_space<vmem>>, vector<1x128xf32>
      %cst_88 = arith.constant dense<0.000000e+00> : vector<17xf32>
      %201 = vector.multi_reduction <add>, %198, %cst_88 [1] : vector<17x128xf32> to vector<17xf32>
      %202 = vector.shape_cast %201 : vector<17xf32> to vector<17x1xf32>
      %cst_89 = arith.constant 1.280000e+02 : f32
      %203 = vector.broadcast %cst_89 : f32 to vector<17x1xf32>
      %204 = arith.divf %202, %203 : vector<17x1xf32>
      %205 = vector.broadcast %204 : vector<17x1xf32> to vector<17x128xf32>
      %206 = arith.subf %198, %205 : vector<17x128xf32>
      %207 = arith.mulf %206, %206 : vector<17x128xf32>
      %cst_90 = arith.constant dense<0.000000e+00> : vector<17xf32>
      %208 = vector.multi_reduction <add>, %207, %cst_90 [1] : vector<17x128xf32> to vector<17xf32>
      %209 = vector.shape_cast %208 : vector<17xf32> to vector<17x1xf32>
      %cst_91 = arith.constant 1.280000e+02 : f32
      %210 = vector.broadcast %cst_91 : f32 to vector<17x1xf32>
      %211 = arith.divf %209, %210 : vector<17x1xf32>
      %cst_92 = arith.constant 9.99999997E-7 : f32
      %212 = vector.broadcast %cst_92 : f32 to vector<17x1xf32>
      %213 = arith.addf %211, %212 : vector<17x1xf32>
      %214 = math.rsqrt %213 : vector<17x1xf32>
      %215 = vector.broadcast %214 : vector<17x1xf32> to vector<17x128xf32>
      %216 = arith.mulf %206, %215 : vector<17x128xf32>
      %217 = vector.broadcast %199 : vector<1x128xf32> to vector<17x128xf32>
      %218 = arith.mulf %216, %217 : vector<17x128xf32>
      %219 = vector.broadcast %200 : vector<1x128xf32> to vector<17x128xf32>
      %220 = arith.addf %218, %219 : vector<17x128xf32>
      %c0_93 = arith.constant 0 : index
      %c0_94 = arith.constant 0 : index
      %c0_95 = arith.constant 0 : index
      %221 = vector.load %arg20[%c0_93, %c0_94, %c0_95] : memref<1x17x128xf32, #tpu.memory_space<vmem>>, vector<1x17x128xf32>
      %222 = vector.shape_cast %221 : vector<1x17x128xf32> to vector<17x128xf32>
      %223 = vector.shape_cast %220 : vector<17x128xf32> to vector<1x17x128xf32>
      tpu.vector_store %arg20[%c0_93, %c0_94, %c0_95], %223 {strides = array<i32>} : memref<1x17x128xf32, #tpu.memory_space<vmem>>, vector<1x17x128xf32>,
    } else {
    }
    return
  }
  func.func @transform_0(%arg0: i32, %arg1: i32) -> (i32, i32, i32) {
    %c0_i32 = arith.constant 0 : i32
    %c0_i32_0 = arith.constant 0 : i32
    %c0_i32_1 = arith.constant 0 : i32
    return %arg0, %c0_i32, %c0_i32_0 : i32, i32, i32
  }
  func.func @transform_1(%arg0: i32, %arg1: i32) -> (i32, i32) {
    %c0_i32 = arith.constant 0 : i32
    %c0_i32_0 = arith.constant 0 : i32
    %c0_i32_1 = arith.constant 0 : i32
    return %c0_i32, %c0_i32_0 : i32, i32
  }
  func.func @transform_2(%arg0: i32, %arg1: i32) -> (i32, i32) {
    %c0_i32 = arith.constant 0 : i32
    %c0_i32_0 = arith.constant 0 : i32
    %c0_i32_1 = arith.constant 0 : i32
    return %c0_i32, %c0_i32_0 : i32, i32
  }
  func.func @transform_3(%arg0: i32, %arg1: i32) -> (i32, i32) {
    %c0_i32 = arith.constant 0 : i32
    %c0_i32_0 = arith.constant 0 : i32
    %c0_i32_1 = arith.constant 0 : i32
    return %c0_i32, %c0_i32_0 : i32, i32
  }
  func.func @transform_4(%arg0: i32, %arg1: i32) -> (i32, i32, i32) {
    %c0_i32 = arith.constant 0 : i32
    %c0_i32_0 = arith.constant 0 : i32
    %c0_i32_1 = arith.constant 0 : i32
    return %arg1, %c0_i32, %c0_i32_0 : i32, i32, i32
  }
  func.func @transform_5(%arg0: i32, %arg1: i32) -> (i32, i32, i32) {
    %c0_i32 = arith.constant 0 : i32
    %c0_i32_0 = arith.constant 0 : i32
    %c0_i32_1 = arith.constant 0 : i32
    return %arg1, %c0_i32, %c0_i32_0 : i32, i32, i32
  }
  func.func @transform_6(%arg0: i32, %arg1: i32) -> (i32, i32, i32) {
    %c0_i32 = arith.constant 0 : i32
    %c0_i32_0 = arith.constant 0 : i32
    %c0_i32_1 = arith.constant 0 : i32
    return %arg1, %c0_i32, %c0_i32_0 : i32, i32, i32
  }
  func.func @transform_7(%arg0: i32, %arg1: i32) -> (i32, i32, i32) {
    %c0_i32 = arith.constant 0 : i32
    %c0_i32_0 = arith.constant 0 : i32
    %c0_i32_1 = arith.constant 0 : i32
    return %arg1, %c0_i32, %c0_i32_0 : i32, i32, i32
  }
  func.func @transform_8(%arg0: i32, %arg1: i32) -> (i32, i32, i32) {
    %c0_i32 = arith.constant 0 : i32
    %c0_i32_0 = arith.constant 0 : i32
    %c0_i32_1 = arith.constant 0 : i32
    return %arg1, %c0_i32, %c0_i32_0 : i32, i32, i32
  }
  func.func @transform_9(%arg0: i32, %arg1: i32) -> (i32, i32, i32) {
    %c0_i32 = arith.constant 0 : i32
    %c0_i32_0 = arith.constant 0 : i32
    %c0_i32_1 = arith.constant 0 : i32
    return %arg1, %c0_i32, %c0_i32_0 : i32, i32, i32
  }
  func.func @transform_10(%arg0: i32, %arg1: i32) -> (i32, i32, i32) {
    %c0_i32 = arith.constant 0 : i32
    %c0_i32_0 = arith.constant 0 : i32
    %c0_i32_1 = arith.constant 0 : i32
    return %arg1, %c0_i32, %c0_i32_0 : i32, i32, i32
  }
  func.func @transform_11(%arg0: i32, %arg1: i32) -> (i32, i32, i32) {
    %c0_i32 = arith.constant 0 : i32
    %c0_i32_0 = arith.constant 0 : i32
    %c0_i32_1 = arith.constant 0 : i32
    return %arg1, %c0_i32, %c0_i32_0 : i32, i32, i32
  }
  func.func @transform_12(%arg0: i32, %arg1: i32) -> (i32, i32, i32) {
    %c0_i32 = arith.constant 0 : i32
    %c0_i32_0 = arith.constant 0 : i32
    %c0_i32_1 = arith.constant 0 : i32
    return %arg1, %c0_i32, %c0_i32_0 : i32, i32, i32
  }
  func.func @transform_13(%arg0: i32, %arg1: i32) -> (i32, i32, i32) {
    %c0_i32 = arith.constant 0 : i32
    %c0_i32_0 = arith.constant 0 : i32
    %c0_i32_1 = arith.constant 0 : i32
    return %arg1, %c0_i32, %c0_i32_0 : i32, i32, i32
  }
  func.func @transform_14(%arg0: i32, %arg1: i32) -> (i32, i32, i32) {
    %c0_i32 = arith.constant 0 : i32
    %c0_i32_0 = arith.constant 0 : i32
    %c0_i32_1 = arith.constant 0 : i32
    return %arg1, %c0_i32, %c0_i32_0 : i32, i32, i32
  }
  func.func @transform_15(%arg0: i32, %arg1: i32) -> (i32, i32, i32) {
    %c0_i32 = arith.constant 0 : i32
    %c0_i32_0 = arith.constant 0 : i32
    %c0_i32_1 = arith.constant 0 : i32
    return %arg1, %c0_i32, %c0_i32_0 : i32, i32, i32
  }
  func.func @transform_16(%arg0: i32, %arg1: i32) -> (i32, i32) {
    %c0_i32 = arith.constant 0 : i32
    %c0_i32_0 = arith.constant 0 : i32
    %c0_i32_1 = arith.constant 0 : i32
    return %c0_i32, %c0_i32_0 : i32, i32
  }
  func.func @transform_17(%arg0: i32, %arg1: i32) -> (i32, i32) {
    %c0_i32 = arith.constant 0 : i32
    %c0_i32_0 = arith.constant 0 : i32
    %c0_i32_1 = arith.constant 0 : i32
    return %c0_i32, %c0_i32_0 : i32, i32
  }
  func.func @transform_18(%arg0: i32, %arg1: i32) -> (i32, i32, i32) {
    %c0_i32 = arith.constant 0 : i32
    %c0_i32_0 = arith.constant 0 : i32
    %c0_i32_1 = arith.constant 0 : i32
    return %arg0, %c0_i32, %c0_i32_0 : i32, i32, i32
  }
}

</mosaic_0001>

<bundles_post_ra>
// kernel: tpu_custom_call.1
= control target key start
LH: loop header
LB: loop body
LE: loop exit
PB: predicated region body
PF: predicated region fallthrough
CT: control target
= control target key end

     0   :  { %s5247_s0 = inlined_call_operand.vmem [shape: bf16[2,17,192], index: 0, kind: input, shape index: {}]   ;;  %s5248_s1 = inlined_call_operand.vmem [shape: f32[17,128], index: 1, kind: input, shape index: {}]   ;;  %s5249_s2 = inlined_call_operand.hbm [shape: bf16[192,128], index: 2, kind: input, shape index: {}]   ;;  %s5250_s3 = inlined_call_operand.vmem [shape: f32[1,128], index: 3, kind: input, shape index: {}]   ;;  %s5251_s4 = inlined_call_operand.vmem [shape: f32[2,1,128], index: 4, kind: input, shape index: {}]   ;;  %s5252_s5 = inlined_call_operand.vmem [shape: f32[2,1,128], index: 5, kind: input, shape index: {}]   ;;  %s5253_s6 = inlined_call_operand.hbm [shape: bf16[2,128,384], index: 6, kind: input, shape index: {}]   ;;  %s5254_s7 = inlined_call_operand.vmem [shape: f32[2,1,384], index: 7, kind: input, shape index: {}]   ;;  %s5255_s8 = inlined_call_operand.hbm [shape: bf16[2,128,128], index: 8, kind: input, shape index: {}]   ;;  %s5256_s9 = inlined_call_operand.vmem [shape: f32[2,1,128], index: 9, kind: input, shape index: {}]   ;;  %s5257_s10 = inlined_call_operand.vmem [shape: f32[2,1,128], index: 10, kind: input, shape index: {}]   ;;  %s5258_s11 = inlined_call_operand.vmem [shape: f32[2,1,128], index: 11, kind: input, shape index: {}]   ;;  %s5259_s12 = inlined_call_operand.hbm [shape: bf16[2,128,512], index: 12, kind: input, shape index: {}]   ;;  %s5260_s13 = inlined_call_operand.vmem [shape: f32[2,1,512], index: 13, kind: input, shape index: {}]   ;;  %s5261_s14 = inlined_call_operand.hbm [shape: bf16[2,512,128], index: 14, kind: input, shape index: {}]   ;;  %s5262_s15 = inlined_call_operand.vmem [shape: f32[2,1,128], index: 15, kind: input, shape index: {}]   ;;  %s5263_s16 = inlined_call_operand.vmem [shape: f32[1,128], index: 16, kind: input, shape index: {}]   ;;  %s5264_s17 = inlined_call_operand.vmem [shape: f32[1,128], index: 17, kind: input, shape index: {}]   ;;  %s5265_s18 = inlined_call_operand.vmem [shape: f32[2,17,128], index: 18, kind: output, shape index: {}]  }
   0x1   :  { %5275 = sst [smem:[#allocation23_spill]] %s5247_s0 }
   0x2   :  { %5276 = sst [smem:[#allocation24_spill]] %s5248_s1 }
   0x3   :  { %5277 = sst [smem:[#allocation25_spill]] %s5249_s2 }
   0x4   :  { %5278 = sst [smem:[#allocation26_spill]] %s5250_s3 }
   0x5   :  { %5279 = sst [smem:[#allocation27_spill]] %s5253_s6 }
   0x6   :  { %5280 = sst [smem:[#allocation28_spill]] %s5254_s7 }
   0x7   :  { %5281 = sst [smem:[#allocation29_spill]] %s5255_s8 }
   0x8   :  { %5282 = sst [smem:[#allocation30_spill]] %s5256_s9 }
   0x9   :  { %5283 = sst [smem:[#allocation31_spill]] %s5257_s10 }
   0xa   :  { %5284 = sst [smem:[#allocation32_spill]] %s5258_s11 }
   0xb   :  { %5285 = sst [smem:[#allocation33_spill]] %s5259_s12 }
   0xc   :  { %5286 = sst [smem:[#allocation34_spill]] %s5260_s13 }
   0xd   :  { %5287 = sst [smem:[#allocation35_spill]] %s5261_s14 }
   0xe   :  { %5288 = sst [smem:[#allocation36_spill]] %s5262_s15 }
   0xf   :  { %5289 = sst [smem:[#allocation37_spill]] %s5263_s16 }
  0x10   :  { %5290 = sst [smem:[#allocation38_spill]] %s5264_s17 }
  0x11   :  { %5291 = sst [smem:[#allocation39_spill]] %s5265_s18 }
  0x12   :  { %23 = vsyncpa [#allocation4], 0 }
  0x13   :  { %24 = vsyncpa [#allocation6], 0 }
  0x14   :  { %26 = vsyncpa [#allocation6 + $0x1], 0 }
  0x15   :  { %27 = vsyncpa [#allocation9], 0 }
  0x16   :  { %29 = vsyncpa [#allocation9 + $0x1], 0  ;;  %s4439_s27 = smov 0   ;;  %s4441_s28 = smov 0  }
  0x17   :  { %s4443_s29 = smov 0   ;;  %s4445_s30 = smov 0  }
  0x18   :  { %s4447_s0 = smov 0   ;;  %s4449_s19 = smov 0  }
  0x19   :  { %s4451_s1 = smov 0   ;;  %s4453_s20 = smov 0  }
  0x1a LB: > { %5292 = sst [smem:[#allocation14_spill]] %s4306_s28  ;;  %s44_s21 = sadd.s32 1, %s4322_s19  ;;  %s4330_s20 = sphi %s4453_s20, %s35_s20   ;;  %s4326_s1 = sphi %s4451_s1, %s5344_s1   ;;  %s4322_s19 = sphi %s4449_s19, %s5343_s19   ;;  %s4318_s0 = sphi %s4447_s0, %s5342_s0   ;;  %s4314_s30 = sphi %s4445_s30, %s5341_s30   ;;  %s4310_s29 = sphi %s4443_s29, %s5340_s29   ;;  %s4306_s28 = sphi %s4441_s28, %s5339_s28   ;;  %s4302_s27 = sphi %s4439_s27, %s5338_s27  }
  0x1b   : > { %5293 = sst [smem:[#allocation15_spill]] %s4310_s29  ;;  %s47_s22 = sadd.s32 1, %s4326_s1 }
  0x1c   : > { %5294 = sst [smem:[#allocation16_spill]] %s4322_s19  ;;  %p45_p0 = scmp.ge.s32.totalorder %s44_s21, 2 }
  0x1d   : > { %5295 = sst [smem:[#allocation17_spill]] %s4326_s1  ;;  %s195_s2 = sadd.s32 1, %s4310_s29 }
  0x1e   : > { %5296 = sst [smem:[#allocation18_spill]] %s4330_s20  ;;  %p202_p1 = scmp.ne.s32.totalorder %s4310_s29, %s4306_s28 }
  0x1f   : > { %p203_p2 = scmp.eq.s32.totalorder %s4330_s20, 0  ;;  %s5346_s21 = smov (%p45_p0, %s44_s21), 0 }
  0x20   : > { %5297 = sst [smem:[#allocation19_spill]] %s5346_s21  ;;  %s5348_s22 = smov (!%p45_p0, %s47_s22), %s4326_s1 }
  0x21   : > { %s192_s23 = ssub.s32 %s4322_s19, %s5346_s21  ;;  %p204_p3 = por %p203_p2, %p202_p1 }
  0x22   : > { %p49_p4 = scmp.ge.s32.totalorder %s5348_s22, 2  ;;  %p193_p5 = scmp.eq.s32.totalorder %s192_s23, 0 }
  0x23   : > { %p3924_p6 = scmp.lt.s32.totalorder %s4330_s20, 4  ;;  %s580_s25 = sand.u32 1, %s4330_s20  }
  0x24   : > { %s5350_s22 = smov (%p49_p4, %s5348_s22), 0  ;;  %s4498_s26 = sand.u32 1, %s4310_s29  }
  0x25   : > { %5298 = sst [smem:[#allocation20_spill]] %s5350_s22  ;;  %s3889_s17 = smul.u32 192, %s4498_s26 }
  0x26   : > { %s4494_s24 = scalar_select %p193_p5, %s4310_s29, %s195_s2  }
  0x27   : > { %s3890_s16 = smul.u32 192, %s4322_s19  ;;  %p4502_p7 = pnand %p3924_p6, %p204_p3 }
  0x28   : > { %5299 = sst [smem:[#allocation21_spill]] %s4494_s24  ;;  %s584_s22 = scalar_lea.vmem [#allocation5], %s3889_s17 }
  0x29   : > { %s5301_s6 = sld [smem:[#allocation27_spill]]  ;;  %s592_s2 = sshll.u32 %s584_s22, 4  ;;  %s593_s2 = int_to_ptr.vmem [resolvable:$true] %s592_s2 }
  0x2a   : > { %s4509_s29 = scalar_lea.sflag [#allocation6], %s580_s25  ;;  %s4332_s18 = smov 192  }
  0x2b   : > { %s4333_s13 = smov 12   ;;  %s3282_s15 = sshll.u32 %s4498_s26, 8 }
  0x2c   : > { %s3767_s11 = sshll.u32 %s4322_s19, 8  ;;  %s5302_s12 = sld [smem:[#allocation33_spill]] }
  0x2d   : > { %s653_s17 = scalar_lea.vmem [#allocation8], %s3282_s15  ;;  %s4519_s22 = scalar_lea.sflag [#allocation9], %s580_s25 }
  0x2e   : > { %s661_s21 = sshll.u32 %s653_s17, 4  ;;  %s5303_s14 = sld [smem:[#allocation35_spill]]  ;;  %s662_s21 = int_to_ptr.vmem [resolvable:$true] %s661_s21 }
  0x2f   : > { %s589_s23 = scalar_lea.hbm %s5301_s6, %s3890_s16  ;;  %s5270_s25 = sadd.s32 4294967295, %s4330_s20  }
  0x30   : > { %s590_s24 = sshll.u32 %s589_s23, 4  ;;  %p208_p8 = scmp.ne.s32.totalorder %s4306_s28, %s4302_s27  ;;  %s591_s24 = int_to_ptr.hbm [resolvable:$true] %s590_s24 }
  0x31   : > { %3913 = dma.hbm_to_vmem [thread:$0]  (!%p4502_p7), %s591_s24, 3072, %s593_s2, %s4509_s29, %s4332_s18, %s4332_s18, %s4333_s13  }
  0x32   : > { %s658_s1 = scalar_lea.hbm %s5302_s12, %s3767_s11  ;;  %s4334_s13 = smov 256  }
  0x33   : > { %s659_s16 = sshll.u32 %s658_s1, 4  ;;  %s4335_s18 = smov 16   ;;  %s660_s16 = int_to_ptr.hbm [resolvable:$true] %s659_s16 }
  0x34   : > { %3919 = dma.hbm_to_vmem [thread:$0]  (!%p4502_p7), %s660_s16, 4096, %s662_s21, %s4519_s22, %s4334_s13, %s4334_s13, %s4335_s18  }
  0x35   : > { %s687_s24 = scalar_lea.hbm %s5303_s14, %s3767_s11  ;;  %s682_s2 = scalar_lea.vmem [#allocation10], %s3282_s15 }
  0x36   : > { %s688_s23 = sshll.u32 %s687_s24, 4  ;;  %s690_s1 = sshll.u32 %s682_s2, 4  ;;  %s4527_s23 = int_to_ptr.hbm [resolvable:$true] %s688_s23  ;;  %s4529_s1 = int_to_ptr.vmem [resolvable:$true] %s690_s1 }
  0x37   : > { %p4536_p9 = scmp.eq.s32.totalorder %s5270_s25, 0  ;;  %p3275_p10 = scmp.ge.s32.totalorder %s4330_s20, 1 }
  0x38   : > { %p521_p11 = scmp.lt.s32.totalorder %s4330_s20, 5  ;;  %s5306_s21 = sld [smem:[#allocation25_spill]] }
  0x39   : > { %p4544_p12 = por %p4536_p9, %p208_p8  ;;  %s4336_s18 = smov [#allocation3]  }
  0x3a   : > { %p4551_p13 = pnand %p3275_p10, %p521_p11  ;;  %s537_s7 = sshll.u32 %s4336_s18, 4  ;;  %s538_s7 = int_to_ptr.vmem [resolvable:$true] %s537_s7 }
  0x3b   : > { %s3279_s10 = sshll.u32 %s4498_s26, 6  ;;  %s3766_s24 = sshll.u32 %s4322_s19, 6 }
  0x3c   : > { %p3906_p0 = pneg %p4551_p13  ;;  %s5308_s8 = sld [smem:[#allocation29_spill]] }
  0x3d   : > { %s4338_s25 = smov 4   ;;  %s613_s12 = scalar_lea.vmem [#allocation7], %s3279_s10 }
  0x3e   : > { %s535_s13 = sshll.u32 %s5306_s21, 4  ;;  %p3907_p1 = pnand %p3906_p0, %p4536_p9  ;;  %s536_s13 = int_to_ptr.hbm [resolvable:$true] %s535_s13 }
  0x3f   : > { %s4337_s21 = smov 64   ;;  %s621_s14 = sshll.u32 %s613_s12, 4  ;;  %s622_s14 = int_to_ptr.vmem [resolvable:$true] %s621_s14 }
  0x40   : > { %3909 = dma.hbm_to_vmem [thread:$0]  (!%p3907_p1), %s536_s13, 1536, %s538_s7, [#allocation4], %s4337_s21, %s4337_s21, %s4338_s25  }
  0x41   : > { %3922 = dma.hbm_to_vmem [thread:$0]  (!%p4502_p7), %s4527_s23, 4096, %s4529_s1, %s4519_s22, %s4337_s21, %s4337_s21, %s4338_s25  }
  0x42   : > { %s618_s16 = scalar_lea.hbm %s5308_s8, %s3766_s24  ;;  %708 = sbr.rel (%p4551_p13) target bundleno = 2886 (0xb46), region = 92 }
  0x43   : > { %s619_s6 = sshll.u32 %s618_s16, 4  ;;  %s620_s6 = int_to_ptr.hbm [resolvable:$true] %s619_s6 }
  0x44   : > { %3916 = dma.hbm_to_vmem [thread:$0]  (!%p4502_p7), %s620_s6, 1024, %s622_s14, %s4509_s29, %s4337_s21, %s4337_s21, %s4338_s25  }
  0x47   : > { %4289 = dma.done.wait (%p4536_p9), [#allocation4], 1536  }
  0x48   : > { %4291 = vsyncadd (%p4536_p9), [#allocation4], 4294965760  ;;  %s5309_s26 = sadd.s32 4294967295, %s4330_s20   ;;  %s4581_s13 = sand.u32 1, %s4306_s28  }
  0x49   : > { %s715_s12 = sand.u32 1, %s5309_s26   ;;  %s3891_s6 = smul.u32 192, %s4581_s13 }
  0x4a   : > { %s716_s3 = scalar_lea.sflag [#allocation6], %s715_s12 }
  0x4b   : > { %s4584_s14 = scalar_lea.vmem [#allocation5], %s3891_s6 }
  0x4c   : > { %4293 = dma.done.wait (%p4544_p12), %s716_s3, 4096  }
  0x4d   : > { %4295 = vsyncadd (%p4544_p12), %s716_s3, 4294963200  ;;  %s3290_s29 = sshll.u32 %s4581_s13, 6  ;;  %s3291_s22 = sshll.u32 %s4581_s13, 8 }
  0x4e   : > { %s4592_s23 = scalar_lea.vmem [#allocation7], %s3290_s29  ;;  %s736_s1 = scalar_lea.sflag [#allocation9], %s715_s12 }
  0x4f   : > { %s4594_s25 = scalar_lea.vmem [#allocation8], %s3291_s22 }
  0x50   : > { %5310 = sst [smem:[#allocation22_spill]] %s4594_s25 }
  0x51   : > { %4297 = dma.done.wait (%p4544_p12), %s736_s1, 8192  }
  0x52   : > { %4299 = vsyncadd (%p4544_p12), %s736_s1, 4294959104  ;;  %p849_p2 = scmp.lt.s32.totalorder %s4318_s0, 1  ;;  %p854_p3 = scmp.lt.s32.totalorder %s4314_s30, 1 }
  0x53   : > { %s5311_s21 = sld [smem:[#allocation23_spill]]  ;;  %p3296_p4 = scmp.ne.s32.totalorder %s4314_s30, 0 }
  0x54   : > { %s5352_s0 = smov (!%p849_p2, %s4318_s0), 1  ;;  %s5313_s1 = sld [smem:[#allocation31_spill]] }
  0x55   : > { %s4604_s17 = scalar_select %p854_p3, %s4314_s30, 1 }
  0x56   : > { %s3892_s27 = smul.u32 24, %s5352_s0  ;;  %s5314_s7 = sld [smem:[#allocation28_spill]] }
  0x57   : > { %s3893_s12 = smul.u32 3, %s4604_s17  ;;  %s5315_s2 = sld [smem:[#allocation32_spill]] }
  0x58   : > { %s3294_s16 = sshll.u32 %s4604_s17, 2  ;;  %s5316_s20 = sld [smem:[#allocation36_spill]] }
  0x59   : > { %s4617_s26 = scalar_lea.vmem %s5311_s21, %s3892_s27  ;;  %s5317_s3 = sld [smem:[#allocation34_spill]] }
  0x5a   : > { %s869_s8 = scalar_lea.vmem %s5313_s1, %s4604_s17  ;;  %s5318_s1 = sld [smem:[#allocation39_spill]] }
  0x5c   : > { %s4631_s19 = scalar_lea.vmem %s5314_s7, %s3893_s12  ;;  %s4652_s7 = scalar_lea.vmem [#allocation10], %s3291_s22 }
  0x5d   : > { %s872_s15 = scalar_lea.vmem %s5315_s2, %s4604_s17  ;;  %889 = sbr.rel (%p3296_p4) target bundleno = 271 (0x10f), region = 116 }
  0x5e   : > { %s879_s25 = scalar_lea.vmem %s5316_s20, %s4604_s17  ;;  %s5319_s22 = sld [smem:[#allocation26_spill]] (!%p3296_p4) }
  0x5f   : > { %s4645_s9 = scalar_lea.vmem %s5317_s3, %s3294_s16 }
  0x60   : > { %s4650_s11 = scalar_lea.vmem %s5318_s1, %s3892_s27 }
  0x62   : > { %v3778_v0 = vld [vmem:[#allocation3 + $0x38] sm:$0xff]  ;;  %v3777_v2 = vld [vmem:[#allocation3 + $0x30] sm:$0xff]  ;;  %v3776_v4 = vld [vmem:[#allocation3 + $0x28] sm:$0xff]  ;;  %vm1008_vm0 = vcmask 523264  }
  0x63   : > { %v3782_v1 = vld [vmem:[#allocation3 + $0x58] sm:$0xff]  ;;  %1015 = vmatpush.bf16.msra.mxu0 %v3778_v0  ;;  %3879 = vmatpush.bf16.msra.mxu2 %v3778_v0  ;;  %v3781_v3 = vld [vmem:[#allocation3 + $0x50] sm:$0xff]  ;;  %v3780_v5 = vld [vmem:[#allocation3 + $0x48] sm:$0xff] }
  0x64   : > { %1037 = vmatpush.bf16.msra.mxu1 %v3782_v1  ;;  %v3775_v6 = vld [vmem:[#allocation3 + $0x20] sm:$0xff]  ;;  %v3769_v8 = vld [vmem:[%s4617_s26 + $0x4] sm:$0xf]  ;;  %v3301_v9 = vld [vmem:[%s4617_s26 + $0x8] sm:$0xf0] }
  0x65   : > { %v3779_v7 = vld [vmem:[#allocation3 + $0x40] sm:$0xff]  ;;  %v3304_v10 = vor.u32 %v3769_v8, %v3301_v9  ;;  %v3774_v11 = vld [vmem:[#allocation3 + $0x18] sm:$0xff]  ;;  %v3773_v12 = vld [vmem:[#allocation3 + $0x10] sm:$0xff] }
  0x66   : > { %v3772_v13 = vld [vmem:[#allocation3 + $0x8] sm:$0xff]  ;;  %v892_v14 = vld [vmem:[%s4617_s26 + $0x10] sm:$0x11]  ;;  %v3771_v15 = vld [vmem:[#allocation3] sm:$0xff] }
  0x67   : > { %1016 = vmatpush.bf16.msra.mxu0 %v3777_v2  ;;  %3880 = vmatpush.bf16.msra.mxu2 %v3777_v2  ;;  %v3299_v16 = vld [vmem:[%s4617_s26] sm:$0xf]  ;;  %v3770_v17 = vld [vmem:[%s4617_s26 + $0x4] sm:$0xf0]  ;;  %v928_v18 = vunpack.c.l.b16 %v892_v14  ;;  %v929_v19 = vunpack.c.h.b16 %v892_v14  ;;  %s5320_s26 = sld [smem:[#allocation24_spill]] }
  0x68   : > { %1038 = vmatpush.bf16.msra.mxu1 %v3781_v3  ;;  %v3300_v20 = vor.u32 %v3770_v17, %v3299_v16  ;;  %v4002_v25 = vld [vmem:[%s5319_s22] ss:$0 sm:$0xff] }
  0x69   : > { %v932_v21 = vpack.c.b16 %v928_v18, %v928_v18  ;;  %v933_v22 = vpack.c.b16 %v929_v19, %v929_v19 }
  0x6b   : > { %1017 = vmatpush.bf16.msra.mxu0 %v3776_v4  ;;  %3881 = vmatpush.bf16.msra.mxu2 %v3776_v4 }
  0x6c   : > { %1039 = vmatpush.bf16.msra.mxu1 %v3780_v5 }
  0x6d   : > { %v1051_v29 = vld [vmem:[%s5320_s26] sm:$0xff]  ;;  %v1053_v35 = vld [vmem:[%s5320_s26 + $0x10] sm:$0x1]  ;;  %v1052_v39 = vld [vmem:[%s5320_s26 + $0x8] sm:$0xff] }
  0x6f   : > { %1018 = vmatpush.bf16.msra.mxu0 %v3775_v6  ;;  %3882 = vmatpush.bf16.msra.mxu2 %v3775_v6 }
  0x70   : > { %1040 = vmatpush.bf16.msra.mxu1 %v3779_v7 }
  0x73   : > { %3353 = vmatmul.msk.bf16.vlgmr.msra.gmra.mxu1 %vm1008_vm0, %v3304_v10  ;;  %1019 = vmatpush.bf16.msra.mxu0 %v3774_v11 }
  0x74   : > { %3883 = vmatpush.bf16.msra.mxu2 %v3774_v11 }
  0x77   : > { %1020 = vmatpush.bf16.msra.mxu0 %v3773_v12 }
  0x78   : > { %3884 = vmatpush.bf16.msra.mxu2 %v3773_v12 }
  0x7b   : > { %1021 = vmatpush.bf16.msra.mxu0 %v3772_v13 }
  0x7c   : > { %3885 = vmatpush.bf16.msra.mxu2 %v3772_v13 }
  0x7f   : > { %1022 = vmatpush.bf16.msra.mxu0 %v3771_v15 }
  0x80   : > { %3886 = vmatpush.bf16.msra.mxu2 %v3771_v15 }
  0x82   : > { %1023 = vmatmul.bf16.vlgmr.msra.gmra.mxu0 %v3300_v20 }
  0x83   : > { %1028 = vmatmul.bf16.vlgmr.msra.gmra.mxu2 %v932_v21  ;;  %3354 = vmatmul.msk.bf16.gmra.mxu1 %vm1008_vm0, %v933_v22 }
  0xf0   : > { %v1042_v23 = vpop.f32.mrf.mxu1 }
  0xf8   : > { %v1044_v24 = vpop.f32.mrf.mxu1 }
  0xff   : > { %v1024_v26 = vpop.f32.mrf.mxu0 }
 0x100   : > { %v1025_v27 = vadd.f32 %v4002_v25, %v1024_v26  ;;  %v1047_v28 = vpop.f32.mrf.mxu1 }
 0x102   : > { %v1043_v30 = vadd.f32 %v1042_v23, %v1025_v27 }
 0x104   : > { %v1054_v31 = vadd.f32 %v1051_v29, %v1043_v30 }
 0x106   : > { %1057 = vst [vmem:[#allocation2 + $0x10] sm:$0xff] %v1054_v31  ;;  %v1029_v32 = vpop.f32.mrf.mxu2 }
 0x107   : > { %v1030_v33 = vadd.f32 %v4002_v25, %v1029_v32  ;;  %v1026_v34 = vpop.f32.mrf.mxu0 }
 0x108   : > { %v1027_v36 = vadd.f32 %v4002_v25, %v1026_v34  ;;  %v1049_v37 = vpop.f32.mrf.mxu1 }
 0x109   : > { %v1048_v38 = vadd.f32 %v1047_v28, %v1030_v33 }
 0x10a   : > { %v1045_v40 = vadd.f32 %v1044_v24, %v1027_v36 }
 0x10b   : > { %v1056_v41 = vadd.f32 %v1053_v35, %v1048_v38 }
 0x10c   : > { %v1055_v42 = vadd.f32 %v1052_v39, %v1045_v40 }
 0x10d   : > { %1059 = vst [vmem:[#allocation2 + $0x8] sm:$0x1] %v1056_v41 }
 0x10e   : > { %1058 = vst [vmem:[#allocation2] sm:$0xff] %v1055_v42  ;;  %v1031_v43 = vpop.f32.mrf.mxu2 }
 0x10f PF: > { %v1060_v44 = vld [vmem:[#allocation2 + $0x10] sm:$0xff]  ;;  %vm1219_vm1 = vcmask 1040384   ;;  %v4339_v48 = vmov 128.0   ;;  %v3441_v4 = vld [vmem:[%s4584_s14 + $0xa8] sm:$0xf]  ;;  %s5321_s16 = scalar_lea.vmem %s5251_s4, %s4604_s17  ;;  %s5322_s6 = scalar_lea.vmem %s5252_s5, %s4604_s17  ;;  %vm1495_vm12 = vcmask 261120  }
 0x110   : > { %1215 = vadd.xlane.f32.xlu0 %v1060_v44  ;;  %4009 = vrcp.f32 %v4339_v48  ;;  %v3805_v5 = vld [vmem:[%s4584_s14 + $0xb0] sm:$0xf0]  ;;  %v3804_v6 = vld [vmem:[%s4584_s14 + $0xac] sm:$0xf]  ;;  %v3443_v8 = vld [vmem:[%s4584_s14 + $0xb4] sm:$0xf0] }
 0x111   : > { %v3442_v7 = vor.u32 %v3805_v5, %v3441_v4  ;;  %v3449_v9 = vld [vmem:[%s4584_s14 + $0xb0] sm:$0xf]  ;;  %v3806_v10 = vld [vmem:[%s4584_s14 + $0xb8] sm:$0xf0]  ;;  %v3446_v11 = vor.u32 %v3804_v6, %v3443_v8  ;;  %v3801_v15 = vld [vmem:[%s4584_s14 + $0x94] sm:$0xf] }
 0x112   : > { %v3450_v12 = vor.u32 %v3806_v10, %v3449_v9  ;;  %v3429_v13 = vld [vmem:[%s4584_s14 + $0x90] sm:$0xf]  ;;  %v3802_v14 = vld [vmem:[%s4584_s14 + $0x98] sm:$0xf0]  ;;  %v3431_v17 = vld [vmem:[%s4584_s14 + $0x9c] sm:$0xf0] }
 0x113   : > { %1434 = vmatpush.bf16.msra.mxu0 %v3442_v7  ;;  %1452 = vmatpush.bf16.msra.mxu1 %v3446_v11  ;;  %v3430_v16 = vor.u32 %v3802_v14, %v3429_v13  ;;  %v3437_v18 = vld [vmem:[%s4584_s14 + $0x98] sm:$0xf]  ;;  %v3803_v19 = vld [vmem:[%s4584_s14 + $0xa0] sm:$0xf0]  ;;  %v3434_v20 = vor.u32 %v3801_v15, %v3431_v17  ;;  %v3798_v24 = vld [vmem:[%s4584_s14 + $0x7c] sm:$0xf] }
 0x114   : > { %v1062_v45 = vld [vmem:[#allocation2 + $0x8] sm:$0x1]  ;;  %1470 = vmatpush.bf16.msra.mxu2 %v3450_v12  ;;  %v3438_v21 = vor.u32 %v3803_v19, %v3437_v18  ;;  %v3417_v22 = vld [vmem:[%s4584_s14 + $0x78] sm:$0xf]  ;;  %v3799_v23 = vld [vmem:[%s4584_s14 + $0x80] sm:$0xf0] }
 0x115   : > { %v1220_v46 = vsel %vm1219_vm1, %v1062_v45, 0.0  ;;  %v1061_v47 = vld [vmem:[#allocation2] sm:$0xff]  ;;  %v3418_v25 = vor.u32 %v3799_v23, %v3417_v22  ;;  %v3425_v27 = vld [vmem:[%s4584_s14 + $0x80] sm:$0xf]  ;;  %v3795_v33 = vld [vmem:[%s4584_s14 + $0x64] sm:$0xf] }
 0x116   : > { %1221 = vadd.xlane.f32.xlu1 %v1220_v46  ;;  %v4010_v49 = vpop.eup %4009  ;;  %v3419_v26 = vld [vmem:[%s4584_s14 + $0x84] sm:$0xf0]  ;;  %v3800_v28 = vld [vmem:[%s4584_s14 + $0x88] sm:$0xf0]  ;;  %v3405_v31 = vld [vmem:[%s4584_s14 + $0x60] sm:$0xf] }
 0x117   : > { %v1224_v50 = vmul.f32 128.0, %v4010_v49  ;;  %vm1228_vm2 = vweird.f32 %v4010_v49  ;;  %1435 = vmatpush.bf16.msra.mxu0 %v3430_v16  ;;  %1453 = vmatpush.bf16.msra.mxu1 %v3434_v20  ;;  %v3422_v29 = vor.u32 %v3798_v24, %v3419_v26  ;;  %v3426_v30 = vor.u32 %v3800_v28, %v3425_v27  ;;  %v3796_v32 = vld [vmem:[%s4584_s14 + $0x68] sm:$0xf0]  ;;  %v3407_v35 = vld [vmem:[%s4584_s14 + $0x6c] sm:$0xf0]  ;;  %s4342_s29 = smov 64  }
 0x118   : > { %1217 = vadd.xlane.f32.xlu0 %v1061_v47  ;;  %1471 = vmatpush.bf16.msra.mxu2 %v3438_v21  ;;  %v3406_v34 = vor.u32 %v3796_v32, %v3405_v31  ;;  %v3413_v36 = vld [vmem:[%s4584_s14 + $0x68] sm:$0xf]  ;;  %v3797_v37 = vld [vmem:[%s4584_s14 + $0x70] sm:$0xf0]  ;;  %v3410_v38 = vor.u32 %v3795_v33, %v3407_v35  ;;  %v3792_v42 = vld [vmem:[%s4584_s14 + $0x4c] sm:$0xf] }
 0x119   : > { %v1225_v51 = vsub.f32 1.0, %v1224_v50  ;;  %v3414_v39 = vor.u32 %v3797_v37, %v3413_v36  ;;  %v3393_v40 = vld [vmem:[%s4584_s14 + $0x48] sm:$0xf]  ;;  %v3793_v41 = vld [vmem:[%s4584_s14 + $0x50] sm:$0xf0]  ;;  %vm1526_vm13 = vcmask 138240  }
 0x11a   : > { %v3394_v43 = vor.u32 %v3793_v41, %v3393_v40  ;;  %v3794_v46 = vld [vmem:[%s4584_s14 + $0x58] sm:$0xf0]  ;;  %v3788_v4 = vld [vmem:[%s4584_s14 + $0x28] sm:$0xf0]  ;;  %v3357_v9 = vld [vmem:[%s4584_s14] sm:$0xf] }
 0x11b   : > { %v1226_v52 = vmul.f32 %v4010_v49, %v1225_v51  ;;  %1436 = vmatpush.bf16.msra.mxu0 %v3418_v25  ;;  %1454 = vmatpush.bf16.msra.mxu1 %v3422_v29  ;;  %v3790_v50 = vld [vmem:[%s4584_s14 + $0x38] sm:$0xf0]  ;;  %v3789_v51 = vld [vmem:[%s4584_s14 + $0x34] sm:$0xf]  ;;  %v3784_v10 = vld [vmem:[%s4584_s14 + $0x8] sm:$0xf0] }
 0x11c   : > { %1472 = vmatpush.bf16.msra.mxu2 %v3426_v30  ;;  %v3783_v11 = vld [vmem:[%s4584_s14 + $0x4] sm:$0xf]  ;;  %v3358_v12 = vor.u32 %v3784_v10, %v3357_v9  ;;  %v3359_v13 = vld [vmem:[%s4584_s14 + $0xc] sm:$0xf0]  ;;  %v3365_v14 = vld [vmem:[%s4584_s14 + $0x8] sm:$0xf] }
 0x11d   : > { %v1227_v53 = vadd.f32 %v4010_v49, %v1226_v52  ;;  %v3785_v15 = vld [vmem:[%s4584_s14 + $0x10] sm:$0xf0]  ;;  %v3362_v17 = vor.u32 %v3783_v11, %v3359_v13  ;;  %vm1533_vm14 = vcmask 131072   ;;  %s4343_s0 = smov 32   ;;  %s5329_s28 = sld [smem:[#allocation30_spill]] }
 0x11e   : > { %v3366_v18 = vor.u32 %v3785_v15, %v3365_v14  ;;  %s5331_s22 = sld [smem:[#allocation22_spill]]  ;;  %p3763_p5 = scmp.ne.s32.totalorder %s4314_s30, 1 }
 0x11f   : > { %v4675_v54 = vsel %vm1228_vm2, %v4010_v49, %v1227_v53  ;;  %1437 = vmatpush.bf16.msra.mxu0 %v3406_v34  ;;  %1455 = vmatpush.bf16.msra.mxu1 %v3410_v38  ;;  %v3381_v49 = vld [vmem:[%s4584_s14 + $0x30] sm:$0xf]  ;;  %v3383_v53 = vld [vmem:[%s4584_s14 + $0x3c] sm:$0xf0]  ;;  %s5336_s24 = sld [smem:[#allocation38_spill]] (!%p3763_p5) }
 0x120   : > { %1473 = vmatpush.bf16.msra.mxu2 %v3414_v39  ;;  %v3382_v52 = vor.u32 %v3790_v50, %v3381_v49  ;;  %v4003_v39 = vld [vmem:[%s5321_s16] ss:$0 sm:$0xff] }
 0x123   : > { %1438 = vmatpush.bf16.msra.mxu0 %v3394_v43  ;;  %s5330_s20 = scalar_lea.vmem %s5329_s28, %s4604_s17  ;;  %s5335_s17 = sld [smem:[#allocation37_spill]] (!%p3763_p5) }
 0x127   : > { %1439 = vmatpush.bf16.msra.mxu0 %v3382_v52 }
 0x183   : > { %v1216_v55 = vpop.xlane.xlu0 %1215 }
 0x184   : > { %v1230_v56 = vmul.f32 %v4675_v54, %v1216_v55  ;;  %v3389_v55 = vld [vmem:[%s4584_s14 + $0x38] sm:$0xf] }
 0x186   : > { %v4678_v57 = vsub.f32 %v1060_v44, %v1230_v56  ;;  %v3395_v44 = vld [vmem:[%s4584_s14 + $0x54] sm:$0xf0]  ;;  %v3791_v56 = vld [vmem:[%s4584_s14 + $0x40] sm:$0xf0] }
 0x188   : > { %v1236_v58 = vmul.f32 %v4678_v57, %v4678_v57 }
 0x189   : > { %v1222_v59 = vpop.xlane.xlu1 %1221 }
 0x18a   : > { %1239 = vadd.xlane.f32.xlu1 %v1236_v58  ;;  %v1232_v61 = vmul.f32 %v4675_v54, %v1222_v59  ;;  %v3386_v58 = vor.u32 %v3789_v51, %v3383_v53  ;;  %v3390_v59 = vor.u32 %v3791_v56, %v3389_v55 }
 0x18b   : > { %v1218_v60 = vpop.xlane.xlu0 %1217 }
 0x18c   : > { %v1231_v62 = vmul.f32 %v4675_v54, %v1218_v60  ;;  %v4686_v0 = vsub.f32 %v1062_v45, %v1232_v61  ;;  %v3401_v45 = vld [vmem:[%s4584_s14 + $0x50] sm:$0xf]  ;;  %v3369_v60 = vld [vmem:[%s4584_s14 + $0x18] sm:$0xf]  ;;  %v3787_v61 = vld [vmem:[%s4584_s14 + $0x20] sm:$0xf0] }
 0x18d   : > { %v3402_v48 = vor.u32 %v3794_v46, %v3401_v45  ;;  %v4004_v46 = vld [vmem:[%s5322_s6] ss:$0 sm:$0xff] }
 0x18e   : > { %v4684_v63 = vsub.f32 %v1061_v47, %v1231_v62  ;;  %v1238_v2 = vmul.f32 %v4686_v0, %v4686_v0  ;;  %v3398_v47 = vor.u32 %v3792_v42, %v3395_v44  ;;  %v3786_v62 = vld [vmem:[%s4584_s14 + $0x1c] sm:$0xf] }
 0x18f   : > { %1474 = vmatpush.bf16.msra.mxu2 %v3402_v48 }
 0x190   : > { %v1237_v1 = vmul.f32 %v4684_v63, %v4684_v63  ;;  %v1243_v3 = vsel %vm1219_vm1, %v1238_v2, 0.0  ;;  %1456 = vmatpush.bf16.msra.mxu1 %v3398_v47  ;;  %v3371_v2 = vld [vmem:[%s4584_s14 + $0x24] sm:$0xf0] }
 0x191   : > { %v3374_v5 = vor.u32 %v3786_v62, %v3371_v2  ;;  %v1097_v2 = vld [vmem:[%s4631_s19] sm:$0x7]  ;;  %s4341_s19 = smov 96  }
 0x192   : > { %1241 = vadd.xlane.f32.xlu2 %v1237_v1  ;;  %v3370_v1 = vor.u32 %v3787_v61, %v3369_v60  ;;  %v1302_v10 = vperm.slane %v1097_v2, 2 }
 0x193   : > { %1475 = vmatpush.bf16.msra.mxu2 %v3390_v59 }
 0x194   : > { %1457 = vmatpush.bf16.msra.mxu1 %v3386_v58  ;;  %1440 = vmatpush.bf16.msra.mxu0 %v3370_v1 }
 0x198   : > { %1458 = vmatpush.bf16.msra.mxu1 %v3374_v5  ;;  %1441 = vmatpush.bf16.msra.mxu0 %v3358_v12 }
 0x19a   : > { %1244 = vadd.xlane.f32.xlu2 %v1243_v3  ;;  %v3377_v3 = vld [vmem:[%s4584_s14 + $0x20] sm:$0xf] }
 0x19b   : > { %v3378_v6 = vor.u32 %v3788_v4, %v3377_v3  ;;  %v1301_v3 = vperm.slane %v1097_v2, 1 }
 0x19c   : > { %1459 = vmatpush.bf16.msra.mxu1 %v3362_v17 }
 0x19d   : > { %1476 = vmatpush.bf16.msra.mxu2 %v3378_v6 }
 0x1a1   : > { %1477 = vmatpush.bf16.msra.mxu2 %v3366_v18 }
 0x1fd   : > { %v1240_v7 = vpop.xlane.xlu1 %1239 }
 0x1fe   : > { %v1246_v8 = vmul.f32 %v1240_v7, %v4675_v54 }
 0x200   : > { %v1249_v16 = vadd.f32 1e-06, %v1246_v8 }
 0x202   : > { %4011 = vrsqrt.f32 %v1249_v16  ;;  %vm1258_vm4 = vweird.f32 %v1249_v16 }
 0x205   : > { %v1242_v19 = vpop.xlane.xlu2 %1241 }
 0x206   : > { %v1247_v20 = vmul.f32 %v1242_v19, %v4675_v54  ;;  %v4340_v19 = vmov 0  }
 0x208   : > { %v4012_v21 = vpop.eup %4011  ;;  %v1250_v22 = vadd.f32 1e-06, %v1247_v20  ;;  %v4767_v20 = vsel %vm1219_vm1, 65535, %v4340_v19 }
 0x209   : > { %v1253_v23 = vmul.f32 %v4012_v21, %v1249_v16  ;;  %vm1259_vm3 = vweird.f32 %v4012_v21  ;;  %v1300_v16 = vperm.slane %v1097_v2, 0 }
 0x20a   : > { %4013 = vrsqrt.f32 %v1250_v22  ;;  %vm1260_vm5 = vmor %vm1258_vm4, %vm1259_vm3  ;;  %vm1268_vm7 = vweird.f32 %v1250_v22 }
 0x20b   : > { %v1254_v24 = vmul.f32 %v4012_v21, %v1253_v23 }
 0x20d   : > { %v1255_v25 = vmul.f32 0.5, %v1254_v24  ;;  %v1245_v26 = vpop.xlane.xlu2 %1244 }
 0x20e   : > { %v1248_v27 = vmul.f32 %v1245_v26, %v4675_v54 }
 0x20f   : > { %v1256_v28 = vsub.f32 1.5, %v1255_v25 }
 0x210   : > { %v4014_v29 = vpop.eup %4013  ;;  %v1251_v30 = vadd.f32 1e-06, %v1248_v27 }
 0x211   : > { %v1257_v31 = vmul.f32 %v4012_v21, %v1256_v28  ;;  %v1263_v32 = vmul.f32 %v4014_v29, %v1250_v22  ;;  %vm1269_vm6 = vweird.f32 %v4014_v29 }
 0x212   : > { %4015 = vrsqrt.f32 %v1251_v30  ;;  %vm1270_vm8 = vmor %vm1268_vm7, %vm1269_vm6  ;;  %vm1278_vm9 = vweird.f32 %v1251_v30 }
 0x213   : > { %v1264_v33 = vmul.f32 %v4014_v29, %v1263_v32  ;;  %v1261_v34 = vsel %vm1260_vm5, %v4012_v21, %v1257_v31 }
 0x214   : > { %v1282_v38 = vmul.f32 %v1261_v34, %v4678_v57 }
 0x215   : > { %v1265_v35 = vmul.f32 0.5, %v1264_v33 }
 0x216   : > { %v1288_v45 = vmul.f32 %v4003_v39, %v1282_v38 }
 0x217   : > { %v1266_v36 = vsub.f32 1.5, %v1265_v35 }
 0x218   : > { %v4016_v37 = vpop.eup %4015  ;;  %v1294_v49 = vadd.f32 %v4004_v46, %v1288_v45 }
 0x219   : > { %v1267_v40 = vmul.f32 %v4014_v29, %v1266_v36  ;;  %v1273_v41 = vmul.f32 %v4016_v37, %v1251_v30  ;;  %vm1279_vm10 = vweird.f32 %v4016_v37 }
 0x21a   : > { %vm1280_vm11 = vmor %vm1278_vm9, %vm1279_vm10 }
 0x21b   : > { %v1271_v42 = vsel %vm1270_vm8, %v4014_v29, %v1267_v40  ;;  %v1274_v43 = vmul.f32 %v4016_v37, %v1273_v41 }
 0x21c   : > { %v1283_v44 = vmul.f32 %v1271_v42, %v4684_v63 }
 0x21d   : > { %v1275_v57 = vmul.f32 0.5, %v1274_v43 }
 0x21e   : > { %v1289_v47 = vmul.f32 %v4003_v39, %v1283_v44 }
 0x21f   : > { %v1276_v48 = vsub.f32 1.5, %v1275_v57 }
 0x220   : > { %v1295_v50 = vadd.f32 %v4004_v46, %v1289_v47 }
 0x221   : > { %v1277_v51 = vmul.f32 %v4016_v37, %v1276_v48 }
 0x222   : > { %v1297_v52 = vpack.c.bf16 %v1295_v50, %v1294_v49 }
 0x223   : > { %v1281_v53 = vsel %vm1280_vm11, %v4016_v37, %v1277_v51 }
 0x224   : > { %1442 = vmatmul.bf16.vlgmr.msra.gmra.mxu0 %v1297_v52  ;;  %1460 = vmatmul.bf16.vlgmr.msra.gmra.mxu1 %v1297_v52  ;;  %v1284_v63 = vmul.f32 %v1281_v53, %v4686_v0 }
 0x225   : > { %1478 = vmatmul.bf16.vlgmr.msra.gmra.mxu2 %v1297_v52 }
 0x226   : > { %v1290_v55 = vmul.f32 %v4003_v39, %v1284_v63 }
 0x228   : > { %v1296_v56 = vadd.f32 %v4004_v46, %v1290_v55 }
 0x22a   : > { %v1298_v58 = vpack.c.bf16 %v1296_v56, %v1296_v56 }
 0x234   : > { %1447 = vmatmul.bf16.gmra.mxu0 %v1298_v58  ;;  %1465 = vmatmul.bf16.gmra.mxu1 %v1298_v58 }
 0x235   : > { %1483 = vmatmul.bf16.gmra.mxu2 %v1298_v58  ;;  %v3808_v58 = vld [vmem:[%s4592_s23 + $0x8] sm:$0xff] }
 0x2a1   : > { %v1443_v59 = vpop.f32.mrf.mxu0  ;;  %v1461_v60 = vpop.f32.mrf.mxu1 }
 0x2a2   : > { %v1462_v11 = vadd.f32 %v1461_v60, %v1301_v3  ;;  %v1444_v22 = vadd.f32 %v1443_v59, %v1300_v16 }
 0x2a4   : > { %v1488_v29 = vmul.f32 0.17677669, %v1444_v22 }
 0x2a8   : > { %v1479_v61 = vpop.f32.mrf.mxu2 }
 0x2a9   : > { %v1445_v62 = vpop.f32.mrf.mxu0  ;;  %v1463_v1 = vpop.f32.mrf.mxu1  ;;  %v1480_v26 = vadd.f32 %v1479_v61, %v1302_v10 }
 0x2aa   : > { %v1464_v0 = vadd.f32 %v1463_v1, %v1301_v3  ;;  %v1446_v21 = vadd.f32 %v1445_v62, %v1300_v16  ;;  %v3807_v62 = vld [vmem:[%s4592_s23] sm:$0xff] }
 0x2ac   : > { %v4762_v17 = vpack.c.bf16 %v1464_v0, %v1462_v11  ;;  %v1489_v27 = vmul.f32 0.17677669, %v1446_v21 }
 0x2ae   : > { %v1503_v24 = vsel %vm1495_vm12, %v4762_v17, 0  ;;  %v1491_v31 = vpack.c.bf16 %v1489_v27, %v1488_v29 }
 0x2b0   : > { %v1481_v4 = vpop.f32.mrf.mxu2 }
 0x2b1   : > { %v1448_v5 = vpop.f32.mrf.mxu0  ;;  %v1466_v6 = vpop.f32.mrf.mxu1  ;;  %v1482_v23 = vadd.f32 %v1481_v4, %v1302_v10 }
 0x2b2   : > { %v1467_v7 = vadd.f32 %v1466_v6, %v1301_v3  ;;  %v1449_v32 = vadd.f32 %v1448_v5, %v1300_v16 }
 0x2b3   : > { %v4773_v30 = vpack.c.bf16 %v1482_v23, %v1480_v26 }
 0x2b4   : > { %v4758_v8 = vpack.c.bf16 %v1467_v7, %v1467_v7  ;;  %v1490_v33 = vmul.f32 0.17677669, %v1449_v32 }
 0x2b6   : > { %v1506_v9 = vsel %vm1495_vm12, %v4758_v8, 0  ;;  %v1492_v34 = vpack.c.bf16 %v1490_v33, %v1490_v33 }
 0x2b7   : > { %1514 = vmatpush.bf16.xpose.msra.mxu3 %v1506_v9 }
 0x2b8   : > { %v1484_v12 = vpop.f32.mrf.mxu2 }
 0x2b9   : > { %v1485_v13 = vadd.f32 %v1484_v12, %v1302_v10  ;;  %v1450_v14 = vpop.f32.mrf.mxu0  ;;  %v1468_v15 = vpop.f32.mrf.mxu1 }
 0x2bb   : > { %v4764_v18 = vpack.c.bf16 %v1485_v13, %v1485_v13 }
 0x2bd   : > { %v1613_v25 = vand.u32 %v4767_v20, %v4764_v18 }
 0x2bf   : > { %1515 = vmatpush.bf16.xpose.msra.mxu3 %v1503_v24 }
 0x2c0   : > { %v1486_v28 = vpop.f32.mrf.mxu2 }
 0x2c6   : > { %3451 = vmatmul.msk.bf16.vlgmr.msra.gmra.mxu3 %vm1495_vm12, %v1491_v31 }
 0x2c7   : > { %1621 = vmatpush.bf16.msrb.mxu3 %v1613_v25 }
 0x2cb   : > { %1622 = vmatpush.bf16.msrb.mxu3 %v4773_v30 }
 0x2cf   : > { %1847 = vmatpush.bf16.msra.mxu3 %v3808_v58 }
 0x2d3   : > { %1848 = vmatpush.bf16.msra.mxu3 %v3807_v62 }
 0x2d6   : > { %3452 = vmatmul.msk.bf16.gmra.mxu3 %vm1495_vm12, %v1492_v34 }
 0x349   : > { %v1517_v35 = vpop.f32.mrf.mxu3 }
 0x34a   : > { %v1527_v36 = vsel %vm1526_vm13, %v1517_v35, -inf }
 0x34b   : > { %1528 = vmax.xlane.f32.xlu0 %v1527_v36 }
 0x351   : > { %v1519_v37 = vpop.f32.mrf.mxu3 }
 0x352   : > { %v1530_v38 = vsel %vm1526_vm13, %v1519_v37, -inf }
 0x353   : > { %1531 = vmax.xlane.f32.xlu1 %v1530_v38 }
 0x359   : > { %v1522_v39 = vpop.f32.mrf.mxu3 }
 0x35a   : > { %v1534_v40 = vsel %vm1533_vm14, %v1522_v39, -inf }
 0x35b   : > { %1535 = vmax.xlane.f32.xlu2 %v1534_v40 }
 0x361   : > { %v1524_v41 = vpop.f32.mrf.mxu3 }
 0x3be   : > { %v1529_v42 = vpop.xlane.xlu0 %1528 }
 0x3bf   : > { %v1537_v43 = vsub.f32 %v1517_v35, %v1529_v42 }
 0x3c1   : > { %v1540_v44 = vmul.f32 1.442695, %v1537_v43 }
 0x3c3   : > { %4017 = vpow2.f32 %v1540_v44 }
 0x3c6   : > { %v1532_v45 = vpop.xlane.xlu1 %1531 }
 0x3c7   : > { %v1538_v46 = vsub.f32 %v1519_v37, %v1532_v45 }
 0x3c9   : > { %v4781_v57 = vpop.eup %4017  ;;  %v1542_v47 = vmul.f32 1.442695, %v1538_v46 }
 0x3ca   : > { %v1546_v48 = vsel %vm1526_vm13, %v4781_v57, 0.0 }
 0x3cb   : > { %4019 = vpow2.f32 %v1542_v47  ;;  %1547 = vadd.xlane.f32.xlu0 %v1546_v48 }
 0x3ce   : > { %v1536_v49 = vpop.xlane.xlu2 %1535 }
 0x3cf   : > { %v1539_v50 = vsub.f32 %v1522_v39, %v1536_v49 }
 0x3d1   : > { %v4785_v51 = vpop.eup %4019  ;;  %v1544_v52 = vmul.f32 1.442695, %v1539_v50 }
 0x3d2   : > { %v1549_v53 = vsel %vm1526_vm13, %v4785_v51, 0.0 }
 0x3d3   : > { %4021 = vpow2.f32 %v1544_v52  ;;  %1550 = vadd.xlane.f32.xlu1 %v1549_v53 }
 0x3d9   : > { %v4789_v63 = vpop.eup %4021 }
 0x3da   : > { %v1552_v55 = vsel %vm1533_vm14, %v4789_v63, 0.0 }
 0x3db   : > { %1553 = vadd.xlane.f32.xlu2 %v1552_v55 }
 0x3df   : > { %1645 = vrot.lane.b32.xlu0 %v4758_v8, %s4341_s19 }
 0x3e7   : > { %1865 = vrot.lane.b32.xlu0 %v4758_v8, %s4342_s29 }
 0x3ec   : > { %1643 = vrot.lane.b32.xlu1 %v4762_v17, %s4341_s19 }
 0x3ef   : > { %1863 = vrot.lane.b32.xlu0 %v4762_v17, %s4342_s29 }
 0x3f3   : > { %1637 = vrot.lane.b32.xlu2 %v1491_v31, %s4341_s19 }
 0x3f4   : > { %2050 = vrot.lane.b32.xlu1 %v4758_v8, %s4343_s0 }
 0x3f7   : > { %2044 = vrot.lane.b32.xlu0 %v1491_v31, %s4343_s0 }
 0x3fb   : > { %1639 = vrot.lane.b32.xlu2 %v1492_v34, %s4341_s19 }
 0x3fc   : > { %1859 = vrot.lane.b32.xlu1 %v1491_v31, %s4342_s29 }
 0x403   : > { %2048 = vrot.lane.b32.xlu2 %v4762_v17, %s4343_s0 }
 0x404   : > { %2046 = vrot.lane.b32.xlu1 %v1492_v34, %s4343_s0 }
 0x40b   : > { %1861 = vrot.lane.b32.xlu2 %v1492_v34, %s4342_s29 }
 0x43e   : > { %v1548_v56 = vpop.xlane.xlu0 %1547 }
 0x43f   : > { %4023 = vrcp.f32 %v1548_v56  ;;  %v1566_v7 = vand.u32 2147483648, %v1548_v56  ;;  %vm1560_vm0 = vweird.f32 %v1548_v56  ;;  %v1564_v8 = vand.u32 2147483647, %v1548_v56 }
 0x441   : > { %v1567_v16 = vor.u32 1.1754944e-38, %v1566_v7  ;;  %vm1565_vm4 = vcmp.eq.f32.partialorder %v1564_v8, 8.507059e+37 }
 0x445   : > { %v4024_v59 = vpop.eup %4023 }
 0x446   : > { %v1556_v60 = vmul.f32 %v4024_v59, %v1548_v56  ;;  %v1551_v61 = vpop.xlane.xlu1 %1550  ;;  %vm1561_vm15 = vweird.f32 %v4024_v59 }
 0x447   : > { %4025 = vrcp.f32 %v1551_v61  ;;  %vm4813_vm2 = vmor %vm1560_vm0, %vm1561_vm15  ;;  %v1579_v10 = vand.u32 2147483647, %v1551_v61  ;;  %v1581_v11 = vand.u32 2147483648, %v1551_v61  ;;  %vm1575_vm5 = vweird.f32 %v1551_v61 }
 0x448   : > { %v1557_v1 = vsub.f32 1.0, %v1556_v60 }
 0x449   : > { %v1582_v21 = vor.u32 1.1754944e-38, %v1581_v11  ;;  %vm1580_vm7 = vcmp.eq.f32.partialorder %v1579_v10, 8.507059e+37 }
 0x44a   : > { %v1558_v2 = vmul.f32 %v4024_v59, %v1557_v1 }
 0x44c   : > { %v1559_v4 = vadd.f32 %v4024_v59, %v1558_v2 }
 0x44d   : > { %v4026_v3 = vpop.eup %4025 }
 0x44e   : > { %v1571_v5 = vmul.f32 %v4026_v3, %v1551_v61  ;;  %v1554_v6 = vpop.xlane.xlu2 %1553  ;;  %v1563_v13 = vsel %vm4813_vm2, %v4024_v59, %v1559_v4  ;;  %vm1576_vm3 = vweird.f32 %v4026_v3 }
 0x44f   : > { %4027 = vrcp.f32 %v1554_v6  ;;  %vm1577_vm6 = vmor %vm1575_vm5, %vm1576_vm3  ;;  %v1568_v22 = vsel %vm1565_vm4, %v1567_v16, %v1563_v13  ;;  %v1596_v35 = vand.u32 2147483648, %v1554_v6  ;;  %vm1590_vm9 = vweird.f32 %v1554_v6 }
 0x450   : > { %v1572_v0 = vsub.f32 1.0, %v1571_v5  ;;  %v1569_v28 = vmul.f32 %v4781_v57, %v1568_v22  ;;  %v1594_v37 = vand.u32 2147483647, %v1554_v6 }
 0x451   : > { %v1646_v12 = vpop.permute.xlu0 %1645  ;;  %v1597_v41 = vor.u32 1.1754944e-38, %v1596_v35 }
 0x452   : > { %v1573_v14 = vmul.f32 %v4026_v3, %v1572_v0  ;;  %v1657_v15 = vsel %vm1495_vm12, %v1646_v12, 0  ;;  %vm1595_vm11 = vcmp.eq.f32.partialorder %v1594_v37, 8.507059e+37 }
 0x453   : > { %1665 = vmatpush.bf16.xpose.msrb.mxu0 %v1657_v15  ;;  %3887 = vmatpush.bf16.xpose.msrb.mxu2 %v1657_v15 }
 0x454   : > { %v1574_v17 = vadd.f32 %v4026_v3, %v1573_v14 }
 0x455   : > { %v4028_v19 = vpop.eup %4027 }
 0x456   : > { %v1578_v23 = vsel %vm1577_vm6, %v4026_v3, %v1574_v17  ;;  %v1586_v24 = vmul.f32 %v4028_v19, %v1554_v6  ;;  %v1638_v27 = vpop.permute.xlu2 %1637  ;;  %vm1591_vm8 = vweird.f32 %v4028_v19 }
 0x457   : > { %v1583_v25 = vsel %vm1580_vm7, %v1582_v21, %v1578_v23  ;;  %vm1592_vm10 = vmor %vm1590_vm9, %vm1591_vm8 }
 0x458   : > { %v1587_v26 = vsub.f32 1.0, %v1586_v24  ;;  %v1584_v29 = vmul.f32 %v4785_v51, %v1583_v25 }
 0x459   : > { %v1866_v33 = vpop.permute.xlu0 %1865 }
 0x45a   : > { %v1588_v31 = vmul.f32 %v4028_v19, %v1587_v26  ;;  %v1600_v32 = vpack.c.bf16 %v1584_v29, %v1569_v28  ;;  %v1877_v39 = vsel %vm1495_vm12, %v1866_v33, 0 }
 0x45c   : > { %3453 = vmatmul.msk.bf16.vlgmr.msrb.gmra.mxu3 %vm1526_vm13, %v1600_v32  ;;  %v1589_v34 = vadd.f32 %v4028_v19, %v1588_v31 }
 0x45e   : > { %v1644_v36 = vpop.permute.xlu1 %1643  ;;  %v1593_v40 = vsel %vm1592_vm10, %v4028_v19, %v1589_v34  ;;  %v1640_v42 = vpop.permute.xlu2 %1639 }
 0x45f   : > { %v1654_v38 = vsel %vm1495_vm12, %v1644_v36, 0  ;;  %v1598_v43 = vsel %vm1595_vm11, %v1597_v41, %v1593_v40 }
 0x460   : > { %1666 = vmatpush.bf16.xpose.msrb.mxu0 %v1654_v38  ;;  %3888 = vmatpush.bf16.xpose.msrb.mxu2 %v1654_v38  ;;  %v1599_v46 = vmul.f32 %v4789_v63, %v1598_v43 }
 0x461   : > { %v1864_v44 = vpop.permute.xlu0 %1863 }
 0x462   : > { %v1874_v47 = vsel %vm1495_vm12, %v1864_v44, 0  ;;  %v1601_v48 = vpack.c.bf16 %v1599_v46, %v1599_v46 }
 0x466   : > { %v2051_v45 = vpop.permute.xlu1 %2050  ;;  %v2049_v49 = vpop.permute.xlu2 %2048 }
 0x467   : > { %v2062_v57 = vsel %vm1495_vm12, %v2051_v45, 0  ;;  %3455 = vmatmul.msk.bf16.vlgmr.msrb.gmra.mxu0 %vm1495_vm12, %v1638_v27  ;;  %3456 = vmatmul.msk.bf16.vlgmr.msrb.gmra.mxu2 %vm1495_vm12, %v1640_v42  ;;  %v2059_v50 = vsel %vm1495_vm12, %v2049_v49, 0 }
 0x468   : > { %1885 = vmatpush.bf16.xpose.msra.mxu0 %v1877_v39  ;;  %2070 = vmatpush.bf16.xpose.msrb.mxu3 %v2062_v57 }
 0x469   : > { %v2045_v9 = vpop.permute.xlu0 %2044 }
 0x46c   : > { %3454 = vmatmul.msk.bf16.gmra.mxu3 %vm1526_vm13, %v1601_v48 }
 0x46e   : > { %v1860_v51 = vpop.permute.xlu1 %1859  ;;  %v1862_v52 = vpop.permute.xlu2 %1861 }
 0x470   : > { %1886 = vmatpush.bf16.xpose.msra.mxu0 %v1874_v47  ;;  %2071 = vmatpush.bf16.xpose.msrb.mxu3 %v2059_v50 }
 0x476   : > { %v2047_v11 = vpop.permute.xlu1 %2046 }
 0x477   : > { %3479 = vmatmul.msk.bf16.vlgmr.msra.gmra.mxu0 %vm1495_vm12, %v1860_v51 }
 0x487   : > { %3480 = vmatmul.msk.bf16.gmra.mxu0 %vm1495_vm12, %v1862_v52 }
 0x4df   : > { %v1624_v53 = vpop.f32.mrf.mxu3 }
 0x4e4   : > { %v1668_v63 = vpop.f32.mrf.mxu0 }
 0x4e5   : > { %v1677_v55 = vsel %vm1526_vm13, %v1668_v63, -inf }
 0x4e6   : > { %1678 = vmax.xlane.f32.xlu0 %v1677_v55 }
 0x4e7   : > { %v1626_v56 = vpop.f32.mrf.mxu3 }
 0x4e8   : > { %v1633_v58 = vpack.c.bf16 %v1626_v56, %v1624_v53 }
 0x4ea   : > { %v1673_v59 = vpop.f32.mrf.mxu2  ;;  %3477 = vmatmul.msk.bf16.vlgmr.msra.gmra.mxu3 %vm1495_vm12, %v1633_v58 }
 0x4eb   : > { %v1683_v60 = vsel %vm1533_vm14, %v1673_v59, -inf }
 0x4ec   : > { %v1670_v61 = vpop.f32.mrf.mxu0  ;;  %1684 = vmax.xlane.f32.xlu1 %v1683_v60 }
 0x4ed   : > { %v1680_v62 = vsel %vm1526_vm13, %v1670_v61, -inf }
 0x4ee   : > { %1681 = vmax.xlane.f32.xlu2 %v1680_v62 }
 0x4ef   : > { %v1629_v1 = vpop.f32.mrf.mxu3 }
 0x4f0   : > { %v1634_v6 = vpack.c.bf16 %v1629_v1, %v1629_v1 }
 0x4f2   : > { %v1675_v2 = vpop.f32.mrf.mxu2 }
 0x4f4   : > { %v4838_v3 = vpop.f32.mrf.mxu0 }
 0x4f5   : > { %v1897_v4 = vsel %vm1526_vm13, %v4838_v3, -inf }
 0x4f6   : > { %1898 = vmax.xlane.f32.xlu0 %v1897_v4 }
 0x4f7   : > { %v1631_v5 = vpop.f32.mrf.mxu3 }
 0x4fa   : > { %3478 = vmatmul.msk.bf16.gmra.mxu3 %vm1495_vm12, %v1634_v6 }
 0x4fc   : > { %v1890_v7 = vpop.f32.mrf.mxu0 }
 0x4fd   : > { %v1900_v8 = vsel %vm1526_vm13, %v1890_v7, -inf }
 0x4fe   : > { %1901 = vmax.xlane.f32.xlu2 %v1900_v8 }
 0x504   : > { %v4844_v0 = vpop.f32.mrf.mxu0 }
 0x505   : > { %v1903_v40 = vsel %vm1533_vm14, %v4844_v0, -inf }
 0x50a   : > { %3493 = vmatmul.msk.bf16.vlgmr.msrb.gmra.mxu3 %vm1495_vm12, %v2045_v9 }
 0x50c   : > { %v1895_v10 = vpop.f32.mrf.mxu0 }
 0x51a   : > { %3494 = vmatmul.msk.bf16.gmra.mxu3 %vm1495_vm12, %v2047_v11 }
 0x559   : > { %v1679_v12 = vpop.xlane.xlu0 %1678 }
 0x55a   : > { %v1686_v13 = vsub.f32 %v1668_v63, %v1679_v12 }
 0x55c   : > { %v1689_v14 = vmul.f32 1.442695, %v1686_v13 }
 0x55e   : > { %4029 = vpow2.f32 %v1689_v14 }
 0x55f   : > { %v1685_v15 = vpop.xlane.xlu1 %1684 }
 0x560   : > { %v1688_v16 = vsub.f32 %v1673_v59, %v1685_v15 }
 0x561   : > { %v1682_v17 = vpop.xlane.xlu2 %1681 }
 0x562   : > { %v1693_v19 = vmul.f32 1.442695, %v1688_v16  ;;  %v1687_v21 = vsub.f32 %v1670_v61, %v1682_v17 }
 0x564   : > { %v4848_v22 = vpop.eup %4029  ;;  %4031 = vpow2.f32 %v1693_v19  ;;  %v1691_v23 = vmul.f32 1.442695, %v1687_v21 }
 0x565   : > { %v1695_v24 = vsel %vm1526_vm13, %v4848_v22, 0.0 }
 0x566   : > { %4033 = vpow2.f32 %v1691_v23  ;;  %1696 = vadd.xlane.f32.xlu2 %v1695_v24 }
 0x569   : > { %v1899_v57 = vpop.xlane.xlu0 %1898 }
 0x56a   : > { %v4852_v25 = vpop.eup %4031  ;;  %v1906_v47 = vsub.f32 %v4838_v3, %v1899_v57 }
 0x56b   : > { %v1701_v28 = vsel %vm1533_vm14, %v4852_v25, 0.0 }
 0x56c   : > { %v4854_v26 = vpop.eup %4033  ;;  %v1909_v48 = vmul.f32 1.442695, %v1906_v47 }
 0x56d   : > { %v4856_v27 = vpop.f32.mrf.mxu3  ;;  %v1698_v29 = vsel %vm1526_vm13, %v4854_v26, 0.0 }
 0x56e   : > { %1702 = vadd.xlane.f32.xlu2 %v1701_v28  ;;  %1699 = vadd.xlane.f32.xlu1 %v1698_v29 }
 0x571   : > { %v1902_v34 = vpop.xlane.xlu2 %1901 }
 0x572   : > { %v1907_v35 = vsub.f32 %v1890_v7, %v1902_v34 }
 0x574   : > { %v1911_v38 = vmul.f32 1.442695, %v1907_v35 }
 0x575   : > { %v4862_v31 = vpop.f32.mrf.mxu3 }
 0x576   : > { %4035 = vpow2.f32 %v1911_v38 }
 0x577   : > { %4037 = vpow2.f32 %v1909_v48 }
 0x57c   : > { %v4872_v42 = vpop.eup %4035 }
 0x57d   : > { %v4864_v32 = vpop.f32.mrf.mxu3  ;;  %v1918_v44 = vsel %vm1526_vm13, %v4872_v42, 0.0  ;;  %v4883_v49 = vpop.eup %4037 }
 0x57e   : > { %v1915_v50 = vsel %vm1526_vm13, %v4883_v49, 0.0 }
 0x585   : > { %v1857_v33 = vpop.f32.mrf.mxu3 }
 0x586   : > { %1753 = vrot.lane.b32.xlu2 %v4773_v30, %s4341_s19 }
 0x58d   : > { %v2073_v36 = vpop.f32.mrf.mxu3 }
 0x58e   : > { %v2082_v37 = vsel %vm1526_vm13, %v2073_v36, -inf }
 0x58f   : > { %2083 = vmax.xlane.f32.xlu1 %v2082_v37 }
 0x595   : > { %v2075_v39 = vpop.f32.mrf.mxu3 }
 0x596   : > { %v2085_v41 = vsel %vm1526_vm13, %v2075_v39, -inf }
 0x597   : > { %1904 = vmax.xlane.f32.xlu1 %v1903_v40  ;;  %2086 = vmax.xlane.f32.xlu0 %v2085_v41 }
 0x59d   : > { %v4874_v43 = vpop.f32.mrf.mxu3 }
 0x59e   : > { %v2088_v46 = vsel %vm1533_vm14, %v4874_v43, -inf }
 0x59f   : > { %1919 = vadd.xlane.f32.xlu1 %v1918_v44 }
 0x5a5   : > { %v2080_v45 = vpop.f32.mrf.mxu3 }
 0x5a7   : > { %2089 = vmax.xlane.f32.xlu1 %v2088_v46 }
 0x5ab   : > { %1755 = vrot.lane.b32.xlu0 %v4764_v18, %s4341_s19 }
 0x5d5   : > { %1916 = vadd.xlane.f32.xlu0 %v1915_v50 }
 0x5d9   : > { %v1697_v52 = vpop.xlane.xlu2 %1696 }
 0x5da   : > { %v1715_v19 = vand.u32 2147483648, %v1697_v52  ;;  %vm1709_vm4 = vweird.f32 %v1697_v52  ;;  %v1713_v21 = vand.u32 2147483647, %v1697_v52 }
 0x5dc   : > { %v1716_v35 = vor.u32 1.1754944e-38, %v1715_v19  ;;  %vm1714_vm7 = vcmp.eq.f32.partialorder %v1713_v21, 8.507059e+37 }
 0x5e1   : > { %v1700_v51 = vpop.xlane.xlu1 %1699  ;;  %v1703_v7 = vpop.xlane.xlu2 %1702 }
 0x5e2   : > { %4039 = vrcp.f32 %v1700_v51  ;;  %v1730_v15 = vand.u32 2147483648, %v1700_v51  ;;  %vm1724_vm2 = vweird.f32 %v1700_v51  ;;  %v1728_v17 = vand.u32 2147483647, %v1700_v51 }
 0x5e3   : > { %4041 = vrcp.f32 %v1697_v52  ;;  %v1745_v48 = vand.u32 2147483648, %v1703_v7  ;;  %vm1739_vm9 = vweird.f32 %v1703_v7  ;;  %v1743_v50 = vand.u32 2147483647, %v1703_v7 }
 0x5e4   : > { %v1731_v29 = vor.u32 1.1754944e-38, %v1730_v15  ;;  %vm1729_vm6 = vcmp.eq.f32.partialorder %v1728_v17, 8.507059e+37 }
 0x5e5   : > { %vm1744_vm11 = vcmp.eq.f32.partialorder %v1743_v50, 8.507059e+37 }
 0x5e8   : > { %v4040_v56 = vpop.eup %4039 }
 0x5e9   : > { %1971 = vrot.lane.b32.xlu0 %v4773_v30, %s4342_s29  ;;  %v4042_v58 = vpop.eup %4041  ;;  %v1720_v60 = vmul.f32 %v4040_v56, %v1700_v51  ;;  %vm1725_vm15 = vweird.f32 %v4040_v56  ;;  %v1754_v45 = vpop.permute.xlu2 %1753 }
 0x5ea   : > { %v1705_v2 = vmul.f32 %v4042_v58, %v1697_v52  ;;  %vm1710_vm0 = vweird.f32 %v4042_v58  ;;  %vm1726_vm3 = vmor %vm1724_vm2, %vm1725_vm15  ;;  %v1746_v52 = vor.u32 1.1754944e-38, %v1745_v48 }
 0x5eb   : > { %v1721_v6 = vsub.f32 1.0, %v1720_v60  ;;  %vm1711_vm5 = vmor %vm1709_vm4, %vm1710_vm0 }
 0x5ec   : > { %v1706_v8 = vsub.f32 1.0, %v1705_v2 }
 0x5ed   : > { %v1722_v10 = vmul.f32 %v4040_v56, %v1721_v6 }
 0x5ee   : > { %v1707_v11 = vmul.f32 %v4042_v58, %v1706_v8 }
 0x5ef   : > { %v1723_v13 = vadd.f32 %v4040_v56, %v1722_v10 }
 0x5f0   : > { %v1708_v16 = vadd.f32 %v4042_v58, %v1707_v11 }
 0x5f1   : > { %v1727_v23 = vsel %vm1726_vm3, %v4040_v56, %v1723_v13 }
 0x5f2   : > { %v1712_v33 = vsel %vm1711_vm5, %v4042_v58, %v1708_v16  ;;  %v1732_v37 = vsel %vm1729_vm6, %v1731_v29, %v1727_v23 }
 0x5f3   : > { %v1717_v40 = vsel %vm1714_vm7, %v1716_v35, %v1712_v33  ;;  %v1733_v41 = vmul.f32 %v4854_v26, %v1732_v37 }
 0x5f4   : > { %v1718_v46 = vmul.f32 %v4848_v22, %v1717_v40 }
 0x5f6   : > { %v1749_v57 = vpack.c.bf16 %v1733_v41, %v1718_v46 }
 0x602   : > { %v2084_v53 = vpop.xlane.xlu1 %2083 }
 0x603   : > { %v2091_v63 = vsub.f32 %v2073_v36, %v2084_v53 }
 0x605   : > { %v2094_v55 = vmul.f32 1.442695, %v2091_v63 }
 0x607   : > { %4043 = vpow2.f32 %v2094_v55 }
 0x60a   : > { %v2087_v59 = vpop.xlane.xlu0 %2086  ;;  %v1905_v61 = vpop.xlane.xlu1 %1904 }
 0x60b   : > { %v2092_v62 = vsub.f32 %v2075_v39, %v2087_v59  ;;  %v1908_v4 = vsub.f32 %v4844_v0, %v1905_v61  ;;  %v3810_v61 = vld [vmem:[%s4592_s23 + $0x18] sm:$0xff] }
 0x60c   : > { %1811 = vmatpush.bf16.msra.mxu2 %v3810_v61 }
 0x60d   : > { %v4889_v1 = vpop.eup %4043  ;;  %v2096_v3 = vmul.f32 1.442695, %v2092_v62  ;;  %v1913_v9 = vmul.f32 1.442695, %v1908_v4 }
 0x60e   : > { %v2100_v5 = vsel %vm1526_vm13, %v4889_v1, 0.0 }
 0x60f   : > { %2101 = vadd.xlane.f32.xlu1 %v2100_v5  ;;  %4045 = vpow2.f32 %v2096_v3  ;;  %v3809_v5 = vld [vmem:[%s4592_s23 + $0x10] sm:$0xff] }
 0x610   : > { %4047 = vrcp.f32 %v1703_v7  ;;  %1812 = vmatpush.bf16.msra.mxu2 %v3809_v5 }
 0x611   : > { %4049 = vpow2.f32 %v1913_v9 }
 0x612   : > { %v1920_v63 = vpop.xlane.xlu1 %1919 }
 0x613   : > { %v1950_v17 = vand.u32 2147483648, %v1920_v63  ;;  %vm1944_vm2 = vweird.f32 %v1920_v63  ;;  %v1948_v23 = vand.u32 2147483647, %v1920_v63 }
 0x615   : > { %v4894_v12 = vpop.eup %4045  ;;  %vm1949_vm6 = vcmp.eq.f32.partialorder %v1948_v23, 8.507059e+37 }
 0x616   : > { %v2103_v0 = vsel %vm1526_vm13, %v4894_v12, 0.0  ;;  %v4048_v14 = vpop.eup %4047 }
 0x617   : > { %2104 = vadd.xlane.f32.xlu2 %v2103_v0  ;;  %v1735_v24 = vmul.f32 %v4048_v14, %v1703_v7  ;;  %v4898_v28 = vpop.eup %4049  ;;  %vm1740_vm8 = vweird.f32 %v4048_v14 }
 0x618   : > { %v1921_v39 = vsel %vm1533_vm14, %v4898_v28, 0.0  ;;  %vm1741_vm10 = vmor %vm1739_vm9, %vm1740_vm8 }
 0x619   : > { %v1736_v38 = vsub.f32 1.0, %v1735_v24 }
 0x61a   : > { %v2090_v55 = vpop.xlane.xlu1 %2089 }
 0x61b   : > { %v1737_v44 = vmul.f32 %v4048_v14, %v1736_v38  ;;  %v2093_v56 = vsub.f32 %v4874_v43, %v2090_v55 }
 0x61d   : > { %v1756_v34 = vpop.permute.xlu0 %1755  ;;  %v1738_v47 = vadd.f32 %v4048_v14, %v1737_v44  ;;  %v2098_v58 = vmul.f32 1.442695, %v2093_v56 }
 0x61e   : > { %v1765_v36 = vand.u32 %v1756_v34, %v4767_v20 }
 0x61f   : > { %1922 = vadd.xlane.f32.xlu2 %v1921_v39  ;;  %v1742_v51 = vsel %vm1741_vm10, %v4048_v14, %v1738_v47  ;;  %4051 = vpow2.f32 %v2098_v58 }
 0x620   : > { %1773 = vmatpush.bf16.msrb.mxu1 %v1765_v36  ;;  %v1747_v26 = vsel %vm1744_vm11, %v1746_v52, %v1742_v51  ;;  %v1951_v36 = vor.u32 1.1754944e-38, %v1950_v17 }
 0x621   : > { %v1748_v22 = vmul.f32 %v4852_v25, %v1747_v26 }
 0x623   : > { %v1750_v53 = vpack.c.bf16 %v1748_v22, %v1748_v22 }
 0x624   : > { %1774 = vmatpush.bf16.msrb.mxu1 %v1754_v45 }
 0x625   : > { %v4915_v59 = vpop.eup %4051 }
 0x627   : > { %3457 = vmatmul.msk.bf16.vlgmr.msrb.gmra.mxu1 %vm1526_vm13, %v1749_v57 }
 0x628   : > { %1973 = vrot.lane.b32.xlu1 %v4764_v18, %s4342_s29 }
 0x630   : > { %2158 = vrot.lane.b32.xlu1 %v4764_v18, %s4343_s0  ;;  %v2106_v18 = vsel %vm1533_vm14, %v4915_v59, 0.0 }
 0x637   : > { %3458 = vmatmul.msk.bf16.gmra.mxu1 %vm1526_vm13, %v1750_v53 }
 0x638   : > { %2156 = vrot.lane.b32.xlu1 %v4773_v30, %s4343_s0 }
 0x648   : > { %v1917_v25 = vpop.xlane.xlu0 %1916 }
 0x649   : > { %4053 = vrcp.f32 %v1917_v25  ;;  %v1935_v16 = vand.u32 2147483648, %v1917_v25  ;;  %vm1929_vm0 = vweird.f32 %v1917_v25  ;;  %v1933_v19 = vand.u32 2147483647, %v1917_v25 }
 0x64a   : > { %4055 = vrcp.f32 %v1920_v63 }
 0x64b   : > { %v1936_v34 = vor.u32 1.1754944e-38, %v1935_v16  ;;  %vm1934_vm5 = vcmp.eq.f32.partialorder %v1933_v19, 8.507059e+37 }
 0x64f   : > { %v4054_v60 = vpop.eup %4053 }
 0x650   : > { %v4056_v62 = vpop.eup %4055  ;;  %v1925_v30 = vmul.f32 %v4054_v60, %v1917_v25  ;;  %vm1930_vm14 = vweird.f32 %v4054_v60 }
 0x651   : > { %v1940_v43 = vmul.f32 %v4056_v62, %v1920_v63  ;;  %vm1945_vm15 = vweird.f32 %v4056_v62  ;;  %vm1931_vm3 = vmor %vm1929_vm0, %vm1930_vm14 }
 0x652   : > { %v1926_v4 = vsub.f32 1.0, %v1925_v30  ;;  %vm1946_vm4 = vmor %vm1944_vm2, %vm1945_vm15 }
 0x653   : > { %v1941_v6 = vsub.f32 1.0, %v1940_v43 }
 0x654   : > { %v1927_v7 = vmul.f32 %v4054_v60, %v1926_v4 }
 0x655   : > { %v1942_v9 = vmul.f32 %v4056_v62, %v1941_v6 }
 0x656   : > { %v1928_v0 = vadd.f32 %v4054_v60, %v1927_v7 }
 0x657   : > { %v1943_v15 = vadd.f32 %v4056_v62, %v1942_v9 }
 0x658   : > { %v1932_v24 = vsel %vm1931_vm3, %v4054_v60, %v1928_v0 }
 0x659   : > { %v1947_v33 = vsel %vm1946_vm4, %v4056_v62, %v1943_v15  ;;  %v1937_v39 = vsel %vm1934_vm5, %v1936_v34, %v1932_v24 }
 0x65a   : > { %v1952_v44 = vsel %vm1949_vm6, %v1951_v36, %v1947_v33  ;;  %v1938_v57 = vmul.f32 %v4883_v49, %v1937_v39  ;;  %v3811_v39 = vld [vmem:[%s4592_s23 + $0x20] sm:$0xff] }
 0x65b   : > { %v1953_v48 = vmul.f32 %v4872_v42, %v1952_v44  ;;  %v1972_v51 = vpop.permute.xlu0 %1971 }
 0x65d   : > { %v1969_v56 = vpack.c.bf16 %v1953_v48, %v1938_v57 }
 0x662   : > { %2107 = vadd.xlane.f32.xlu1 %v2106_v18 }
 0x682   : > { %v4920_v2 = vpop.xlane.xlu1 %2101 }
 0x683   : > { %4057 = vrcp.f32 %v4920_v2  ;;  %v2120_v49 = vand.u32 2147483648, %v4920_v2  ;;  %vm2114_vm11 = vweird.f32 %v4920_v2  ;;  %v2118_v42 = vand.u32 2147483647, %v4920_v2 }
 0x685   : > { %v2121_v30 = vor.u32 1.1754944e-38, %v2120_v49  ;;  %vm2119_vm2 = vcmp.eq.f32.partialorder %v2118_v42, 8.507059e+37 }
 0x689   : > { %v4927_v8 = vpop.eup %4057 }
 0x68a   : > { %v4923_v3 = vpop.xlane.xlu2 %2104  ;;  %v2110_v14 = vmul.f32 %v4927_v8, %v4920_v2  ;;  %vm2115_vm8 = vweird.f32 %v4927_v8 }
 0x68b   : > { %4059 = vrcp.f32 %v4923_v3  ;;  %v2135_v50 = vand.u32 2147483648, %v4923_v3  ;;  %vm2129_vm9 = vweird.f32 %v4923_v3  ;;  %v2133_v26 = vand.u32 2147483647, %v4923_v3  ;;  %vm4963_vm14 = vmor %vm2114_vm11, %vm2115_vm8 }
 0x68c   : > { %v2111_v29 = vsub.f32 1.0, %v2110_v14 }
 0x68d   : > { %v2136_v18 = vor.u32 1.1754944e-38, %v2135_v50  ;;  %vm2134_vm15 = vcmp.eq.f32.partialorder %v2133_v26, 8.507059e+37 }
 0x68e   : > { %v2112_v45 = vmul.f32 %v4927_v8, %v2111_v29 }
 0x690   : > { %v2113_v52 = vadd.f32 %v4927_v8, %v2112_v45 }
 0x691   : > { %v4929_v10 = vpop.eup %4059 }
 0x692   : > { %v2125_v11 = vmul.f32 %v4929_v10, %v4923_v3  ;;  %v4933_v13 = vpop.xlane.xlu2 %1922  ;;  %vm2130_vm7 = vweird.f32 %v4929_v10  ;;  %v2117_v60 = vsel %vm4963_vm14, %v4927_v8, %v2113_v52 }
 0x693   : > { %4061 = vrcp.f32 %v4933_v13  ;;  %vm4952_vm10 = vmor %vm2129_vm9, %vm2130_vm7  ;;  %v1965_v43 = vand.u32 2147483648, %v4933_v13  ;;  %vm1959_vm3 = vweird.f32 %v4933_v13  ;;  %v2122_v3 = vsel %vm2119_vm2, %v2121_v30, %v2117_v60 }
 0x694   : > { %v2126_v21 = vsub.f32 1.0, %v2125_v11  ;;  %v2123_v7 = vmul.f32 %v4889_v1, %v2122_v3 }
 0x695   : > { %v1966_v6 = vor.u32 1.1754944e-38, %v1965_v43 }
 0x696   : > { %v2127_v37 = vmul.f32 %v4929_v10, %v2126_v21 }
 0x698   : > { %v2128_v47 = vadd.f32 %v4929_v10, %v2127_v37 }
 0x699   : > { %v4062_v35 = vpop.eup %4061 }
 0x69a   : > { %v1974_v38 = vpop.permute.xlu1 %1973  ;;  %v1955_v40 = vmul.f32 %v4062_v35, %v4933_v13  ;;  %v2132_v63 = vsel %vm4952_vm10, %v4929_v10, %v2128_v47  ;;  %vm1960_vm0 = vweird.f32 %v4062_v35 }
 0x69b   : > { %v1983_v41 = vand.u32 %v1974_v38, %v4767_v20  ;;  %v2137_v2 = vsel %vm2134_vm15, %v2136_v18, %v2132_v63  ;;  %vm1961_vm4 = vmor %vm1959_vm3, %vm1960_vm0  ;;  %v3812_v38 = vld [vmem:[%s4592_s23 + $0x28] sm:$0xff] }
 0x69c   : > { %v1956_v46 = vsub.f32 1.0, %v1955_v40  ;;  %v2138_v4 = vmul.f32 %v4894_v12, %v2137_v2  ;;  %2029 = vmatpush.bf16.msrb.mxu2 %v3812_v38  ;;  %v3814_v40 = vld [vmem:[%s4592_s23 + $0x38] sm:$0xff]  ;;  %v4005_v18 = vld [vmem:[%s5330_s20] ss:$0 sm:$0xff]  ;;  %v3843_v38 = vld [vmem:[%s5331_s22 + $0xe4] sm:$0xf] }
 0x69d   : > { %1991 = vmatpush.bf16.msra.mxu1 %v1983_v41  ;;  %v3813_v41 = vld [vmem:[%s4592_s23 + $0x30] sm:$0xff]  ;;  %v4095_v2 = vld [vmem:[#allocation2 + $0x10] sm:$0xff] }
 0x69e   : > { %v1957_v22 = vmul.f32 %v4062_v35, %v1956_v46  ;;  %v2154_v11 = vpack.c.bf16 %v2138_v4, %v2123_v7 }
 0x6a0   : > { %v1958_v62 = vadd.f32 %v4062_v35, %v1957_v22  ;;  %2030 = vmatpush.bf16.msrb.mxu2 %v3811_v39 }
 0x6a1   : > { %1992 = vmatpush.bf16.msra.mxu1 %v1972_v51 }
 0x6a2   : > { %v2159_v55 = vpop.permute.xlu1 %2158  ;;  %v1962_v5 = vsel %vm1961_vm4, %v4062_v35, %v1958_v62 }
 0x6a3   : > { %v2168_v25 = vand.u32 %v2159_v55, %v4767_v20  ;;  %v1963_v20 = vand.u32 2147483647, %v4933_v13 }
 0x6a4   : > { %v1776_v61 = vpop.f32.mrf.mxu1  ;;  %3481 = vmatmul.msk.bf16.vlgmr.msra.gmra.mxu1 %vm1526_vm13, %v1969_v56 }
 0x6a5   : > { %2176 = vmatpush.bf16.msrb.mxu0 %v2168_v25  ;;  %vm1964_vm5 = vcmp.eq.f32.partialorder %v1963_v20, 8.507059e+37  ;;  %2214 = vmatpush.bf16.msrb.mxu1 %v3814_v40  ;;  %v3623_v40 = vld [vmem:[%s5331_s22 + $0xf0] sm:$0xf0] }
 0x6a6   : > { %v1967_v9 = vsel %vm1964_vm5, %v1966_v6, %v1962_v5  ;;  %v4096_v6 = vld [vmem:[#allocation2] sm:$0xff] }
 0x6a7   : > { %v1968_v14 = vmul.f32 %v4898_v28, %v1967_v9 }
 0x6a9   : > { %v1970_v13 = vpack.c.bf16 %v1968_v14, %v1968_v14  ;;  %2215 = vmatpush.bf16.msrb.mxu1 %v3813_v41  ;;  %v4097_v14 = vld [vmem:[#allocation2 + $0x8] sm:$0x1] }
 0x6aa   : > { %v2157_v8 = vpop.permute.xlu1 %2156  ;;  %v3629_v41 = vld [vmem:[%s5331_s22 + $0xe8] sm:$0xf] }
 0x6ab   : > { %2177 = vmatpush.bf16.msrb.mxu0 %v2157_v8 }
 0x6ac   : > { %v1778_v10 = vpop.f32.mrf.mxu1 }
 0x6ad   : > { %v1785_v0 = vpack.c.bf16 %v1778_v10, %v1776_v61 }
 0x6ae   : > { %3495 = vmatmul.msk.bf16.vlgmr.msrb.gmra.mxu0 %vm1526_vm13, %v2154_v11 }
 0x6af   : > { %3467 = vmatmul.msk.bf16.vlgmr.msra.gmra.mxu2 %vm1495_vm12, %v1785_v0 }
 0x6b4   : > { %v1781_v15 = vpop.f32.mrf.mxu1  ;;  %3482 = vmatmul.msk.bf16.gmra.mxu1 %vm1526_vm13, %v1970_v13 }
 0x6b5   : > { %v1786_v16 = vpack.c.bf16 %v1781_v15, %v1781_v15 }
 0x6bc   : > { %v1783_v12 = vpop.f32.mrf.mxu1 }
 0x6bf   : > { %3468 = vmatmul.msk.bf16.gmra.mxu2 %vm1495_vm12, %v1786_v16 }
 0x6d5   : > { %v2108_v1 = vpop.xlane.xlu1 %2107 }
 0x6d6   : > { %4063 = vrcp.f32 %v2108_v1  ;;  %v2150_v23 = vand.u32 2147483648, %v2108_v1  ;;  %v2148_v28 = vand.u32 2147483647, %v2108_v1  ;;  %vm2144_vm7 = vweird.f32 %v2108_v1 }
 0x6d8   : > { %v2151_v33 = vor.u32 1.1754944e-38, %v2150_v23  ;;  %vm2149_vm9 = vcmp.eq.f32.partialorder %v2148_v28, 8.507059e+37 }
 0x6dc   : > { %v4064_v17 = vpop.eup %4063 }
 0x6dd   : > { %v2140_v19 = vmul.f32 %v4064_v17, %v2108_v1  ;;  %vm2145_vm6 = vweird.f32 %v4064_v17 }
 0x6de   : > { %vm2146_vm8 = vmor %vm2144_vm7, %vm2145_vm6 }
 0x6df   : > { %v2141_v21 = vsub.f32 1.0, %v2140_v19 }
 0x6e1   : > { %v2142_v24 = vmul.f32 %v4064_v17, %v2141_v21 }
 0x6e3   : > { %v2143_v29 = vadd.f32 %v4064_v17, %v2142_v24 }
 0x6e5   : > { %v2147_v34 = vsel %vm2146_vm8, %v4064_v17, %v2143_v29 }
 0x6e6   : > { %v2152_v35 = vsel %vm2149_vm9, %v2151_v33, %v2147_v34 }
 0x6e7   : > { %v2153_v36 = vmul.f32 %v4915_v59, %v2152_v35 }
 0x6e9   : > { %v2155_v37 = vpack.c.bf16 %v2153_v36, %v2153_v36  ;;  %v3621_v36 = vld [vmem:[%s5331_s22 + $0xe0] sm:$0xf] }
 0x6eb   : > { %3496 = vmatmul.msk.bf16.gmra.mxu0 %vm1526_vm13, %v2155_v37  ;;  %v3845_v37 = vld [vmem:[%s5331_s22 + $0xec] sm:$0xf0] }
 0x6ec   : > { %v3622_v39 = vor.u32 %v3845_v37, %v3621_v36  ;;  %v3828_v36 = vld [vmem:[%s5331_s22 + $0x6c] sm:$0xf]  ;;  %v3567_v37 = vld [vmem:[%s5331_s22 + $0x78] sm:$0xf0] }
 0x6ee   : > { %2483 = vmatpush.bf16.msra.mxu2 %v3622_v39  ;;  %v3541_v39 = vld [vmem:[%s5331_s22 + $0x40] sm:$0xf] }
 0x721   : > { %v1994_v44 = vpop.f32.mrf.mxu1 }
 0x729   : > { %v1996_v45 = vpop.f32.mrf.mxu1 }
 0x72a   : > { %v2003_v46 = vpack.c.bf16 %v1996_v45, %v1994_v44  ;;  %v3846_v44 = vld [vmem:[%s5331_s22 + $0xf4] sm:$0xf0]  ;;  %v3626_v45 = vor.u32 %v3843_v38, %v3623_v40  ;;  %v3570_v38 = vor.u32 %v3828_v36, %v3567_v37  ;;  %v3825_v40 = vld [vmem:[%s5331_s22 + $0x4c] sm:$0xf0]  ;;  %v4006_v37 = vld [vmem:[%s869_s8] ss:$0 sm:$0xff] }
 0x72b   : > { %v2179_v57 = vpop.f32.mrf.mxu0 }
 0x72c   : > { %3491 = vmatmul.msk.bf16.vlgmr.msrb.gmra.mxu2 %vm1495_vm12, %v2003_v46  ;;  %v3630_v46 = vor.u32 %v3846_v44, %v3629_v41  ;;  %2501 = vmatpush.bf16.msra.mxu3 %v3626_v45  ;;  %v3823_v41 = vld [vmem:[%s5331_s22 + $0x44] sm:$0xf]  ;;  %v3542_v44 = vor.u32 %v3825_v40, %v3541_v39  ;;  %v3543_v45 = vld [vmem:[%s5331_s22 + $0x50] sm:$0xf0] }
 0x72e   : > { %2519 = vmatpush.bf16.msra.mxu0 %v3630_v46  ;;  %v3549_v46 = vld [vmem:[%s5331_s22 + $0x48] sm:$0xf] }
 0x731   : > { %v1999_v47 = vpop.f32.mrf.mxu1 }
 0x732   : > { %v1814_v48 = vpop.f32.mrf.mxu2  ;;  %v2004_v52 = vpack.c.bf16 %v1999_v47, %v1999_v47  ;;  %v3631_v47 = vld [vmem:[%s5331_s22 + $0xf8] sm:$0xf0] }
 0x733   : > { %v2181_v59 = vpop.f32.mrf.mxu0  ;;  %v1851_v56 = vadd.f32 %v4856_v27, %v1814_v48 }
 0x734   : > { %v2188_v50 = vpack.c.bf16 %v2181_v59, %v2179_v57  ;;  %v3844_v57 = vld [vmem:[%s5331_s22 + $0xec] sm:$0xf]  ;;  %v3605_v59 = vld [vmem:[%s5331_s22 + $0xc0] sm:$0xf] }
 0x735   : > { %v3634_v48 = vor.u32 %v3844_v57, %v3631_v47  ;;  %v3826_v57 = vld [vmem:[%s5331_s22 + $0x54] sm:$0xf0]  ;;  %v3546_v47 = vor.u32 %v3823_v41, %v3543_v45 }
 0x736   : > { %3505 = vmatmul.msk.bf16.vlgmr.msrb.gmra.mxu1 %vm1495_vm12, %v2188_v50  ;;  %v3841_v50 = vld [vmem:[%s5331_s22 + $0xcc] sm:$0xf0] }
 0x737   : > { %2537 = vmatpush.bf16.msra.mxu1 %v3634_v48  ;;  %v3550_v48 = vor.u32 %v3826_v57, %v3549_v46 }
 0x739   : > { %v2001_v51 = vpop.f32.mrf.mxu1 }
 0x73a   : > { %v1816_v26 = vpop.f32.mrf.mxu2  ;;  %v3839_v51 = vld [vmem:[%s5331_s22 + $0xc4] sm:$0xf] }
 0x73b   : > { %v1853_v30 = vadd.f32 %v4862_v31, %v1816_v26  ;;  %v3607_v26 = vld [vmem:[%s5331_s22 + $0xd0] sm:$0xf0] }
 0x73c   : > { %3492 = vmatmul.msk.bf16.gmra.mxu2 %vm1495_vm12, %v2004_v52  ;;  %v3606_v52 = vor.u32 %v3841_v50, %v3605_v59  ;;  %v3824_v59 = vld [vmem:[%s5331_s22 + $0x4c] sm:$0xf]  ;;  %v3551_v50 = vld [vmem:[%s5331_s22 + $0x58] sm:$0xf0] }
 0x73e   : > { %2484 = vmatpush.bf16.msra.mxu2 %v3606_v52  ;;  %v3525_v52 = vld [vmem:[%s5331_s22 + $0x20] sm:$0xf] }
 0x742   : > { %v1819_v22 = vpop.f32.mrf.mxu2 }
 0x743   : > { %v1856_v9 = vadd.f32 %v4864_v32, %v1819_v22  ;;  %v3613_v22 = vld [vmem:[%s5331_s22 + $0xc8] sm:$0xf] }
 0x74a   : > { %v1821_v49 = vpop.f32.mrf.mxu2 }
 0x74b   : > { %v3842_v49 = vld [vmem:[%s5331_s22 + $0xd4] sm:$0xf0] }
 0x768   : > { %v2184_v53 = vpop.f32.mrf.mxu0 }
 0x769   : > { %v2189_v42 = vpack.c.bf16 %v2184_v53, %v2184_v53  ;;  %v3610_v53 = vor.u32 %v3839_v51, %v3607_v26  ;;  %v3554_v51 = vor.u32 %v3824_v59, %v3551_v50  ;;  %v3821_v26 = vld [vmem:[%s5331_s22 + $0x2c] sm:$0xf0] }
 0x76b   : > { %3506 = vmatmul.msk.bf16.gmra.mxu1 %vm1495_vm12, %v2189_v42  ;;  %v3614_v42 = vor.u32 %v3842_v49, %v3613_v22  ;;  %2502 = vmatpush.bf16.msra.mxu3 %v3610_v53  ;;  %v3819_v22 = vld [vmem:[%s5331_s22 + $0x24] sm:$0xf]  ;;  %v3526_v53 = vor.u32 %v3821_v26, %v3525_v52 }
 0x76d   : > { %2520 = vmatpush.bf16.msra.mxu0 %v3614_v42  ;;  %v3527_v42 = vld [vmem:[%s5331_s22 + $0x30] sm:$0xf0] }
 0x770   : > { %v2186_v63 = vpop.f32.mrf.mxu0 }
 0x771   : > { %v3840_v63 = vld [vmem:[%s5331_s22 + $0xcc] sm:$0xf] }
 0x7af   : > { %v2032_v55 = vpop.f32.mrf.mxu2 }
 0x7b0   : > { %v2041_v58 = vadd.f32 %v2032_v55, %v1851_v56  ;;  %v3615_v55 = vld [vmem:[%s5331_s22 + $0xd8] sm:$0xf0] }
 0x7b1   : > { %v3618_v56 = vor.u32 %v3840_v63, %v3615_v55  ;;  %v3533_v63 = vld [vmem:[%s5331_s22 + $0x28] sm:$0xf]  ;;  %v3822_v55 = vld [vmem:[%s5331_s22 + $0x34] sm:$0xf0] }
 0x7b3   : > { %v2217_v25 = vpop.f32.mrf.mxu1  ;;  %2538 = vmatpush.bf16.msra.mxu1 %v3618_v56 }
 0x7b4   : > { %v2226_v60 = vadd.f32 %v2217_v25, %v2041_v58  ;;  %v3589_v58 = vld [vmem:[%s5331_s22 + $0xa0] sm:$0xf]  ;;  %v3835_v25 = vld [vmem:[%s5331_s22 + $0xa4] sm:$0xf] }
 0x7b6   : > { %v2232_v61 = vadd.f32 %v4005_v18, %v2226_v60 }
 0x7b7   : > { %v2034_v62 = vpop.f32.mrf.mxu2 }
 0x7b8   : > { %v4999_v43 = vadd.f32 %v4095_v2, %v2232_v61  ;;  %v2042_v20 = vadd.f32 %v2034_v62, %v1853_v30  ;;  %v3591_v61 = vld [vmem:[%s5331_s22 + $0xb0] sm:$0xf0]  ;;  %v3597_v62 = vld [vmem:[%s5331_s22 + $0xa8] sm:$0xf]  ;;  %v3838_v30 = vld [vmem:[%s5331_s22 + $0xb4] sm:$0xf0] }
 0x7b9   : > { %v3594_v2 = vor.u32 %v3835_v25, %v3591_v61  ;;  %v3820_v25 = vld [vmem:[%s5331_s22 + $0x2c] sm:$0xf]  ;;  %v3509_v61 = vld [vmem:[%s5331_s22] sm:$0xf] }
 0x7ba   : > { %2238 = vadd.xlane.f32.xlu0 %v4999_v43 }
 0x7bb   : > { %v2219_v3 = vpop.f32.mrf.mxu1  ;;  %2503 = vmatpush.bf16.msra.mxu3 %v3594_v2  ;;  %v3815_v2 = vld [vmem:[%s5331_s22 + $0x4] sm:$0xf] }
 0x7bc   : > { %v2227_v27 = vadd.f32 %v2219_v3, %v2042_v20  ;;  %v3598_v20 = vor.u32 %v3838_v30, %v3597_v62  ;;  %v3836_v3 = vld [vmem:[%s5331_s22 + $0xac] sm:$0xf]  ;;  %v3817_v30 = vld [vmem:[%s5331_s22 + $0xc] sm:$0xf0] }
 0x7be   : > { %v2233_v4 = vadd.f32 %v4005_v18, %v2227_v27  ;;  %v3599_v27 = vld [vmem:[%s5331_s22 + $0xb8] sm:$0xf0]  ;;  %2521 = vmatpush.bf16.msra.mxu0 %v3598_v20  ;;  %v3511_v20 = vld [vmem:[%s5331_s22 + $0x10] sm:$0xf0] }
 0x7bf   : > { %v2037_v5 = vpop.f32.mrf.mxu2 }
 0x7c0   : > { %v5002_v7 = vadd.f32 %v4096_v6, %v2233_v4  ;;  %v2043_v10 = vadd.f32 %v2037_v5, %v1856_v9  ;;  %v3602_v4 = vor.u32 %v3836_v3, %v3599_v27  ;;  %v3573_v5 = vld [vmem:[%s5331_s22 + $0x80] sm:$0xf]  ;;  %v3833_v6 = vld [vmem:[%s5331_s22 + $0x8c] sm:$0xf0]  ;;  %v3510_v27 = vor.u32 %v3817_v30, %v3509_v61  ;;  %v3853_v30 = vld [vmem:[%s4652_s7 + $0x30] sm:$0xff] }
 0x7c1   : > { %v3574_v9 = vor.u32 %v3833_v6, %v3573_v5  ;;  %v3517_v5 = vld [vmem:[%s5331_s22 + $0x8] sm:$0xf]  ;;  %v3818_v6 = vld [vmem:[%s5331_s22 + $0x14] sm:$0xf0]  ;;  %v3868_v61 = vld [vmem:[%s4652_s7 + $0xa8] sm:$0xff] }
 0x7c2   : > { %2240 = vadd.xlane.f32.xlu2 %v5002_v7  ;;  %2539 = vmatpush.bf16.msra.mxu1 %v3602_v4  ;;  %v3514_v4 = vor.u32 %v3815_v2, %v3511_v20  ;;  %v3861_v2 = vld [vmem:[%s4652_s7 + $0x70] sm:$0xff]  ;;  %v3867_v20 = vld [vmem:[%s4652_s7 + $0xa0] sm:$0xff] }
 0x7c7   : > { %v2039_v8 = vpop.f32.mrf.mxu2 }
 0x7c8   : > { %v3831_v8 = vld [vmem:[%s5331_s22 + $0x84] sm:$0xf] }
 0x7e8   : > { %v2222_v31 = vpop.f32.mrf.mxu1 }
 0x7e9   : > { %v2228_v11 = vadd.f32 %v2222_v31, %v2043_v10  ;;  %v3575_v10 = vld [vmem:[%s5331_s22 + $0x90] sm:$0xf0]  ;;  %v3581_v31 = vld [vmem:[%s5331_s22 + $0x88] sm:$0xf] }
 0x7eb   : > { %v2234_v0 = vadd.f32 %v4005_v18, %v2228_v11  ;;  %v3837_v18 = vld [vmem:[%s5331_s22 + $0xac] sm:$0xf0]  ;;  %v3834_v11 = vld [vmem:[%s5331_s22 + $0x94] sm:$0xf0] }
 0x7ec   : > { %v3590_v60 = vor.u32 %v3837_v18, %v3589_v58  ;;  %v3530_v58 = vor.u32 %v3819_v22, %v3527_v42  ;;  %v3534_v18 = vor.u32 %v3822_v55, %v3533_v63 }
 0x7ed   : > { %v5006_v13 = vadd.f32 %v4097_v14, %v2234_v0  ;;  %v3578_v0 = vor.u32 %v3831_v8, %v3575_v10  ;;  %v3582_v14 = vor.u32 %v3834_v11, %v3581_v31  ;;  %v3518_v8 = vor.u32 %v3818_v6, %v3517_v5  ;;  %v3519_v10 = vld [vmem:[%s5331_s22 + $0x18] sm:$0xf0]  ;;  %v3866_v5 = vld [vmem:[%s4652_s7 + $0x98] sm:$0xff] }
 0x7ee   : > { %2485 = vmatpush.bf16.msra.mxu2 %v3590_v60  ;;  %v3535_v60 = vld [vmem:[%s5331_s22 + $0x38] sm:$0xf0]  ;;  %v3874_v6 = vld [vmem:[%s4652_s7 + $0xd8] sm:$0xff] }
 0x7ef   : > { %v2242_v15 = vsel %vm1219_vm1, %v5006_v13, 0.0  ;;  %2504 = vmatpush.bf16.msra.mxu3 %v3578_v0  ;;  %2522 = vmatpush.bf16.msra.mxu0 %v3582_v14  ;;  %v3538_v62 = vor.u32 %v3820_v25, %v3535_v60  ;;  %v3854_v25 = vld [vmem:[%s4652_s7 + $0x38] sm:$0xff] }
 0x7f0   : > { %2243 = vadd.xlane.f32.xlu2 %v2242_v15  ;;  %v2224_v12 = vpop.f32.mrf.mxu1  ;;  %v3832_v15 = vld [vmem:[%s5331_s22 + $0x8c] sm:$0xf]  ;;  %v3862_v60 = vld [vmem:[%s4652_s7 + $0x78] sm:$0xff] }
 0x7f1   : > { %v3583_v12 = vld [vmem:[%s5331_s22 + $0x98] sm:$0xf0] }
 0x7f2   : > { %2486 = vmatpush.bf16.msra.mxu2 %v3574_v9  ;;  %v3816_v9 = vld [vmem:[%s5331_s22 + $0xc] sm:$0xf] }
 0x7f3   : > { %v3522_v31 = vor.u32 %v3816_v9, %v3519_v10  ;;  %v3859_v9 = vld [vmem:[%s4652_s7 + $0x60] sm:$0xff]  ;;  %v3865_v10 = vld [vmem:[%s4652_s7 + $0x90] sm:$0xff] }
 0x82d   : > { %v2239_v16 = vpop.xlane.xlu0 %2238 }
 0x82e   : > { %v2245_v1 = vmul.f32 %v2239_v16, %v4675_v54  ;;  %v3586_v16 = vor.u32 %v3832_v15, %v3583_v12 }
 0x830   : > { %v5012_v17 = vsub.f32 %v4999_v43, %v2245_v1  ;;  %v3557_v1 = vld [vmem:[%s5331_s22 + $0x60] sm:$0xf]  ;;  %2540 = vmatpush.bf16.msra.mxu1 %v3586_v16 }
 0x832   : > { %v2251_v32 = vmul.f32 %v5012_v17, %v5012_v17 }
 0x834   : > { %2254 = vadd.xlane.f32.xlu2 %v2251_v32  ;;  %v3829_v32 = vld [vmem:[%s5331_s22 + $0x6c] sm:$0xf0]  ;;  %2541 = vmatpush.bf16.msra.mxu1 %v3570_v38 }
 0x835   : > { %v2241_v19 = vpop.xlane.xlu2 %2240 }
 0x836   : > { %v2246_v21 = vmul.f32 %v2241_v19, %v4675_v54  ;;  %v3827_v19 = vld [vmem:[%s5331_s22 + $0x64] sm:$0xf] }
 0x838   : > { %v5018_v23 = vsub.f32 %v5002_v7, %v2246_v21  ;;  %v3558_v21 = vor.u32 %v3829_v32, %v3557_v1  ;;  %2542 = vmatpush.bf16.msra.mxu1 %v3554_v51 }
 0x83a   : > { %v2252_v24 = vmul.f32 %v5018_v23, %v5018_v23  ;;  %2487 = vmatpush.bf16.msra.mxu2 %v3558_v21 }
 0x83c   : > { %2256 = vadd.xlane.f32.xlu2 %v2252_v24  ;;  %v3559_v24 = vld [vmem:[%s5331_s22 + $0x70] sm:$0xf0]  ;;  %2543 = vmatpush.bf16.msra.mxu1 %v3538_v62  ;;  %v3876_v62 = vld [vmem:[%s4652_s7 + $0xe8] sm:$0xff] }
 0x83e   : > { %2488 = vmatpush.bf16.msra.mxu2 %v3542_v44  ;;  %v4007_v44 = vld [vmem:[%s872_s15] ss:$0 sm:$0xff] }
 0x840   : > { %2544 = vmatpush.bf16.msra.mxu1 %v3522_v31  ;;  %v3873_v31 = vld [vmem:[%s4652_s7 + $0xd0] sm:$0xff] }
 0x842   : > { %2489 = vmatpush.bf16.msra.mxu2 %v3526_v53 }
 0x846   : > { %2490 = vmatpush.bf16.msra.mxu2 %v3510_v27  ;;  %v3852_v27 = vld [vmem:[%s4652_s7 + $0x28] sm:$0xff] }
 0x84a   : > { %2866 = vmatpush.bf16.msrb.mxu2 %v3854_v25 }
 0x84e   : > { %2867 = vmatpush.bf16.msrb.mxu2 %v3853_v30 }
 0x852   : > { %2868 = vmatpush.bf16.msrb.mxu2 %v3852_v27 }
 0x863   : > { %v2244_v28 = vpop.xlane.xlu2 %2243 }
 0x864   : > { %v2247_v29 = vmul.f32 %v2244_v28, %v4675_v54  ;;  %v3565_v28 = vld [vmem:[%s5331_s22 + $0x68] sm:$0xf] }
 0x866   : > { %v5024_v33 = vsub.f32 %v5006_v13, %v2247_v29  ;;  %v3830_v29 = vld [vmem:[%s5331_s22 + $0x74] sm:$0xf0] }
 0x868   : > { %v2253_v34 = vmul.f32 %v5024_v33, %v5024_v33 }
 0x86a   : > { %v2258_v35 = vsel %vm1219_vm1, %v2253_v34, 0.0  ;;  %v3562_v34 = vor.u32 %v3827_v19, %v3559_v24 }
 0x86b   : > { %2259 = vadd.xlane.f32.xlu2 %v2258_v35  ;;  %v3566_v35 = vor.u32 %v3830_v29, %v3565_v28 }
 0x86c   : > { %2505 = vmatpush.bf16.msra.mxu3 %v3562_v34 }
 0x86d   : > { %2523 = vmatpush.bf16.msra.mxu0 %v3566_v35 }
 0x870   : > { %2506 = vmatpush.bf16.msra.mxu3 %v3546_v47 }
 0x871   : > { %2524 = vmatpush.bf16.msra.mxu0 %v3550_v48 }
 0x874   : > { %2507 = vmatpush.bf16.msra.mxu3 %v3530_v58  ;;  %v3878_v58 = vld [vmem:[%s4652_s7 + $0xf8] sm:$0xff] }
 0x875   : > { %2525 = vmatpush.bf16.msra.mxu0 %v3534_v18  ;;  %2920 = vmatpush.bf16.msrb.mxu1 %v3878_v58  ;;  %v3869_v18 = vld [vmem:[%s4652_s7 + $0xb0] sm:$0xff] }
 0x878   : > { %2508 = vmatpush.bf16.msra.mxu3 %v3514_v4  ;;  %v3860_v4 = vld [vmem:[%s4652_s7 + $0x68] sm:$0xff] }
 0x879   : > { %2526 = vmatpush.bf16.msra.mxu0 %v3518_v8  ;;  %v3851_v8 = vld [vmem:[%s4652_s7 + $0x20] sm:$0xff] }
 0x87a   : > { %2869 = vmatpush.bf16.msrb.mxu2 %v3851_v8 }
 0x87c   : > { %2884 = vmatpush.bf16.msrb.mxu3 %v3862_v60 }
 0x880   : > { %2885 = vmatpush.bf16.msrb.mxu3 %v3861_v2 }
 0x884   : > { %2886 = vmatpush.bf16.msrb.mxu3 %v3860_v4 }
 0x888   : > { %2887 = vmatpush.bf16.msrb.mxu3 %v3859_v9 }
 0x8a7   : > { %v2255_v49 = vpop.xlane.xlu2 %2254 }
 0x8a8   : > { %v2261_v56 = vmul.f32 %v2255_v49, %v4675_v54 }
 0x8aa   : > { %v2264_v3 = vadd.f32 1e-06, %v2261_v56  ;;  %v3870_v56 = vld [vmem:[%s4652_s7 + $0xb8] sm:$0xff] }
 0x8ab   : > { %2902 = vmatpush.bf16.msrb.mxu0 %v3870_v56 }
 0x8ac   : > { %4065 = vrsqrt.f32 %v2264_v3  ;;  %vm2273_vm13 = vweird.f32 %v2264_v3 }
 0x8af   : > { %v2257_v11 = vpop.xlane.xlu2 %2256  ;;  %2903 = vmatpush.bf16.msrb.mxu0 %v3869_v18 }
 0x8b0   : > { %v2262_v0 = vmul.f32 %v2257_v11, %v4675_v54  ;;  %v1149_v11 = vld [vmem:[%s4645_s9] sm:$0xf] }
 0x8b2   : > { %v4066_v14 = vpop.eup %4065  ;;  %v2265_v15 = vadd.f32 1e-06, %v2262_v0  ;;  %v3850_v0 = vld [vmem:[%s4652_s7 + $0x18] sm:$0xff] }
 0x8b3   : > { %v2268_v12 = vmul.f32 %v4066_v14, %v2264_v3  ;;  %vm2274_vm12 = vweird.f32 %v4066_v14  ;;  %2904 = vmatpush.bf16.msrb.mxu0 %v3868_v61  ;;  %v3875_v3 = vld [vmem:[%s4652_s7 + $0xe0] sm:$0xff]  ;;  %2870 = vmatpush.bf16.msrb.mxu2 %v3850_v0 }
 0x8b4   : > { %4067 = vrsqrt.f32 %v2265_v15  ;;  %vm2275_vm10 = vmor %vm2273_vm13, %vm2274_vm12  ;;  %vm2283_vm14 = vweird.f32 %v2265_v15 }
 0x8b5   : > { %v2269_v16 = vmul.f32 %v4066_v14, %v2268_v12  ;;  %v3872_v12 = vld [vmem:[%s4652_s7 + $0xc8] sm:$0xff] }
 0x8b7   : > { %v2270_v1 = vmul.f32 0.5, %v2269_v16  ;;  %2905 = vmatpush.bf16.msrb.mxu0 %v3867_v20  ;;  %v5134_v16 = vperm.slane %v1149_v11, 2 }
 0x8b9   : > { %v2271_v32 = vsub.f32 1.5, %v2270_v1  ;;  %v5136_v1 = vperm.slane %v1149_v11, 3 }
 0x8ba   : > { %v4068_v19 = vpop.eup %4067 }
 0x8bb   : > { %v2272_v21 = vmul.f32 %v4066_v14, %v2271_v32  ;;  %v2278_v24 = vmul.f32 %v4068_v19, %v2265_v15  ;;  %vm2284_vm11 = vweird.f32 %v4068_v19  ;;  %2906 = vmatpush.bf16.msrb.mxu0 %v3866_v5  ;;  %v3864_v15 = vld [vmem:[%s4652_s7 + $0x88] sm:$0xff]  ;;  %v3849_v32 = vld [vmem:[%s4652_s7 + $0x10] sm:$0xff] }
 0x8bc   : > { %vm2285_vm15 = vmor %vm2283_vm14, %vm2284_vm11  ;;  %2871 = vmatpush.bf16.msrb.mxu2 %v3849_v32 }
 0x8bd   : > { %v2279_v28 = vmul.f32 %v4068_v19, %v2278_v24  ;;  %v2276_v29 = vsel %vm2275_vm10, %v4066_v14, %v2272_v21  ;;  %v3858_v14 = vld [vmem:[%s4652_s7 + $0x58] sm:$0xff] }
 0x8be   : > { %v2297_v36 = vmul.f32 %v2276_v29, %v5012_v17  ;;  %2888 = vmatpush.bf16.msrb.mxu3 %v3858_v14  ;;  %v3871_v29 = vld [vmem:[%s4652_s7 + $0xc0] sm:$0xff] }
 0x8bf   : > { %v2280_v34 = vmul.f32 0.5, %v2279_v28  ;;  %2907 = vmatpush.bf16.msrb.mxu0 %v3865_v10  ;;  %v3863_v28 = vld [vmem:[%s4652_s7 + $0x80] sm:$0xff] }
 0x8c0   : > { %v2303_v41 = vmul.f32 %v4006_v37, %v2297_v36  ;;  %v5148_v36 = vperm.slane %v1149_v11, 0 }
 0x8c1   : > { %v2281_v35 = vsub.f32 1.5, %v2280_v34 }
 0x8c2   : > { %v2309_v46 = vadd.f32 %v4007_v44, %v2303_v41 }
 0x8c3   : > { %v2282_v38 = vmul.f32 %v4068_v19, %v2281_v35  ;;  %2908 = vmatpush.bf16.msrb.mxu0 %v3864_v15 }
 0x8c5   : > { %v2286_v39 = vsel %vm2285_vm15, %v4068_v19, %v2282_v38  ;;  %v3857_v19 = vld [vmem:[%s4652_s7 + $0x50] sm:$0xff]  ;;  %v3848_v38 = vld [vmem:[%s4652_s7 + $0x8] sm:$0xff] }
 0x8c6   : > { %v2298_v40 = vmul.f32 %v2286_v39, %v5018_v23  ;;  %2889 = vmatpush.bf16.msrb.mxu3 %v3857_v19  ;;  %v3856_v39 = vld [vmem:[%s4652_s7 + $0x48] sm:$0xff]  ;;  %2872 = vmatpush.bf16.msrb.mxu2 %v3848_v38 }
 0x8c7   : > { %2909 = vmatpush.bf16.msrb.mxu0 %v3863_v28 }
 0x8c8   : > { %v2304_v45 = vmul.f32 %v4006_v37, %v2298_v40 }
 0x8ca   : > { %v2310_v17 = vadd.f32 %v4007_v44, %v2304_v45  ;;  %2890 = vmatpush.bf16.msrb.mxu3 %v3856_v39 }
 0x8cc   : > { %v2312_v57 = vpack.c.bf16 %v2310_v17, %v2309_v46 }
 0x8ce   : > { %2491 = vmatmul.bf16.vlgmr.msra.gmra.mxu2 %v2312_v57  ;;  %2509 = vmatmul.bf16.vlgmr.msra.gmra.mxu3 %v2312_v57 }
 0x8cf   : > { %2527 = vmatmul.bf16.vlgmr.msra.gmra.mxu0 %v2312_v57  ;;  %2545 = vmatmul.bf16.vlgmr.msra.gmra.mxu1 %v2312_v57 }
 0x8de   : > { %v2260_v47 = vpop.xlane.xlu2 %2259 }
 0x8df   : > { %v2263_v48 = vmul.f32 %v2260_v47, %v4675_v54 }
 0x8e1   : > { %v2266_v59 = vadd.f32 1e-06, %v2263_v48  ;;  %v3847_v48 = vld [vmem:[%s4652_s7] sm:$0xff] }
 0x8e2   : > { %2873 = vmatpush.bf16.msrb.mxu2 %v3847_v48 }
 0x8e3   : > { %4069 = vrsqrt.f32 %v2266_v59  ;;  %vm2293_vm2 = vweird.f32 %v2266_v59 }
 0x8e9   : > { %v4070_v23 = vpop.eup %4069 }
 0x8ea   : > { %v2288_v50 = vmul.f32 %v4070_v23, %v2266_v59  ;;  %vm2294_vm0 = vweird.f32 %v4070_v23  ;;  %v3855_v59 = vld [vmem:[%s4652_s7 + $0x40] sm:$0xff] }
 0x8eb   : > { %vm2295_vm3 = vmor %vm2293_vm2, %vm2294_vm0  ;;  %2891 = vmatpush.bf16.msrb.mxu3 %v3855_v59 }
 0x8ec   : > { %v2289_v51 = vmul.f32 %v4070_v23, %v2288_v50 }
 0x8ee   : > { %v2290_v52 = vmul.f32 0.5, %v2289_v51 }
 0x8f0   : > { %v2291_v26 = vsub.f32 1.5, %v2290_v52 }
 0x8f2   : > { %v2292_v22 = vmul.f32 %v4070_v23, %v2291_v26 }
 0x8f4   : > { %v2296_v49 = vsel %vm2295_vm3, %v4070_v23, %v2292_v22 }
 0x8f5   : > { %v2299_v53 = vmul.f32 %v2296_v49, %v5024_v33  ;;  %v3877_v33 = vld [vmem:[%s4652_s7 + $0xf0] sm:$0xff] }
 0x8f6   : > { %2921 = vmatpush.bf16.msrb.mxu1 %v3877_v33 }
 0x8f7   : > { %v2305_v42 = vmul.f32 %v4006_v37, %v2299_v53  ;;  %v5150_v37 = vperm.slane %v1149_v11, 1 }
 0x8f9   : > { %v2311_v63 = vadd.f32 %v4007_v44, %v2305_v42 }
 0x8fa   : > { %2922 = vmatpush.bf16.msrb.mxu1 %v3876_v62 }
 0x8fb   : > { %v2313_v55 = vpack.c.bf16 %v2311_v63, %v2311_v63 }
 0x8fd   : > { %2496 = vmatmul.bf16.gmra.mxu2 %v2313_v55  ;;  %2514 = vmatmul.bf16.gmra.mxu3 %v2313_v55 }
 0x8fe   : > { %2532 = vmatmul.bf16.gmra.mxu0 %v2313_v55  ;;  %2550 = vmatmul.bf16.gmra.mxu1 %v2313_v55 }
 0x8ff   : > { %2923 = vmatpush.bf16.msrb.mxu1 %v3875_v3 }
 0x903   : > { %2924 = vmatpush.bf16.msrb.mxu1 %v3874_v6 }
 0x907   : > { %2925 = vmatpush.bf16.msrb.mxu1 %v3873_v31 }
 0x90b   : > { %2926 = vmatpush.bf16.msrb.mxu1 %v3872_v12 }
 0x90f   : > { %2927 = vmatpush.bf16.msrb.mxu1 %v3871_v29 }
 0x94c   : > { %v2528_v21 = vpop.f32.mrf.mxu0  ;;  %v2546_v24 = vpop.f32.mrf.mxu1 }
 0x94d   : > { %v5143_v34 = vadd.f32 %v2528_v21, %v5134_v16  ;;  %v5146_v35 = vadd.f32 %v2546_v24, %v5136_v1 }
 0x94f   : > { %v2557_v40 = vmul.f32 %v5143_v34, %v5143_v34  ;;  %v2558_v41 = vmul.f32 %v5146_v35, %v5146_v35 }
 0x951   : > { %v2569_v44 = vmul.f32 %v2557_v40, %v5143_v34  ;;  %v2570_v45 = vmul.f32 %v2558_v41, %v5146_v35  ;;  %v2492_v46 = vpop.f32.mrf.mxu2  ;;  %v2510_v17 = vpop.f32.mrf.mxu3 }
 0x952   : > { %v5161_v57 = vadd.f32 %v2492_v46, %v5148_v36  ;;  %v5164_v47 = vadd.f32 %v2510_v17, %v5150_v37 }
 0x953   : > { %v2581_v23 = vmul.f32 0.044715, %v2569_v44  ;;  %v2582_v50 = vmul.f32 0.044715, %v2570_v45 }
 0x954   : > { %v2555_v51 = vmul.f32 %v5161_v57, %v5161_v57  ;;  %v2556_v52 = vmul.f32 %v5164_v47, %v5164_v47  ;;  %v2530_v26 = vpop.f32.mrf.mxu0  ;;  %v2548_v22 = vpop.f32.mrf.mxu1 }
 0x955   : > { %v2593_v49 = vadd.f32 %v2581_v23, %v5143_v34  ;;  %v2594_v53 = vadd.f32 %v2582_v50, %v5146_v35  ;;  %v2531_v42 = vadd.f32 %v2530_v26, %v5134_v16  ;;  %v5176_v63 = vadd.f32 %v2548_v22, %v5136_v1 }
 0x956   : > { %v2567_v55 = vmul.f32 %v2555_v51, %v5161_v57  ;;  %v2568_v56 = vmul.f32 %v2556_v52, %v5164_v47 }
 0x957   : > { %v2605_v58 = vmul.f32 0.7978846, %v2593_v49  ;;  %v2561_v18 = vmul.f32 %v2531_v42, %v2531_v42  ;;  %v2562_v33 = vmul.f32 %v5176_v63, %v5176_v63  ;;  %v2606_v25 = vmul.f32 0.7978846, %v2594_v53 }
 0x958   : > { %v2579_v60 = vmul.f32 0.044715, %v2567_v55  ;;  %v2580_v61 = vmul.f32 0.044715, %v2568_v56 }
 0x959   : > { %v2573_v62 = vmul.f32 %v2561_v18, %v2531_v42  ;;  %v2574_v30 = vmul.f32 %v2562_v33, %v5176_v63  ;;  %v2494_v2 = vpop.f32.mrf.mxu2  ;;  %v2512_v20 = vpop.f32.mrf.mxu3  ;;  %4071 = vtanh.f32 %v2605_v58 }
 0x95a   : > { %v2591_v3 = vadd.f32 %v2579_v60, %v5161_v57  ;;  %v2592_v27 = vadd.f32 %v2580_v61, %v5164_v47  ;;  %v2495_v4 = vadd.f32 %v2494_v2, %v5148_v36  ;;  %v2513_v8 = vadd.f32 %v2512_v20, %v5150_v37 }
 0x95b   : > { %v2585_v5 = vmul.f32 0.044715, %v2573_v62  ;;  %v2586_v6 = vmul.f32 0.044715, %v2574_v30  ;;  %4073 = vtanh.f32 %v2606_v25 }
 0x95c   : > { %v2603_v9 = vmul.f32 0.7978846, %v2591_v3  ;;  %v2604_v10 = vmul.f32 0.7978846, %v2592_v27  ;;  %v2559_v31 = vmul.f32 %v2495_v4, %v2495_v4  ;;  %v2560_v14 = vmul.f32 %v2513_v8, %v2513_v8 }
 0x95d   : > { %v2597_v11 = vadd.f32 %v2585_v5, %v2531_v42  ;;  %v2598_v0 = vadd.f32 %v2586_v6, %v5176_v63 }
 0x95e   : > { %v2571_v15 = vmul.f32 %v2559_v31, %v2495_v4  ;;  %4075 = vtanh.f32 %v2603_v9  ;;  %v2572_v19 = vmul.f32 %v2560_v14, %v2513_v8 }
 0x95f   : > { %v2609_v12 = vmul.f32 0.7978846, %v2597_v11  ;;  %v2610_v32 = vmul.f32 0.7978846, %v2598_v0  ;;  %4077 = vtanh.f32 %v2604_v10  ;;  %v4072_v24 = vpop.eup %4071 }
 0x960   : > { %v2583_v21 = vmul.f32 0.044715, %v2571_v15  ;;  %v2584_v28 = vmul.f32 0.044715, %v2572_v19  ;;  %v2629_v40 = vadd.f32 1.0, %v4072_v24 }
 0x961   : > { %4079 = vtanh.f32 %v2609_v12  ;;  %v4074_v29 = vpop.eup %4073 }
 0x962   : > { %4081 = vtanh.f32 %v2610_v32  ;;  %v2595_v38 = vadd.f32 %v2583_v21, %v2495_v4  ;;  %v2596_v39 = vadd.f32 %v2584_v28, %v2513_v8  ;;  %v2630_v45 = vadd.f32 1.0, %v4074_v29 }
 0x963   : > { %v2641_v23 = vmul.f32 0.5, %v2629_v40 }
 0x964   : > { %v2607_v41 = vmul.f32 0.7978846, %v2595_v38  ;;  %v4076_v44 = vpop.eup %4075  ;;  %v2608_v46 = vmul.f32 0.7978846, %v2596_v39  ;;  %v2642_v51 = vmul.f32 0.5, %v2630_v45 }
 0x965   : > { %v4078_v17 = vpop.eup %4077  ;;  %v2627_v52 = vadd.f32 1.0, %v4076_v44  ;;  %v2653_v56 = vmul.f32 %v2641_v23, %v5143_v34 }
 0x966   : > { %4083 = vtanh.f32 %v2607_v41  ;;  %v2628_v22 = vadd.f32 1.0, %v4078_v17  ;;  %v2654_v33 = vmul.f32 %v2642_v51, %v5146_v35 }
 0x967   : > { %v4080_v48 = vpop.eup %4079  ;;  %4085 = vtanh.f32 %v2608_v46  ;;  %v2639_v25 = vmul.f32 0.5, %v2627_v52 }
 0x968   : > { %v4082_v59 = vpop.eup %4081  ;;  %v2633_v50 = vadd.f32 1.0, %v4080_v48  ;;  %v2640_v62 = vmul.f32 0.5, %v2628_v22 }
 0x969   : > { %v2634_v26 = vadd.f32 1.0, %v4082_v59  ;;  %v2651_v5 = vmul.f32 %v2639_v25, %v5161_v57 }
 0x96a   : > { %v2645_v49 = vmul.f32 0.5, %v2633_v50  ;;  %v2652_v34 = vmul.f32 %v2640_v62, %v5164_v47 }
 0x96b   : > { %v2646_v53 = vmul.f32 0.5, %v2634_v26 }
 0x96c   : > { %v4084_v55 = vpop.eup %4083  ;;  %v2657_v58 = vmul.f32 %v2645_v49, %v2531_v42 }
 0x96d   : > { %v4086_v18 = vpop.eup %4085  ;;  %v2658_v60 = vmul.f32 %v2646_v53, %v5176_v63  ;;  %v2631_v61 = vadd.f32 1.0, %v4084_v55 }
 0x96e   : > { %v2632_v30 = vadd.f32 1.0, %v4086_v18  ;;  %v2665_v2 = vpack.c.bf16 %v2657_v58, %v2653_v56 }
 0x96f   : > { %v2643_v20 = vmul.f32 0.5, %v2631_v61  ;;  %v2666_v3 = vpack.c.bf16 %v2658_v60, %v2654_v33 }
 0x970   : > { %v2644_v27 = vmul.f32 0.5, %v2632_v30  ;;  %2910 = vmatmul.bf16.vlgmr.msrb.gmra.mxu0 %v2665_v2 }
 0x971   : > { %v2655_v6 = vmul.f32 %v2643_v20, %v2495_v4  ;;  %2928 = vmatmul.bf16.vlgmr.msrb.gmra.mxu1 %v2666_v3  ;;  %v4008_v3 = vld [vmem:[%s879_s25] ss:$0 sm:$0xff] }
 0x972   : > { %v2656_v42 = vmul.f32 %v2644_v27, %v2513_v8 }
 0x973   : > { %v2663_v9 = vpack.c.bf16 %v2655_v6, %v2651_v5 }
 0x974   : > { %v2664_v35 = vpack.c.bf16 %v2656_v42, %v2652_v34 }
 0x975   : > { %2874 = vmatmul.bf16.vlgmr.msrb.gmra.mxu2 %v2663_v9 }
 0x976   : > { %2892 = vmatmul.bf16.vlgmr.msrb.gmra.mxu3 %v2664_v35 }
 0x97b   : > { %v2533_v63 = vpop.f32.mrf.mxu0  ;;  %v2551_v10 = vpop.f32.mrf.mxu1 }
 0x97c   : > { %v2534_v31 = vadd.f32 %v2533_v63, %v5134_v16  ;;  %v2552_v11 = vadd.f32 %v2551_v10, %v5136_v1 }
 0x97e   : > { %v2565_v0 = vmul.f32 %v2534_v31, %v2534_v31  ;;  %v2566_v14 = vmul.f32 %v2552_v11, %v2552_v11 }
 0x980   : > { %v2577_v15 = vmul.f32 %v2565_v0, %v2534_v31  ;;  %v2578_v12 = vmul.f32 %v2566_v14, %v2552_v11  ;;  %v2497_v57 = vpop.f32.mrf.mxu2  ;;  %v2515_v4 = vpop.f32.mrf.mxu3 }
 0x981   : > { %v2498_v32 = vadd.f32 %v2497_v57, %v5148_v36  ;;  %v2516_v47 = vadd.f32 %v2515_v4, %v5150_v37 }
 0x982   : > { %v2589_v8 = vmul.f32 0.044715, %v2577_v15  ;;  %v2590_v19 = vmul.f32 0.044715, %v2578_v12 }
 0x983   : > { %v2563_v21 = vmul.f32 %v2498_v32, %v2498_v32  ;;  %v2564_v24 = vmul.f32 %v2516_v47, %v2516_v47  ;;  %v2535_v28 = vpop.f32.mrf.mxu0  ;;  %v2553_v29 = vpop.f32.mrf.mxu1 }
 0x984   : > { %v2601_v38 = vadd.f32 %v2589_v8, %v2534_v31  ;;  %v2602_v16 = vadd.f32 %v2590_v19, %v2552_v11 }
 0x985   : > { %v2575_v39 = vmul.f32 %v2563_v21, %v2498_v32  ;;  %v2576_v1 = vmul.f32 %v2564_v24, %v2516_v47 }
 0x986   : > { %v2613_v40 = vmul.f32 0.7978846, %v2601_v38  ;;  %v2614_v41 = vmul.f32 0.7978846, %v2602_v16 }
 0x987   : > { %v2587_v44 = vmul.f32 0.044715, %v2575_v39  ;;  %v2588_v45 = vmul.f32 0.044715, %v2576_v1 }
 0x988   : > { %v2499_v46 = vpop.f32.mrf.mxu2  ;;  %v2517_v17 = vpop.f32.mrf.mxu3  ;;  %4087 = vtanh.f32 %v2613_v40 }
 0x989   : > { %4089 = vtanh.f32 %v2614_v41  ;;  %v2599_v36 = vadd.f32 %v2587_v44, %v2498_v32  ;;  %v2600_v37 = vadd.f32 %v2588_v45, %v2516_v47 }
 0x98b   : > { %v2611_v48 = vmul.f32 0.7978846, %v2599_v36  ;;  %v2612_v59 = vmul.f32 0.7978846, %v2600_v37 }
 0x98d   : > { %4091 = vtanh.f32 %v2611_v48 }
 0x98e   : > { %v4088_v23 = vpop.eup %4087  ;;  %4093 = vtanh.f32 %v2612_v59 }
 0x98f   : > { %v4090_v50 = vpop.eup %4089  ;;  %v2637_v51 = vadd.f32 1.0, %v4088_v23 }
 0x990   : > { %v2638_v52 = vadd.f32 1.0, %v4090_v50 }
 0x991   : > { %v2649_v26 = vmul.f32 0.5, %v2637_v51 }
 0x992   : > { %v2650_v22 = vmul.f32 0.5, %v2638_v52 }
 0x993   : > { %v4092_v49 = vpop.eup %4091  ;;  %v2661_v53 = vmul.f32 %v2649_v26, %v2534_v31 }
 0x994   : > { %v4094_v55 = vpop.eup %4093  ;;  %v2662_v56 = vmul.f32 %v2650_v22, %v2552_v11  ;;  %v2635_v58 = vadd.f32 1.0, %v4092_v49 }
 0x995   : > { %v2669_v18 = vpack.c.bf16 %v2661_v53, %v2661_v53  ;;  %v2636_v33 = vadd.f32 1.0, %v4094_v55 }
 0x996   : > { %v2670_v25 = vpack.c.bf16 %v2662_v56, %v2662_v56  ;;  %v2647_v60 = vmul.f32 0.5, %v2635_v58 }
 0x997   : > { %2915 = vmatmul.bf16.gmra.mxu0 %v2669_v18  ;;  %v2648_v61 = vmul.f32 0.5, %v2636_v33 }
 0x998   : > { %2933 = vmatmul.bf16.gmra.mxu1 %v2670_v25  ;;  %v2659_v62 = vmul.f32 %v2647_v60, %v2498_v32 }
 0x999   : > { %v2660_v30 = vmul.f32 %v2648_v61, %v2516_v47 }
 0x99a   : > { %v2667_v2 = vpack.c.bf16 %v2659_v62, %v2659_v62 }
 0x99b   : > { %v2668_v20 = vpack.c.bf16 %v2660_v30, %v2660_v30 }
 0x99c   : > { %2879 = vmatmul.bf16.gmra.mxu2 %v2667_v2 }
 0x99d   : > { %2897 = vmatmul.bf16.gmra.mxu3 %v2668_v20 }
 0x9ed   : > { %v2911_v34 = vpop.f32.mrf.mxu0 }
 0x9ee   : > { %v2929_v9 = vpop.f32.mrf.mxu1 }
 0x9f5   : > { %v2913_v15 = vpop.f32.mrf.mxu0 }
 0x9f6   : > { %v2931_v57 = vpop.f32.mrf.mxu1 }
 0x9f8   : > { %v2875_v27 = vpop.f32.mrf.mxu2 }
 0x9f9   : > { %v2876_v5 = vadd.f32 %v4008_v3, %v2875_v27  ;;  %v2893_v6 = vpop.f32.mrf.mxu3 }
 0x9fb   : > { %v2894_v42 = vadd.f32 %v2893_v6, %v2876_v5 }
 0x9fd   : > { %v2912_v35 = vadd.f32 %v2911_v34, %v2894_v42 }
 0x9ff   : > { %v2930_v63 = vadd.f32 %v2929_v9, %v2912_v35 }
 0xa00   : > { %v2877_v10 = vpop.f32.mrf.mxu2 }
 0xa01   : > { %v2938_v31 = vadd.f32 %v2930_v63, %v4999_v43  ;;  %v2878_v11 = vadd.f32 %v4008_v3, %v2877_v10  ;;  %v2895_v0 = vpop.f32.mrf.mxu3 }
 0xa03   : > { %2941 = vst [vmem:[#allocation2 + $0x10] sm:$0xff] %v2938_v31  ;;  %v2896_v14 = vadd.f32 %v2895_v0, %v2878_v11 }
 0xa05   : > { %v2914_v12 = vadd.f32 %v2913_v15, %v2896_v14 }
 0xa07   : > { %v2932_v4 = vadd.f32 %v2931_v57, %v2914_v12 }
 0xa09   : > { %v2939_v32 = vadd.f32 %v2932_v4, %v5002_v7 }
 0xa0b   : > { %2942 = vst [vmem:[#allocation2] sm:$0xff] %v2939_v32 }
 0xa14   : > { %v2916_v47 = vpop.f32.mrf.mxu0 }
 0xa15   : > { %v2934_v8 = vpop.f32.mrf.mxu1 }
 0xa1c   : > { %v2918_v19 = vpop.f32.mrf.mxu0 }
 0xa1d   : > { %v2936_v21 = vpop.f32.mrf.mxu1 }
 0xa1f   : > { %v2880_v24 = vpop.f32.mrf.mxu2 }
 0xa20   : > { %v2881_v28 = vadd.f32 %v4008_v3, %v2880_v24  ;;  %v2898_v29 = vpop.f32.mrf.mxu3 }
 0xa22   : > { %v2899_v38 = vadd.f32 %v2898_v29, %v2881_v28 }
 0xa24   : > { %v2917_v43 = vadd.f32 %v2916_v47, %v2899_v38 }
 0xa26   : > { %v2935_v16 = vadd.f32 %v2934_v8, %v2917_v43  ;;  %2947 = sbr.rel (%p3763_p5) target bundleno = 2886 (0xb46), region = 120 }
 0xa27   : > { %v2882_v39 = vpop.f32.mrf.mxu2 }
 0xa28   : > { %v2940_v1 = vadd.f32 %v2935_v16, %v5006_v13  ;;  %v2900_v40 = vpop.f32.mrf.mxu3 }
 0xa2a   : > { %2943 = vst [vmem:[#allocation2 + $0x8] sm:$0x1] %v2940_v1 }
 0xa2b   : > { %v2949_v7 = vld [vmem:[#allocation2] sm:$0xff]  ;;  %v2948_v45 = vld [vmem:[#allocation2 + $0x10] sm:$0xff] }
 0xa2c   : > { %2955 = vadd.xlane.f32.xlu1 %v2949_v7  ;;  %v4098_v34 = vld [vmem:[%s5335_s17] ss:$0 sm:$0xff] }
 0xa2d   : > { %v4099_v35 = vld [vmem:[%s5336_s24] ss:$0 sm:$0xff] }
 0xa31   : > { %v2950_v41 = vld [vmem:[#allocation2 + $0x8] sm:$0x1] }
 0xa32   : > { %v2957_v44 = vsel %vm1219_vm1, %v2950_v41, 0.0 }
 0xa33   : > { %2958 = vadd.xlane.f32.xlu0 %v2957_v44 }
 0xa3b   : > { %2953 = vadd.xlane.f32.xlu0 %v2948_v45 }
 0xa9f   : > { %v2956_v46 = vpop.xlane.xlu1 %2955 }
 0xaa0   : > { %v2961_v17 = vmul.f32 %v2956_v46, %v4675_v54 }
 0xaa2   : > { %v2964_v13 = vsub.f32 %v2949_v7, %v2961_v17 }
 0xaa4   : > { %v2967_v48 = vmul.f32 %v2964_v13, %v2964_v13 }
 0xaa6   : > { %v2959_v36 = vpop.xlane.xlu0 %2958  ;;  %2971 = vadd.xlane.f32.xlu2 %v2967_v48 }
 0xaa7   : > { %v2962_v37 = vmul.f32 %v2959_v36, %v4675_v54 }
 0xaa9   : > { %v2965_v59 = vsub.f32 %v2950_v41, %v2962_v37 }
 0xaab   : > { %v2968_v51 = vmul.f32 %v2965_v59, %v2965_v59 }
 0xaad   : > { %v2973_v26 = vsel %vm1219_vm1, %v2968_v51, 0.0 }
 0xaae   : > { %v2954_v23 = vpop.xlane.xlu0 %2953  ;;  %2974 = vadd.xlane.f32.xlu2 %v2973_v26 }
 0xaaf   : > { %v2960_v50 = vmul.f32 %v2954_v23, %v4675_v54 }
 0xab1   : > { %v2963_v52 = vsub.f32 %v2948_v45, %v2960_v50 }
 0xab3   : > { %v2966_v22 = vmul.f32 %v2963_v52, %v2963_v52 }
 0xab5   : > { %2969 = vadd.xlane.f32.xlu1 %v2966_v22 }
 0xb19   : > { %v2972_v49 = vpop.xlane.xlu2 %2971 }
 0xb1a   : > { %v2977_v53 = vmul.f32 %v2972_v49, %v4675_v54 }
 0xb1c   : > { %v2980_v55 = vadd.f32 1e-06, %v2977_v53 }
 0xb1e   : > { %4100 = vrsqrt.f32 %v2980_v55  ;;  %vm2998_vm4 = vweird.f32 %v2980_v55 }
 0xb21   : > { %v2975_v56 = vpop.xlane.xlu2 %2974 }
 0xb22   : > { %v2978_v58 = vmul.f32 %v2975_v56, %v4675_v54 }
 0xb24   : > { %v4101_v25 = vpop.eup %4100  ;;  %v2981_v60 = vadd.f32 1e-06, %v2978_v58 }
 0xb25   : > { %v2993_v61 = vmul.f32 %v4101_v25, %v2980_v55  ;;  %vm2999_vm1 = vweird.f32 %v4101_v25 }
 0xb26   : > { %4102 = vrsqrt.f32 %v2981_v60  ;;  %vm3000_vm5 = vmor %vm2998_vm4, %vm2999_vm1  ;;  %vm3008_vm8 = vweird.f32 %v2981_v60 }
 0xb27   : > { %v2994_v30 = vmul.f32 %v4101_v25, %v2993_v61 }
 0xb28   : > { %v2970_v18 = vpop.xlane.xlu1 %2969 }
 0xb29   : > { %v2976_v33 = vmul.f32 %v2970_v18, %v4675_v54  ;;  %v2995_v2 = vmul.f32 0.5, %v2994_v30 }
 0xb2b   : > { %v2979_v62 = vadd.f32 1e-06, %v2976_v33  ;;  %v2996_v20 = vsub.f32 1.5, %v2995_v2 }
 0xb2c   : > { %v4103_v3 = vpop.eup %4102 }
 0xb2d   : > { %4104 = vrsqrt.f32 %v2979_v62  ;;  %v2997_v5 = vmul.f32 %v4101_v25, %v2996_v20  ;;  %v3003_v6 = vmul.f32 %v4103_v3, %v2981_v60  ;;  %vm3009_vm6 = vweird.f32 %v4103_v3 }
 0xb2e   : > { %vm3010_vm9 = vmor %vm3008_vm8, %vm3009_vm6  ;;  %vm2988_vm12 = vweird.f32 %v2979_v62 }
 0xb2f   : > { %v3001_v42 = vsel %vm3000_vm5, %v4101_v25, %v2997_v5  ;;  %v3004_v9 = vmul.f32 %v4103_v3, %v3003_v6 }
 0xb30   : > { %v3013_v63 = vmul.f32 %v3001_v42, %v2964_v13 }
 0xb31   : > { %v3005_v31 = vmul.f32 0.5, %v3004_v9 }
 0xb32   : > { %v3019_v11 = vmul.f32 %v4098_v34, %v3013_v63 }
 0xb33   : > { %v4105_v27 = vpop.eup %4104  ;;  %v3006_v14 = vsub.f32 1.5, %v3005_v31 }
 0xb34   : > { %v2983_v54 = vmul.f32 %v4105_v27, %v2979_v62  ;;  %v3025_v15 = vadd.f32 %v4099_v35, %v3019_v11  ;;  %vm2989_vm7 = vweird.f32 %v4105_v27 }
 0xb35   : > { %v3007_v57 = vmul.f32 %v4103_v3, %v3006_v14  ;;  %vm2990_vm13 = vmor %vm2988_vm12, %vm2989_vm7 }
 0xb36   : > { %v2984_v10 = vmul.f32 %v4105_v27, %v2983_v54  ;;  %3028 = vst [vmem:[%s4650_s11 + $0x8] sm:$0xff] %v3025_v15 }
 0xb37   : > { %v3011_v32 = vsel %vm3010_vm9, %v4103_v3, %v3007_v57 }
 0xb38   : > { %v2985_v0 = vmul.f32 0.5, %v2984_v10  ;;  %v3014_v47 = vmul.f32 %v3011_v32, %v2965_v59 }
 0xb3a   : > { %v2986_v12 = vsub.f32 1.5, %v2985_v0  ;;  %v3020_v21 = vmul.f32 %v4098_v34, %v3014_v47 }
 0xb3c   : > { %v2987_v4 = vmul.f32 %v4105_v27, %v2986_v12  ;;  %v3026_v28 = vadd.f32 %v4099_v35, %v3020_v21 }
 0xb3e   : > { %v2991_v8 = vsel %vm2990_vm13, %v4105_v27, %v2987_v4  ;;  %3029 = vst [vmem:[%s4650_s11 + $0x10] sm:$0x1] %v3026_v28 }
 0xb3f   : > { %v3012_v19 = vmul.f32 %v2991_v8, %v2963_v52 }
 0xb41   : > { %v3018_v24 = vmul.f32 %v4098_v34, %v3012_v19 }
 0xb43   : > { %v3024_v29 = vadd.f32 %v4099_v35, %v3018_v24 }
 0xb45   : > { %3027 = vst [vmem:[%s4650_s11] sm:$0xff] %v3024_v29 }
 0xb46 PF: > { %s5337_s16 = sld [smem:[#allocation18_spill]] }
 0xb47   : > { %s5338_s27 = sld [smem:[#allocation14_spill]] }
 0xb48   : > { %s5339_s28 = sld [smem:[#allocation15_spill]] }
 0xb49   : > { %s5340_s29 = sld [smem:[#allocation21_spill]] }
 0xb4a   : > { %s5341_s30 = sld [smem:[#allocation16_spill]] }
 0xb4b   : > { %s5342_s0 = sld [smem:[#allocation17_spill]] }
 0xb4c   : > { %s35_s20 = sadd.s32 1, %s5337_s16   ;;  %s5343_s19 = sld [smem:[#allocation19_spill]] }
 0xb4d   : > { %p32_p6 = scmp.ge.s32.totalorder %s35_s20, 6   ;;  %s5344_s1 = sld [smem:[#allocation20_spill]] }
 0xb4f   :  { %34 = sbr.rel (!%p32_p6) target bundleno = 26 (0x1a), region = 207 }
 0xb54   :  { %3051 = vsyncpa [#allocation4], 1 }
 0xb55   :  { %3053 = vsyncpa [#allocation4 + $0x1], 1 }
 0xb56   :  { %3054 = vsyncpa [#allocation6], 1 }
 0xb57   :  { %3056 = vsyncpa [#allocation6 + $0x1], 1 }
 0xb58   :  { %3057 = vsyncpa [#allocation9], 1 }
 0xb59   :  { %3059 = vsyncpa [#allocation9 + $0x1], 1 }

</bundles_post_ra>
